<compile_context>
chip_gen: v5e
topology: v5e:2x2
jax: 0.10.0
libtpu: 0.0.40
codegen_flags: <defaults>
</compile_context>

<pallas_src>
import math
import functools

import numpy as np
import jax
import jax.numpy as jnp
from jax.experimental import pallas as pl
from jax.experimental.pallas import tpu as pltpu


NEG_SLOPE = 0.2                    # FusedLeakyReLU negative_slope
ACT_SCALE = math.sqrt(2.0)         # FusedLeakyReLU scale
RES_SCALE = 1.0 / math.sqrt(2.0)   # (out + skip) / sqrt(2)
VMEM_LIMIT = 32 * 1024 * 1024      # safe scoped-VMEM cap on v5e/v6e/v7x


# ------------------------------- small helpers ------------------------------

def make_blur_kernel(k):
    """Same semantics as the PyTorch make_kernel()."""
    k = np.asarray(k, dtype=np.float32)
    if k.ndim == 1:
        k = k[None, :] * k[:, None]
    k = k / k.sum()
    return k


def _pick_cout_tile(cout):
    if cout % 128 != 0 or cout <= 512:
        return cout
    for t in (512, 256, 128):
        if cout % t == 0:
            return t
    return cout


def space_to_depth(x):
    """(N, H, W, C) with H, W even -> (N, H/2, W/2, 4C); channel order (p, q, c)."""
    N, H, W, C = x.shape
    x = x.reshape(N, H // 2, 2, W // 2, 2, C)
    x = jnp.transpose(x, (0, 1, 3, 2, 4, 5))
    return x.reshape(N, H // 2, W // 2, 4 * C)


def s2d_weight(w4):
    """(4, 4, Cin, Cout) stride-2 conv weight -> (2*2 taps, 4*Cin, Cout) weight
    of the equivalent stride-1 2x2-tap conv on the space-to-depth input."""
    _, _, cin, cout = w4.shape
    w = w4.reshape(2, 2, 2, 2, cin, cout)          # (a, p, b, q, c, o); i=2a+p, j=2b+q
    w = jnp.transpose(w, (0, 2, 1, 3, 4, 5))       # (a, b, p, q, c, o)
    return w.reshape(4, 4 * cin, cout)


def crop_flat(out_flat, Ho, Wp, Wo):
    """(N, Ho*Wp, C) flat conv output -> (N, Ho, Wo, C) (drop the junk columns)."""
    N, Mo, C = out_flat.shape
    assert Mo == Ho * Wp
    return out_flat.reshape(N, Ho, Wp, C)[:, :, :Wo, :]


# ----------------- fused direct conv (im2col fused into the kernel) ----------

def _conv_taps_kernel(*refs, T, Wp, Mo, use_act, use_res, res_scale):
    """Direct TxT-tap stride-1 'valid' conv on a flattened-spatial activation.

    Each tap's A tile is a shifted in-VMEM window of the resident activation
    block (im2col fused, activation read from HBM exactly once).  The whole
    tap/Cin reduction happens inside one grid step -> no K axis, no scratch.
    """
    if use_res:
        x_ref, w_ref, b_ref, r_ref, o_ref = refs
    else:
        x_ref, w_ref, b_ref, o_ref = refs
        r_ref = None

    acc = None
    for i in range(T):
        for j in range(T):
            a = x_ref[0, pl.ds(i * Wp + j, Mo), :]                 # (Mo, Cin) bf16
            p = jnp.dot(a, w_ref[i * T + j],
                        preferred_element_type=jnp.float32)        # MXU, f32 acc
            acc = p if acc is None else acc + p

    acc = acc + b_ref[...]                                         # (1, tco) bias
    if use_act:                                                    # FusedLeakyReLU
        acc = jnp.where(acc >= 0.0, acc, acc * NEG_SLOPE) * ACT_SCALE
    if use_res:                                                    # (out+skip)/sqrt2
        acc = (acc + r_ref[0].astype(jnp.float32)) * res_scale
    o_ref[0] = acc.astype(o_ref.dtype)


def conv_taps_flat(x, w_taps, bias, *, T, use_act, residual=None,
                   res_scale=1.0, out_dtype=jnp.float32):
    """TxT-tap stride-1 'valid' conv (+bias [+LeakyReLU*sqrt2] [+residual merge])
    on a spatially pre-padded NHWC input, with im2col fused into the kernel.

    Returns the *flat* output (N, Ho*Wp, Cout): each output row h occupies Wp
    columns, of which only the first Wo = Wp - T + 1 are valid (caller crops).
    """
    N, Hp, Wp, C = x.shape
    Ho = Hp - T + 1
    Mo = Ho * Wp
    Cout = w_taps.shape[-1]
    assert w_taps.shape == (T * T, C, Cout)

    # One extra zero row keeps the shifted windows of the last (junk) flat rows
    # in bounds; flatten spatial so the activation is a (M, C) matrix.
    xf = jnp.pad(x.astype(jnp.bfloat16), ((0, 0), (0, 1), (0, 0), (0, 0)))
    Mf = (Hp + 1) * Wp
    xf = xf.reshape(N, Mf, C)
    wb = w_taps.astype(jnp.bfloat16)
    bb = bias.reshape(1, Cout).astype(jnp.float32)

    tco = _pick_cout_tile(Cout)
    grid = (N, Cout // tco)

    in_specs = [
        pl.BlockSpec((1, Mf, C), lambda n, co: (n, 0, 0)),
        pl.BlockSpec((T * T, C, tco), lambda n, co: (0, 0, co)),
        pl.BlockSpec((1, tco), lambda n, co: (0, co)),
    ]
    args = [xf, wb, bb]
    use_res = residual is not None
    if use_res:
        in_specs.append(pl.BlockSpec((1, Mo, tco), lambda n, co: (n, 0, co)))
        args.append(residual)

    kern = functools.partial(_conv_taps_kernel, T=T, Wp=Wp, Mo=Mo,
                             use_act=use_act, use_res=use_res,
                             res_scale=res_scale)
    return pl.pallas_call(
        kern,
        out_shape=jax.ShapeDtypeStruct((N, Mo, Cout), out_dtype),
        grid=grid,
        in_specs=in_specs,
        out_specs=pl.BlockSpec((1, Mo, tco), lambda n, co: (n, 0, co)),
        compiler_params=pltpu.CompilerParams(
            dimension_semantics=("parallel", "parallel"),
            vmem_limit_bytes=VMEM_LIMIT),
    )(*args)


# ---------------------------- separable blur kernel --------------------------

def _blur_sep_kernel(x_ref, o_ref, *, taps, Ho, Wo):
    x = x_ref[...].astype(jnp.float32)             # (1, Hp, Wp, tc)
    # vertical (H) pass: contiguous slices along the leading H axis
    v = taps[0] * x[:, 0:Ho]
    for i in range(1, len(taps)):
        v = v + taps[i] * x[:, i:i + Ho]
    # horizontal (W) pass: slices along the sublane axis
    o = taps[0] * v[:, :, 0:Wo]
    for j in range(1, len(taps)):
        o = o + taps[j] * v[:, :, j:j + Wo]
    o_ref[...] = o.astype(o_ref.dtype)


def blur_nhwc(x, taps, pad):
    """upfirdn2d(x, outer(k,k)/sum^2, up=1, down=1, pad=pad) on NHWC input,
    as a separable (vertical + horizontal) FIR Pallas kernel."""
    N, H, W, C = x.shape
    T = len(taps)
    xp = jnp.pad(x, ((0, 0), (pad[0], pad[1]), (pad[0], pad[1]), (0, 0)))
    Hp, Wp = H + pad[0] + pad[1], W + pad[0] + pad[1]
    Ho, Wo = Hp - T + 1, Wp - T + 1
    tc = 128 if C % 128 == 0 else C
    kern = functools.partial(_blur_sep_kernel, taps=taps, Ho=Ho, Wo=Wo)
    return pl.pallas_call(
        kern,
        out_shape=jax.ShapeDtypeStruct((N, Ho, Wo, C), x.dtype),
        grid=(N, C // tc),
        in_specs=[pl.BlockSpec((1, Hp, Wp, tc), lambda n, c: (n, 0, 0, c))],
        out_specs=pl.BlockSpec((1, Ho, Wo, tc), lambda n, c: (n, 0, 0, c)),
        compiler_params=pltpu.CompilerParams(
            dimension_semantics=("parallel", "parallel"),
            vmem_limit_bytes=VMEM_LIMIT),
    )(xp)


# ----------------------------- ResBlock forward -------------------------------

def init_resblock_params(key, in_channel, out_channel):
    k1, k2, k3 = jax.random.split(key, 3)
    return {
        # EqualConv2d weights ~ N(0,1); when activate=True the conv has no bias
        # and FusedLeakyReLU supplies a zero-init bias (matching PyTorch).
        "conv1_w": jax.random.normal(k1, (in_channel, in_channel, 3, 3), jnp.float32),
        "conv1_act_b": jnp.zeros((in_channel,), jnp.float32),
        "conv2_w": jax.random.normal(k2, (out_channel, in_channel, 3, 3), jnp.float32),
        "conv2_act_b": jnp.zeros((out_channel,), jnp.float32),
        "skip_w": jax.random.normal(k3, (out_channel, in_channel, 1, 1), jnp.float32),
    }


def resblock_forward(params, x_nchw, blur_kernel=(1, 3, 3, 1)):
    k1d = np.asarray(blur_kernel, dtype=np.float32)
    k2d = make_blur_kernel(list(blur_kernel))
    k2d_flip = np.ascontiguousarray(k2d[::-1, ::-1])   # upfirdn2d convolves with flipped taps
    taps = tuple(float(v) for v in (k1d[::-1] / k1d.sum()))

    # NCHW -> NHWC once at the module boundary; activations carried in bf16.
    x = jnp.transpose(x_nchw, (0, 2, 3, 1)).astype(jnp.bfloat16)
    N, H, W, Cin = x.shape
    Cout = params["conv2_w"].shape[0]
    assert H % 2 == 0 and W % 2 == 0

    # Shared pad-1 input (used by conv1 and the folded skip conv).
    xp1 = jnp.pad(x, ((0, 0), (1, 1), (1, 1), (0, 0)))          # (N, H+2, W+2, Cin)

    # ---- conv1: ConvLayer(in, in, 3) = 3x3 s1 p1 EqualConv2d + FusedLeakyReLU
    w1 = params["conv1_w"].astype(jnp.float32) * (1.0 / math.sqrt(Cin * 9))
    w1 = jnp.transpose(w1, (2, 3, 1, 0)).reshape(9, Cin, Cin)   # (tap, Cin, Cout)
    out1 = conv_taps_flat(xp1, w1, params["conv1_act_b"], T=3,
                          use_act=True, out_dtype=jnp.bfloat16)
    out1 = crop_flat(out1, Ho=H, Wp=W + 2, Wo=W)                # (N, H, W, Cin) bf16

    # ---- conv2 path blur: upfirdn2d(k, pad=(2,2)) -> (N, H+1, W+1, Cin) bf16
    blurred = blur_nhwc(out1, taps, (2, 2))

    # ---- skip: Blur(pad=(1,1)) + 1x1 stride-2 EqualConv2d, folded into ONE
    #      4x4 stride-2 conv (weight = skip_w * flipped blur kernel), run as a
    #      2x2-tap stride-1 conv on the space-to-depth input (eq-scale 1/sqrt(Cin)).
    sw = params["skip_w"][:, :, 0, 0].astype(jnp.float32) * (1.0 / math.sqrt(Cin))
    w_skip4 = jnp.asarray(k2d_flip)[:, :, None, None] * jnp.transpose(sw, (1, 0))[None, None]
    w_skip = s2d_weight(w_skip4)                                # (4, 4Cin, Cout)
    xs_skip = space_to_depth(xp1)                               # (N, H/2+1, W/2+1, 4Cin)
    skip_flat = conv_taps_flat(xs_skip, w_skip, jnp.zeros((Cout,), jnp.float32),
                               T=2, use_act=False, out_dtype=jnp.bfloat16)

    # ---- conv2: 3x3 stride-2 pad-0 EqualConv2d + FusedLeakyReLU, with the
    #      residual merge (out + skip)/sqrt(2) fused into the epilogue.
    #      (3x3 kernel zero-padded to 4x4 + space-to-depth => 2x2-tap s1 conv;
    #       skip_flat is already on the same flat output grid.)
    w2 = params["conv2_w"].astype(jnp.float32) * (1.0 / math.sqrt(Cin * 9))
    w2 = jnp.transpose(w2, (2, 3, 1, 0))                        # (3,3,Cin,Cout)
    w2 = jnp.pad(w2, ((0, 1), (0, 1), (0, 0), (0, 0)))          # (4,4,Cin,Cout)
    w2 = s2d_weight(w2)                                         # (4, 4Cin, Cout)
    bp = jnp.pad(blurred, ((0, 0), (0, 1), (0, 1), (0, 0)))     # even dims (H+2, W+2)
    xs2 = space_to_depth(bp)                                    # (N, H/2+1, W/2+1, 4Cin)
    out2 = conv_taps_flat(xs2, w2, params["conv2_act_b"], T=2,
                          use_act=True, residual=skip_flat,
                          res_scale=RES_SCALE, out_dtype=jnp.float32)
    out2 = crop_flat(out2, Ho=H // 2, Wp=W // 2 + 1, Wo=W // 2)

    # NHWC -> NCHW at the module boundary.
    return jnp.transpose(out2, (0, 3, 1, 2))


# ---------------------- pure-JAX f32 reference (for testing) -----------------

def resblock_reference(params, x_nchw, blur_kernel=(1, 3, 3, 1)):
    """Pure-JAX reference mirroring the PyTorch module op-for-op."""
    k2d = jnp.asarray(make_blur_kernel(list(blur_kernel)))
    kf = jnp.flip(k2d, (0, 1))
    x = jnp.transpose(x_nchw, (0, 2, 3, 1)).astype(jnp.float32)
    Cin = x.shape[-1]

    def conv(x, w_oihw, stride, padding, scale):
        w = jnp.transpose(w_oihw.astype(jnp.float32), (2, 3, 1, 0)) * scale
        return jax.lax.conv_general_dilated(
            x, w, (stride, stride), [(padding, padding), (padding, padding)],
            dimension_numbers=("NHWC", "HWIO", "NHWC"))

    def blur(x, pad):
        C = x.shape[-1]
        w = jnp.tile(kf[:, :, None, None], (1, 1, 1, C))
        xp = jnp.pad(x, ((0, 0), (pad[0], pad[1]), (pad[0], pad[1]), (0, 0)))
        return jax.lax.conv_general_dilated(
            xp, w, (1, 1), "VALID",
            dimension_numbers=("NHWC", "HWIO", "NHWC"), feature_group_count=C)

    def act(x, b):
        x = x + b.reshape(1, 1, 1, -1)
        return jnp.where(x >= 0, x, x * NEG_SLOPE) * ACT_SCALE

    out = act(conv(x, params["conv1_w"], 1, 1, 1.0 / math.sqrt(Cin * 9)),
              params["conv1_act_b"])
    out = blur(out, (2, 2))
    out = act(conv(out, params["conv2_w"], 2, 0, 1.0 / math.sqrt(Cin * 9)),
              params["conv2_act_b"])
    skip = conv(blur(x, (1, 1)), params["skip_w"], 2, 0, 1.0 / math.sqrt(Cin))
    out = (out + skip) * RES_SCALE
    return jnp.transpose(out, (0, 3, 1, 2))


# ------------------------------------ main -----------------------------------

if __name__ == "__main__":
    key = jax.random.PRNGKey(0)
    kx, kp = jax.random.split(key)

    N, Cin, Cout, H, W = 2, 4, 8, 16, 16
    x = jax.random.normal(kx, (N, Cin, H, W), jnp.float32)
    params = init_resblock_params(kp, Cin, Cout)

    fwd = jax.jit(resblock_forward)
    out = jax.block_until_ready(fwd(params, x))

    assert out.shape == (N, Cout, H // 2, W // 2), out.shape
    assert bool(jnp.all(jnp.isfinite(out)))

    # Tolerance check vs a pure-JAX reference (bf16 MXU path => loose tolerance).
    ref = jax.block_until_ready(jax.jit(resblock_reference)(params, x))
    rel = float(jnp.max(jnp.abs(out - ref)) / (jnp.max(jnp.abs(ref)) + 1e-6))
    assert rel < 5e-2, f"relative error vs reference too large: {rel}"

    print("KERNEL_OK")
</pallas_src>

<mosaic_0001>
module attributes {stable_mosaic.version = 11 : i64} {
  func.func @_conv_taps_kernel(%arg0: i32, %arg1: i32, %arg2: memref<1x342x4xbf16, #tpu.memory_space<vmem>>, %arg3: memref<9x4x4xbf16, #tpu.memory_space<vmem>>, %arg4: memref<1x4xf32, #tpu.memory_space<vmem>>, %arg5: memref<1x288x4xbf16, #tpu.memory_space<vmem>>) attributes {dimension_semantics = [#tpu.dimension_semantics<parallel>, #tpu.dimension_semantics<parallel>], iteration_bounds = array<i64: 2, 1>, scalar_prefetch = 0 : i64, scratch_operands = 0 : i64, tpu.core_type = #tpu.core_type<tc>, window_params = [{transform_indices = @transform_0, window_bounds = array<i64: 1, 342, 4>}, {transform_indices = @transform_1, window_bounds = array<i64: 9, 4, 4>}, {transform_indices = @transform_2, window_bounds = array<i64: 1, 4>}, {transform_indices = @transform_3, window_bounds = array<i64: 1, 288, 4>}]} {
    %c0 = arith.constant 0 : index
    %c0_0 = arith.constant 0 : index
    %c0_1 = arith.constant 0 : index
    %0 = vector.load %arg2[%c0, %c0_0, %c0_1] : memref<1x342x4xbf16, #tpu.memory_space<vmem>>, vector<1x288x4xbf16>
    %1 = vector.shape_cast %0 : vector<1x288x4xbf16> to vector<288x4xbf16>
    %c0_2 = arith.constant 0 : index
    %c0_3 = arith.constant 0 : index
    %c0_4 = arith.constant 0 : index
    %2 = vector.load %arg3[%c0_2, %c0_3, %c0_4] : memref<9x4x4xbf16, #tpu.memory_space<vmem>>, vector<1x4x4xbf16>
    %3 = vector.shape_cast %2 : vector<1x4x4xbf16> to vector<4x4xbf16>
    %cst = arith.constant dense<0.000000e+00> : vector<288x4xf32>
    %4 = tpu.matmul %1, %3, %cst {dimension_numbers = #tpu.dot_dimension_numbers<[1], [0], [0], [1], [0, 0, 1, 1], [], []>} : vector<288x4xbf16>, vector<4x4xbf16>, vector<288x4xf32> -> vector<288x4xf32>
    %c0_5 = arith.constant 0 : index
    %c1 = arith.constant 1 : index
    %c0_6 = arith.constant 0 : index
    %5 = vector.load %arg2[%c0_5, %c1, %c0_6] : memref<1x342x4xbf16, #tpu.memory_space<vmem>>, vector<1x288x4xbf16>
    %6 = vector.shape_cast %5 : vector<1x288x4xbf16> to vector<288x4xbf16>
    %c1_7 = arith.constant 1 : index
    %c0_8 = arith.constant 0 : index
    %c0_9 = arith.constant 0 : index
    %7 = vector.load %arg3[%c1_7, %c0_8, %c0_9] : memref<9x4x4xbf16, #tpu.memory_space<vmem>>, vector<1x4x4xbf16>
    %8 = vector.shape_cast %7 : vector<1x4x4xbf16> to vector<4x4xbf16>
    %cst_10 = arith.constant dense<0.000000e+00> : vector<288x4xf32>
    %9 = tpu.matmul %6, %8, %cst_10 {dimension_numbers = #tpu.dot_dimension_numbers<[1], [0], [0], [1], [0, 0, 1, 1], [], []>} : vector<288x4xbf16>, vector<4x4xbf16>, vector<288x4xf32> -> vector<288x4xf32>
    %10 = arith.addf %4, %9 : vector<288x4xf32>
    %c0_11 = arith.constant 0 : index
    %c2 = arith.constant 2 : index
    %c0_12 = arith.constant 0 : index
    %11 = vector.load %arg2[%c0_11, %c2, %c0_12] : memref<1x342x4xbf16, #tpu.memory_space<vmem>>, vector<1x288x4xbf16>
    %12 = vector.shape_cast %11 : vector<1x288x4xbf16> to vector<288x4xbf16>
    %c2_13 = arith.constant 2 : index
    %c0_14 = arith.constant 0 : index
    %c0_15 = arith.constant 0 : index
    %13 = vector.load %arg3[%c2_13, %c0_14, %c0_15] : memref<9x4x4xbf16, #tpu.memory_space<vmem>>, vector<1x4x4xbf16>
    %14 = vector.shape_cast %13 : vector<1x4x4xbf16> to vector<4x4xbf16>
    %cst_16 = arith.constant dense<0.000000e+00> : vector<288x4xf32>
    %15 = tpu.matmul %12, %14, %cst_16 {dimension_numbers = #tpu.dot_dimension_numbers<[1], [0], [0], [1], [0, 0, 1, 1], [], []>} : vector<288x4xbf16>, vector<4x4xbf16>, vector<288x4xf32> -> vector<288x4xf32>
    %16 = arith.addf %10, %15 : vector<288x4xf32>
    %c0_17 = arith.constant 0 : index
    %c18 = arith.constant 18 : index
    %c0_18 = arith.constant 0 : index
    %17 = vector.load %arg2[%c0_17, %c18, %c0_18] : memref<1x342x4xbf16, #tpu.memory_space<vmem>>, vector<1x288x4xbf16>
    %18 = vector.shape_cast %17 : vector<1x288x4xbf16> to vector<288x4xbf16>
    %c3 = arith.constant 3 : index
    %c0_19 = arith.constant 0 : index
    %c0_20 = arith.constant 0 : index
    %19 = vector.load %arg3[%c3, %c0_19, %c0_20] : memref<9x4x4xbf16, #tpu.memory_space<vmem>>, vector<1x4x4xbf16>
    %20 = vector.shape_cast %19 : vector<1x4x4xbf16> to vector<4x4xbf16>
    %cst_21 = arith.constant dense<0.000000e+00> : vector<288x4xf32>
    %21 = tpu.matmul %18, %20, %cst_21 {dimension_numbers = #tpu.dot_dimension_numbers<[1], [0], [0], [1], [0, 0, 1, 1], [], []>} : vector<288x4xbf16>, vector<4x4xbf16>, vector<288x4xf32> -> vector<288x4xf32>
    %22 = arith.addf %16, %21 : vector<288x4xf32>
    %c0_22 = arith.constant 0 : index
    %c19 = arith.constant 19 : index
    %c0_23 = arith.constant 0 : index
    %23 = vector.load %arg2[%c0_22, %c19, %c0_23] : memref<1x342x4xbf16, #tpu.memory_space<vmem>>, vector<1x288x4xbf16>
    %24 = vector.shape_cast %23 : vector<1x288x4xbf16> to vector<288x4xbf16>
    %c4 = arith.constant 4 : index
    %c0_24 = arith.constant 0 : index
    %c0_25 = arith.constant 0 : index
    %25 = vector.load %arg3[%c4, %c0_24, %c0_25] : memref<9x4x4xbf16, #tpu.memory_space<vmem>>, vector<1x4x4xbf16>
    %26 = vector.shape_cast %25 : vector<1x4x4xbf16> to vector<4x4xbf16>
    %cst_26 = arith.constant dense<0.000000e+00> : vector<288x4xf32>
    %27 = tpu.matmul %24, %26, %cst_26 {dimension_numbers = #tpu.dot_dimension_numbers<[1], [0], [0], [1], [0, 0, 1, 1], [], []>} : vector<288x4xbf16>, vector<4x4xbf16>, vector<288x4xf32> -> vector<288x4xf32>
    %28 = arith.addf %22, %27 : vector<288x4xf32>
    %c0_27 = arith.constant 0 : index
    %c20 = arith.constant 20 : index
    %c0_28 = arith.constant 0 : index
    %29 = vector.load %arg2[%c0_27, %c20, %c0_28] : memref<1x342x4xbf16, #tpu.memory_space<vmem>>, vector<1x288x4xbf16>
    %30 = vector.shape_cast %29 : vector<1x288x4xbf16> to vector<288x4xbf16>
    %c5 = arith.constant 5 : index
    %c0_29 = arith.constant 0 : index
    %c0_30 = arith.constant 0 : index
    %31 = vector.load %arg3[%c5, %c0_29, %c0_30] : memref<9x4x4xbf16, #tpu.memory_space<vmem>>, vector<1x4x4xbf16>
    %32 = vector.shape_cast %31 : vector<1x4x4xbf16> to vector<4x4xbf16>
    %cst_31 = arith.constant dense<0.000000e+00> : vector<288x4xf32>
    %33 = tpu.matmul %30, %32, %cst_31 {dimension_numbers = #tpu.dot_dimension_numbers<[1], [0], [0], [1], [0, 0, 1, 1], [], []>} : vector<288x4xbf16>, vector<4x4xbf16>, vector<288x4xf32> -> vector<288x4xf32>
    %34 = arith.addf %28, %33 : vector<288x4xf32>
    %c0_32 = arith.constant 0 : index
    %c36 = arith.constant 36 : index
    %c0_33 = arith.constant 0 : index
    %35 = vector.load %arg2[%c0_32, %c36, %c0_33] : memref<1x342x4xbf16, #tpu.memory_space<vmem>>, vector<1x288x4xbf16>
    %36 = vector.shape_cast %35 : vector<1x288x4xbf16> to vector<288x4xbf16>
    %c6 = arith.constant 6 : index
    %c0_34 = arith.constant 0 : index
    %c0_35 = arith.constant 0 : index
    %37 = vector.load %arg3[%c6, %c0_34, %c0_35] : memref<9x4x4xbf16, #tpu.memory_space<vmem>>, vector<1x4x4xbf16>
    %38 = vector.shape_cast %37 : vector<1x4x4xbf16> to vector<4x4xbf16>
    %cst_36 = arith.constant dense<0.000000e+00> : vector<288x4xf32>
    %39 = tpu.matmul %36, %38, %cst_36 {dimension_numbers = #tpu.dot_dimension_numbers<[1], [0], [0], [1], [0, 0, 1, 1], [], []>} : vector<288x4xbf16>, vector<4x4xbf16>, vector<288x4xf32> -> vector<288x4xf32>
    %40 = arith.addf %34, %39 : vector<288x4xf32>
    %c0_37 = arith.constant 0 : index
    %c37 = arith.constant 37 : index
    %c0_38 = arith.constant 0 : index
    %41 = vector.load %arg2[%c0_37, %c37, %c0_38] : memref<1x342x4xbf16, #tpu.memory_space<vmem>>, vector<1x288x4xbf16>
    %42 = vector.shape_cast %41 : vector<1x288x4xbf16> to vector<288x4xbf16>
    %c7 = arith.constant 7 : index
    %c0_39 = arith.constant 0 : index
    %c0_40 = arith.constant 0 : index
    %43 = vector.load %arg3[%c7, %c0_39, %c0_40] : memref<9x4x4xbf16, #tpu.memory_space<vmem>>, vector<1x4x4xbf16>
    %44 = vector.shape_cast %43 : vector<1x4x4xbf16> to vector<4x4xbf16>
    %cst_41 = arith.constant dense<0.000000e+00> : vector<288x4xf32>
    %45 = tpu.matmul %42, %44, %cst_41 {dimension_numbers = #tpu.dot_dimension_numbers<[1], [0], [0], [1], [0, 0, 1, 1], [], []>} : vector<288x4xbf16>, vector<4x4xbf16>, vector<288x4xf32> -> vector<288x4xf32>
    %46 = arith.addf %40, %45 : vector<288x4xf32>
    %c0_42 = arith.constant 0 : index
    %c38 = arith.constant 38 : index
    %c0_43 = arith.constant 0 : index
    %47 = vector.load %arg2[%c0_42, %c38, %c0_43] : memref<1x342x4xbf16, #tpu.memory_space<vmem>>, vector<1x288x4xbf16>
    %48 = vector.shape_cast %47 : vector<1x288x4xbf16> to vector<288x4xbf16>
    %c8 = arith.constant 8 : index
    %c0_44 = arith.constant 0 : index
    %c0_45 = arith.constant 0 : index
    %49 = vector.load %arg3[%c8, %c0_44, %c0_45] : memref<9x4x4xbf16, #tpu.memory_space<vmem>>, vector<1x4x4xbf16>
    %50 = vector.shape_cast %49 : vector<1x4x4xbf16> to vector<4x4xbf16>
    %cst_46 = arith.constant dense<0.000000e+00> : vector<288x4xf32>
    %51 = tpu.matmul %48, %50, %cst_46 {dimension_numbers = #tpu.dot_dimension_numbers<[1], [0], [0], [1], [0, 0, 1, 1], [], []>} : vector<288x4xbf16>, vector<4x4xbf16>, vector<288x4xf32> -> vector<288x4xf32>
    %52 = arith.addf %46, %51 : vector<288x4xf32>
    %c0_47 = arith.constant 0 : index
    %c0_48 = arith.constant 0 : index
    %53 = vector.load %arg4[%c0_47, %c0_48] : memref<1x4xf32, #tpu.memory_space<vmem>>, vector<1x4xf32>
    %54 = vector.broadcast %53 : vector<1x4xf32> to vector<288x4xf32>
    %55 = arith.addf %52, %54 : vector<288x4xf32>
    %cst_49 = arith.constant 0.000000e+00 : f32
    %56 = vector.broadcast %cst_49 : f32 to vector<288x4xf32>
    %57 = arith.cmpf oge, %55, %56 : vector<288x4xf32>
    %cst_50 = arith.constant 2.000000e-01 : f32
    %58 = vector.broadcast %cst_50 : f32 to vector<288x4xf32>
    %59 = arith.mulf %55, %58 : vector<288x4xf32>
    %60 = arith.select %57, %55, %59 : vector<288x4xi1>, vector<288x4xf32>
    %cst_51 = arith.constant 1.41421354 : f32
    %61 = vector.broadcast %cst_51 : f32 to vector<288x4xf32>
    %62 = arith.mulf %60, %61 : vector<288x4xf32>
    %63 = arith.truncf %62 : vector<288x4xf32> to vector<288x4xbf16>
    %c0_52 = arith.constant 0 : index
    %c0_53 = arith.constant 0 : index
    %c0_54 = arith.constant 0 : index
    %64 = vector.load %arg5[%c0_52, %c0_53, %c0_54] : memref<1x288x4xbf16, #tpu.memory_space<vmem>>, vector<1x288x4xbf16>
    %65 = vector.shape_cast %64 : vector<1x288x4xbf16> to vector<288x4xbf16>
    %66 = vector.shape_cast %63 : vector<288x4xbf16> to vector<1x288x4xbf16>
    tpu.vector_store %arg5[%c0_52, %c0_53, %c0_54], %66 {strides = array<i32>} : memref<1x288x4xbf16, #tpu.memory_space<vmem>>, vector<1x288x4xbf16>,
    return
  }
  func.func @transform_0(%arg0: i32, %arg1: i32) -> (i32, i32, i32) {
    %c0_i32 = arith.constant 0 : i32
    %c0_i32_0 = arith.constant 0 : i32
    %c0_i32_1 = arith.constant 0 : i32
    return %arg0, %c0_i32, %c0_i32_0 : i32, i32, i32
  }
  func.func @transform_1(%arg0: i32, %arg1: i32) -> (i32, i32, i32) {
    %c0_i32 = arith.constant 0 : i32
    %c0_i32_0 = arith.constant 0 : i32
    %c0_i32_1 = arith.constant 0 : i32
    return %c0_i32, %c0_i32_0, %arg1 : i32, i32, i32
  }
  func.func @transform_2(%arg0: i32, %arg1: i32) -> (i32, i32) {
    %c0_i32 = arith.constant 0 : i32
    %c0_i32_0 = arith.constant 0 : i32
    return %c0_i32, %arg1 : i32, i32
  }
  func.func @transform_3(%arg0: i32, %arg1: i32) -> (i32, i32, i32) {
    %c0_i32 = arith.constant 0 : i32
    %c0_i32_0 = arith.constant 0 : i32
    return %arg0, %c0_i32, %arg1 : i32, i32, i32
  }
}

module attributes {stable_mosaic.version = 11 : i64} {
  func.func @_blur_sep_kernel(%arg0: i32, %arg1: i32, %arg2: memref<1x20x20x4xbf16, #tpu.memory_space<vmem>>, %arg3: memref<1x17x17x4xbf16, #tpu.memory_space<vmem>>) attributes {dimension_semantics = [#tpu.dimension_semantics<parallel>, #tpu.dimension_semantics<parallel>], iteration_bounds = array<i64: 2, 1>, scalar_prefetch = 0 : i64, scratch_operands = 0 : i64, tpu.core_type = #tpu.core_type<tc>, window_params = [{transform_indices = @transform_0, window_bounds = array<i64: 1, 20, 20, 4>}, {transform_indices = @transform_1, window_bounds = array<i64: 1, 17, 17, 4>}]} {
    %c0 = arith.constant 0 : index
    %c0_0 = arith.constant 0 : index
    %c0_1 = arith.constant 0 : index
    %c0_2 = arith.constant 0 : index
    %0 = vector.load %arg2[%c0, %c0_0, %c0_1, %c0_2] : memref<1x20x20x4xbf16, #tpu.memory_space<vmem>>, vector<1x20x20x4xbf16>
    %1 = arith.extf %0 : vector<1x20x20x4xbf16> to vector<1x20x20x4xf32>
    %2 = vector.extract_strided_slice %1 {offsets = [0, 0, 0, 0], sizes = [1, 17, 20, 4], strides = [1, 1, 1, 1]} : vector<1x20x20x4xf32> to vector<1x17x20x4xf32>
    %cst = arith.constant 1.250000e-01 : f32
    %3 = vector.broadcast %cst : f32 to vector<1x17x20x4xf32>
    %4 = arith.mulf %3, %2 : vector<1x17x20x4xf32>
    %5 = vector.extract_strided_slice %1 {offsets = [0, 1, 0, 0], sizes = [1, 17, 20, 4], strides = [1, 1, 1, 1]} : vector<1x20x20x4xf32> to vector<1x17x20x4xf32>
    %cst_3 = arith.constant 3.750000e-01 : f32
    %6 = vector.broadcast %cst_3 : f32 to vector<1x17x20x4xf32>
    %7 = arith.mulf %6, %5 : vector<1x17x20x4xf32>
    %8 = arith.addf %4, %7 : vector<1x17x20x4xf32>
    %9 = vector.extract_strided_slice %1 {offsets = [0, 2, 0, 0], sizes = [1, 17, 20, 4], strides = [1, 1, 1, 1]} : vector<1x20x20x4xf32> to vector<1x17x20x4xf32>
    %cst_4 = arith.constant 3.750000e-01 : f32
    %10 = vector.broadcast %cst_4 : f32 to vector<1x17x20x4xf32>
    %11 = arith.mulf %10, %9 : vector<1x17x20x4xf32>
    %12 = arith.addf %8, %11 : vector<1x17x20x4xf32>
    %13 = vector.extract_strided_slice %1 {offsets = [0, 3, 0, 0], sizes = [1, 17, 20, 4], strides = [1, 1, 1, 1]} : vector<1x20x20x4xf32> to vector<1x17x20x4xf32>
    %cst_5 = arith.constant 1.250000e-01 : f32
    %14 = vector.broadcast %cst_5 : f32 to vector<1x17x20x4xf32>
    %15 = arith.mulf %14, %13 : vector<1x17x20x4xf32>
    %16 = arith.addf %12, %15 : vector<1x17x20x4xf32>
    %17 = vector.extract_strided_slice %16 {offsets = [0, 0, 0, 0], sizes = [1, 17, 17, 4], strides = [1, 1, 1, 1]} : vector<1x17x20x4xf32> to vector<1x17x17x4xf32>
    %cst_6 = arith.constant 1.250000e-01 : f32
    %18 = vector.broadcast %cst_6 : f32 to vector<1x17x17x4xf32>
    %19 = arith.mulf %18, %17 : vector<1x17x17x4xf32>
    %20 = vector.extract_strided_slice %16 {offsets = [0, 0, 1, 0], sizes = [1, 17, 17, 4], strides = [1, 1, 1, 1]} : vector<1x17x20x4xf32> to vector<1x17x17x4xf32>
    %cst_7 = arith.constant 3.750000e-01 : f32
    %21 = vector.broadcast %cst_7 : f32 to vector<1x17x17x4xf32>
    %22 = arith.mulf %21, %20 : vector<1x17x17x4xf32>
    %23 = arith.addf %19, %22 : vector<1x17x17x4xf32>
    %24 = vector.extract_strided_slice %16 {offsets = [0, 0, 2, 0], sizes = [1, 17, 17, 4], strides = [1, 1, 1, 1]} : vector<1x17x20x4xf32> to vector<1x17x17x4xf32>
    %cst_8 = arith.constant 3.750000e-01 : f32
    %25 = vector.broadcast %cst_8 : f32 to vector<1x17x17x4xf32>
    %26 = arith.mulf %25, %24 : vector<1x17x17x4xf32>
    %27 = arith.addf %23, %26 : vector<1x17x17x4xf32>
    %28 = vector.extract_strided_slice %16 {offsets = [0, 0, 3, 0], sizes = [1, 17, 17, 4], strides = [1, 1, 1, 1]} : vector<1x17x20x4xf32> to vector<1x17x17x4xf32>
    %cst_9 = arith.constant 1.250000e-01 : f32
    %29 = vector.broadcast %cst_9 : f32 to vector<1x17x17x4xf32>
    %30 = arith.mulf %29, %28 : vector<1x17x17x4xf32>
    %31 = arith.addf %27, %30 : vector<1x17x17x4xf32>
    %32 = arith.truncf %31 : vector<1x17x17x4xf32> to vector<1x17x17x4xbf16>
    %c0_10 = arith.constant 0 : index
    %c0_11 = arith.constant 0 : index
    %c0_12 = arith.constant 0 : index
    %c0_13 = arith.constant 0 : index
    %33 = vector.load %arg3[%c0_10, %c0_11, %c0_12, %c0_13] : memref<1x17x17x4xbf16, #tpu.memory_space<vmem>>, vector<1x17x17x4xbf16>
    tpu.vector_store %arg3[%c0_10, %c0_11, %c0_12, %c0_13], %32 {strides = array<i32>} : memref<1x17x17x4xbf16, #tpu.memory_space<vmem>>, vector<1x17x17x4xbf16>,
    return
  }
  func.func @transform_0(%arg0: i32, %arg1: i32) -> (i32, i32, i32, i32) {
    %c0_i32 = arith.constant 0 : i32
    %c0_i32_0 = arith.constant 0 : i32
    %c0_i32_1 = arith.constant 0 : i32
    return %arg0, %c0_i32, %c0_i32_0, %arg1 : i32, i32, i32, i32
  }
  func.func @transform_1(%arg0: i32, %arg1: i32) -> (i32, i32, i32, i32) {
    %c0_i32 = arith.constant 0 : i32
    %c0_i32_0 = arith.constant 0 : i32
    %c0_i32_1 = arith.constant 0 : i32
    return %arg0, %c0_i32, %c0_i32_0, %arg1 : i32, i32, i32, i32
  }
}

module attributes {stable_mosaic.version = 11 : i64} {
  func.func @_conv_taps_kernel(%arg0: i32, %arg1: i32, %arg2: memref<1x90x16xbf16, #tpu.memory_space<vmem>>, %arg3: memref<4x16x8xbf16, #tpu.memory_space<vmem>>, %arg4: memref<1x8xf32, #tpu.memory_space<vmem>>, %arg5: memref<1x72x8xbf16, #tpu.memory_space<vmem>>) attributes {dimension_semantics = [#tpu.dimension_semantics<parallel>, #tpu.dimension_semantics<parallel>], iteration_bounds = array<i64: 2, 1>, scalar_prefetch = 0 : i64, scratch_operands = 0 : i64, tpu.core_type = #tpu.core_type<tc>, window_params = [{transform_indices = @transform_0, window_bounds = array<i64: 1, 90, 16>}, {transform_indices = @transform_1, window_bounds = array<i64: 4, 16, 8>}, {transform_indices = @transform_2, window_bounds = array<i64: 1, 8>}, {transform_indices = @transform_3, window_bounds = array<i64: 1, 72, 8>}]} {
    %c0 = arith.constant 0 : index
    %c0_0 = arith.constant 0 : index
    %c0_1 = arith.constant 0 : index
    %0 = vector.load %arg2[%c0, %c0_0, %c0_1] : memref<1x90x16xbf16, #tpu.memory_space<vmem>>, vector<1x72x16xbf16>
    %1 = vector.shape_cast %0 : vector<1x72x16xbf16> to vector<72x16xbf16>
    %c0_2 = arith.constant 0 : index
    %c0_3 = arith.constant 0 : index
    %c0_4 = arith.constant 0 : index
    %2 = vector.load %arg3[%c0_2, %c0_3, %c0_4] : memref<4x16x8xbf16, #tpu.memory_space<vmem>>, vector<1x16x8xbf16>
    %3 = vector.shape_cast %2 : vector<1x16x8xbf16> to vector<16x8xbf16>
    %cst = arith.constant dense<0.000000e+00> : vector<72x8xf32>
    %4 = tpu.matmul %1, %3, %cst {dimension_numbers = #tpu.dot_dimension_numbers<[1], [0], [0], [1], [0, 0, 1, 1], [], []>} : vector<72x16xbf16>, vector<16x8xbf16>, vector<72x8xf32> -> vector<72x8xf32>
    %c0_5 = arith.constant 0 : index
    %c1 = arith.constant 1 : index
    %c0_6 = arith.constant 0 : index
    %5 = vector.load %arg2[%c0_5, %c1, %c0_6] : memref<1x90x16xbf16, #tpu.memory_space<vmem>>, vector<1x72x16xbf16>
    %6 = vector.shape_cast %5 : vector<1x72x16xbf16> to vector<72x16xbf16>
    %c1_7 = arith.constant 1 : index
    %c0_8 = arith.constant 0 : index
    %c0_9 = arith.constant 0 : index
    %7 = vector.load %arg3[%c1_7, %c0_8, %c0_9] : memref<4x16x8xbf16, #tpu.memory_space<vmem>>, vector<1x16x8xbf16>
    %8 = vector.shape_cast %7 : vector<1x16x8xbf16> to vector<16x8xbf16>
    %cst_10 = arith.constant dense<0.000000e+00> : vector<72x8xf32>
    %9 = tpu.matmul %6, %8, %cst_10 {dimension_numbers = #tpu.dot_dimension_numbers<[1], [0], [0], [1], [0, 0, 1, 1], [], []>} : vector<72x16xbf16>, vector<16x8xbf16>, vector<72x8xf32> -> vector<72x8xf32>
    %10 = arith.addf %4, %9 : vector<72x8xf32>
    %c0_11 = arith.constant 0 : index
    %c9 = arith.constant 9 : index
    %c0_12 = arith.constant 0 : index
    %11 = vector.load %arg2[%c0_11, %c9, %c0_12] : memref<1x90x16xbf16, #tpu.memory_space<vmem>>, vector<1x72x16xbf16>
    %12 = vector.shape_cast %11 : vector<1x72x16xbf16> to vector<72x16xbf16>
    %c2 = arith.constant 2 : index
    %c0_13 = arith.constant 0 : index
    %c0_14 = arith.constant 0 : index
    %13 = vector.load %arg3[%c2, %c0_13, %c0_14] : memref<4x16x8xbf16, #tpu.memory_space<vmem>>, vector<1x16x8xbf16>
    %14 = vector.shape_cast %13 : vector<1x16x8xbf16> to vector<16x8xbf16>
    %cst_15 = arith.constant dense<0.000000e+00> : vector<72x8xf32>
    %15 = tpu.matmul %12, %14, %cst_15 {dimension_numbers = #tpu.dot_dimension_numbers<[1], [0], [0], [1], [0, 0, 1, 1], [], []>} : vector<72x16xbf16>, vector<16x8xbf16>, vector<72x8xf32> -> vector<72x8xf32>
    %16 = arith.addf %10, %15 : vector<72x8xf32>
    %c0_16 = arith.constant 0 : index
    %c10 = arith.constant 10 : index
    %c0_17 = arith.constant 0 : index
    %17 = vector.load %arg2[%c0_16, %c10, %c0_17] : memref<1x90x16xbf16, #tpu.memory_space<vmem>>, vector<1x72x16xbf16>
    %18 = vector.shape_cast %17 : vector<1x72x16xbf16> to vector<72x16xbf16>
    %c3 = arith.constant 3 : index
    %c0_18 = arith.constant 0 : index
    %c0_19 = arith.constant 0 : index
    %19 = vector.load %arg3[%c3, %c0_18, %c0_19] : memref<4x16x8xbf16, #tpu.memory_space<vmem>>, vector<1x16x8xbf16>
    %20 = vector.shape_cast %19 : vector<1x16x8xbf16> to vector<16x8xbf16>
    %cst_20 = arith.constant dense<0.000000e+00> : vector<72x8xf32>
    %21 = tpu.matmul %18, %20, %cst_20 {dimension_numbers = #tpu.dot_dimension_numbers<[1], [0], [0], [1], [0, 0, 1, 1], [], []>} : vector<72x16xbf16>, vector<16x8xbf16>, vector<72x8xf32> -> vector<72x8xf32>
    %22 = arith.addf %16, %21 : vector<72x8xf32>
    %c0_21 = arith.constant 0 : index
    %c0_22 = arith.constant 0 : index
    %23 = vector.load %arg4[%c0_21, %c0_22] : memref<1x8xf32, #tpu.memory_space<vmem>>, vector<1x8xf32>
    %24 = vector.broadcast %23 : vector<1x8xf32> to vector<72x8xf32>
    %25 = arith.addf %22, %24 : vector<72x8xf32>
    %26 = arith.truncf %25 : vector<72x8xf32> to vector<72x8xbf16>
    %c0_23 = arith.constant 0 : index
    %c0_24 = arith.constant 0 : index
    %c0_25 = arith.constant 0 : index
    %27 = vector.load %arg5[%c0_23, %c0_24, %c0_25] : memref<1x72x8xbf16, #tpu.memory_space<vmem>>, vector<1x72x8xbf16>
    %28 = vector.shape_cast %27 : vector<1x72x8xbf16> to vector<72x8xbf16>
    %29 = vector.shape_cast %26 : vector<72x8xbf16> to vector<1x72x8xbf16>
    tpu.vector_store %arg5[%c0_23, %c0_24, %c0_25], %29 {strides = array<i32>} : memref<1x72x8xbf16, #tpu.memory_space<vmem>>, vector<1x72x8xbf16>,
    return
  }
  func.func @transform_0(%arg0: i32, %arg1: i32) -> (i32, i32, i32) {
    %c0_i32 = arith.constant 0 : i32
    %c0_i32_0 = arith.constant 0 : i32
    %c0_i32_1 = arith.constant 0 : i32
    return %arg0, %c0_i32, %c0_i32_0 : i32, i32, i32
  }
  func.func @transform_1(%arg0: i32, %arg1: i32) -> (i32, i32, i32) {
    %c0_i32 = arith.constant 0 : i32
    %c0_i32_0 = arith.constant 0 : i32
    %c0_i32_1 = arith.constant 0 : i32
    return %c0_i32, %c0_i32_0, %arg1 : i32, i32, i32
  }
  func.func @transform_2(%arg0: i32, %arg1: i32) -> (i32, i32) {
    %c0_i32 = arith.constant 0 : i32
    %c0_i32_0 = arith.constant 0 : i32
    return %c0_i32, %arg1 : i32, i32
  }
  func.func @transform_3(%arg0: i32, %arg1: i32) -> (i32, i32, i32) {
    %c0_i32 = arith.constant 0 : i32
    %c0_i32_0 = arith.constant 0 : i32
    return %arg0, %c0_i32, %arg1 : i32, i32, i32
  }
}

module attributes {stable_mosaic.version = 11 : i64} {
  func.func @_conv_taps_kernel(%arg0: i32, %arg1: i32, %arg2: memref<1x90x16xbf16, #tpu.memory_space<vmem>>, %arg3: memref<4x16x8xbf16, #tpu.memory_space<vmem>>, %arg4: memref<1x8xf32, #tpu.memory_space<vmem>>, %arg5: memref<1x72x8xbf16, #tpu.memory_space<vmem>>, %arg6: memref<1x72x8xf32, #tpu.memory_space<vmem>>) attributes {dimension_semantics = [#tpu.dimension_semantics<parallel>, #tpu.dimension_semantics<parallel>], iteration_bounds = array<i64: 2, 1>, scalar_prefetch = 0 : i64, scratch_operands = 0 : i64, tpu.core_type = #tpu.core_type<tc>, window_params = [{transform_indices = @transform_0, window_bounds = array<i64: 1, 90, 16>}, {transform_indices = @transform_1, window_bounds = array<i64: 4, 16, 8>}, {transform_indices = @transform_2, window_bounds = array<i64: 1, 8>}, {transform_indices = @transform_3, window_bounds = array<i64: 1, 72, 8>}, {transform_indices = @transform_4, window_bounds = array<i64: 1, 72, 8>}]} {
    %c0 = arith.constant 0 : index
    %c0_0 = arith.constant 0 : index
    %c0_1 = arith.constant 0 : index
    %0 = vector.load %arg2[%c0, %c0_0, %c0_1] : memref<1x90x16xbf16, #tpu.memory_space<vmem>>, vector<1x72x16xbf16>
    %1 = vector.shape_cast %0 : vector<1x72x16xbf16> to vector<72x16xbf16>
    %c0_2 = arith.constant 0 : index
    %c0_3 = arith.constant 0 : index
    %c0_4 = arith.constant 0 : index
    %2 = vector.load %arg3[%c0_2, %c0_3, %c0_4] : memref<4x16x8xbf16, #tpu.memory_space<vmem>>, vector<1x16x8xbf16>
    %3 = vector.shape_cast %2 : vector<1x16x8xbf16> to vector<16x8xbf16>
    %cst = arith.constant dense<0.000000e+00> : vector<72x8xf32>
    %4 = tpu.matmul %1, %3, %cst {dimension_numbers = #tpu.dot_dimension_numbers<[1], [0], [0], [1], [0, 0, 1, 1], [], []>} : vector<72x16xbf16>, vector<16x8xbf16>, vector<72x8xf32> -> vector<72x8xf32>
    %c0_5 = arith.constant 0 : index
    %c1 = arith.constant 1 : index
    %c0_6 = arith.constant 0 : index
    %5 = vector.load %arg2[%c0_5, %c1, %c0_6] : memref<1x90x16xbf16, #tpu.memory_space<vmem>>, vector<1x72x16xbf16>
    %6 = vector.shape_cast %5 : vector<1x72x16xbf16> to vector<72x16xbf16>
    %c1_7 = arith.constant 1 : index
    %c0_8 = arith.constant 0 : index
    %c0_9 = arith.constant 0 : index
    %7 = vector.load %arg3[%c1_7, %c0_8, %c0_9] : memref<4x16x8xbf16, #tpu.memory_space<vmem>>, vector<1x16x8xbf16>
    %8 = vector.shape_cast %7 : vector<1x16x8xbf16> to vector<16x8xbf16>
    %cst_10 = arith.constant dense<0.000000e+00> : vector<72x8xf32>
    %9 = tpu.matmul %6, %8, %cst_10 {dimension_numbers = #tpu.dot_dimension_numbers<[1], [0], [0], [1], [0, 0, 1, 1], [], []>} : vector<72x16xbf16>, vector<16x8xbf16>, vector<72x8xf32> -> vector<72x8xf32>
    %10 = arith.addf %4, %9 : vector<72x8xf32>
    %c0_11 = arith.constant 0 : index
    %c9 = arith.constant 9 : index
    %c0_12 = arith.constant 0 : index
    %11 = vector.load %arg2[%c0_11, %c9, %c0_12] : memref<1x90x16xbf16, #tpu.memory_space<vmem>>, vector<1x72x16xbf16>
    %12 = vector.shape_cast %11 : vector<1x72x16xbf16> to vector<72x16xbf16>
    %c2 = arith.constant 2 : index
    %c0_13 = arith.constant 0 : index
    %c0_14 = arith.constant 0 : index
    %13 = vector.load %arg3[%c2, %c0_13, %c0_14] : memref<4x16x8xbf16, #tpu.memory_space<vmem>>, vector<1x16x8xbf16>
    %14 = vector.shape_cast %13 : vector<1x16x8xbf16> to vector<16x8xbf16>
    %cst_15 = arith.constant dense<0.000000e+00> : vector<72x8xf32>
    %15 = tpu.matmul %12, %14, %cst_15 {dimension_numbers = #tpu.dot_dimension_numbers<[1], [0], [0], [1], [0, 0, 1, 1], [], []>} : vector<72x16xbf16>, vector<16x8xbf16>, vector<72x8xf32> -> vector<72x8xf32>
    %16 = arith.addf %10, %15 : vector<72x8xf32>
    %c0_16 = arith.constant 0 : index
    %c10 = arith.constant 10 : index
    %c0_17 = arith.constant 0 : index
    %17 = vector.load %arg2[%c0_16, %c10, %c0_17] : memref<1x90x16xbf16, #tpu.memory_space<vmem>>, vector<1x72x16xbf16>
    %18 = vector.shape_cast %17 : vector<1x72x16xbf16> to vector<72x16xbf16>
    %c3 = arith.constant 3 : index
    %c0_18 = arith.constant 0 : index
    %c0_19 = arith.constant 0 : index
    %19 = vector.load %arg3[%c3, %c0_18, %c0_19] : memref<4x16x8xbf16, #tpu.memory_space<vmem>>, vector<1x16x8xbf16>
    %20 = vector.shape_cast %19 : vector<1x16x8xbf16> to vector<16x8xbf16>
    %cst_20 = arith.constant dense<0.000000e+00> : vector<72x8xf32>
    %21 = tpu.matmul %18, %20, %cst_20 {dimension_numbers = #tpu.dot_dimension_numbers<[1], [0], [0], [1], [0, 0, 1, 1], [], []>} : vector<72x16xbf16>, vector<16x8xbf16>, vector<72x8xf32> -> vector<72x8xf32>
    %22 = arith.addf %16, %21 : vector<72x8xf32>
    %c0_21 = arith.constant 0 : index
    %c0_22 = arith.constant 0 : index
    %23 = vector.load %arg4[%c0_21, %c0_22] : memref<1x8xf32, #tpu.memory_space<vmem>>, vector<1x8xf32>
    %24 = vector.broadcast %23 : vector<1x8xf32> to vector<72x8xf32>
    %25 = arith.addf %22, %24 : vector<72x8xf32>
    %cst_23 = arith.constant 0.000000e+00 : f32
    %26 = vector.broadcast %cst_23 : f32 to vector<72x8xf32>
    %27 = arith.cmpf oge, %25, %26 : vector<72x8xf32>
    %cst_24 = arith.constant 2.000000e-01 : f32
    %28 = vector.broadcast %cst_24 : f32 to vector<72x8xf32>
    %29 = arith.mulf %25, %28 : vector<72x8xf32>
    %30 = arith.select %27, %25, %29 : vector<72x8xi1>, vector<72x8xf32>
    %cst_25 = arith.constant 1.41421354 : f32
    %31 = vector.broadcast %cst_25 : f32 to vector<72x8xf32>
    %32 = arith.mulf %30, %31 : vector<72x8xf32>
    %c0_26 = arith.constant 0 : index
    %c0_27 = arith.constant 0 : index
    %c0_28 = arith.constant 0 : index
    %33 = vector.load %arg5[%c0_26, %c0_27, %c0_28] : memref<1x72x8xbf16, #tpu.memory_space<vmem>>, vector<1x72x8xbf16>
    %34 = vector.shape_cast %33 : vector<1x72x8xbf16> to vector<72x8xbf16>
    %35 = arith.extf %34 : vector<72x8xbf16> to vector<72x8xf32>
    %36 = arith.addf %32, %35 : vector<72x8xf32>
    %cst_29 = arith.constant 0.707106769 : f32
    %37 = vector.broadcast %cst_29 : f32 to vector<72x8xf32>
    %38 = arith.mulf %36, %37 : vector<72x8xf32>
    %c0_30 = arith.constant 0 : index
    %c0_31 = arith.constant 0 : index
    %c0_32 = arith.constant 0 : index
    %39 = vector.load %arg6[%c0_30, %c0_31, %c0_32] : memref<1x72x8xf32, #tpu.memory_space<vmem>>, vector<1x72x8xf32>
    %40 = vector.shape_cast %39 : vector<1x72x8xf32> to vector<72x8xf32>
    %41 = vector.shape_cast %38 : vector<72x8xf32> to vector<1x72x8xf32>
    tpu.vector_store %arg6[%c0_30, %c0_31, %c0_32], %41 {strides = array<i32>} : memref<1x72x8xf32, #tpu.memory_space<vmem>>, vector<1x72x8xf32>,
    return
  }
  func.func @transform_0(%arg0: i32, %arg1: i32) -> (i32, i32, i32) {
    %c0_i32 = arith.constant 0 : i32
    %c0_i32_0 = arith.constant 0 : i32
    %c0_i32_1 = arith.constant 0 : i32
    return %arg0, %c0_i32, %c0_i32_0 : i32, i32, i32
  }
  func.func @transform_1(%arg0: i32, %arg1: i32) -> (i32, i32, i32) {
    %c0_i32 = arith.constant 0 : i32
    %c0_i32_0 = arith.constant 0 : i32
    %c0_i32_1 = arith.constant 0 : i32
    return %c0_i32, %c0_i32_0, %arg1 : i32, i32, i32
  }
  func.func @transform_2(%arg0: i32, %arg1: i32) -> (i32, i32) {
    %c0_i32 = arith.constant 0 : i32
    %c0_i32_0 = arith.constant 0 : i32
    return %c0_i32, %arg1 : i32, i32
  }
  func.func @transform_3(%arg0: i32, %arg1: i32) -> (i32, i32, i32) {
    %c0_i32 = arith.constant 0 : i32
    %c0_i32_0 = arith.constant 0 : i32
    return %arg0, %c0_i32, %arg1 : i32, i32, i32
  }
  func.func @transform_4(%arg0: i32, %arg1: i32) -> (i32, i32, i32) {
    %c0_i32 = arith.constant 0 : i32
    %c0_i32_0 = arith.constant 0 : i32
    return %arg0, %c0_i32, %arg1 : i32, i32, i32
  }
}

</mosaic_0001>

<bundles_post_ra>
// kernel: resblock_forward.5
= control target key start
LH: loop header
LB: loop body
LE: loop exit
PB: predicated region body
PF: predicated region fallthrough
CT: control target
= control target key end

     0   :  { %s1644_s6 = smov 0   ;;  %s1646_s7 = smov 0   ;;  %s2524_s0 = inlined_call_operand.vmem [shape: bf16[2,20,20,4], index: 0, kind: input, shape index: {}]   ;;  %s2525_s1 = inlined_call_operand.vmem [shape: bf16[2,17,17,4], index: 1, kind: output, shape index: {}]  }
   0x1   :  { %s1648_s8 = smov 0  }
   0x2 LB: > { %s23_s9 = sadd.s32 1, %s1628_s7  ;;  %p1530_p0 = scmp.ge.s32.totalorder %s1632_s8, 1  ;;  %s1632_s8 = sphi %s1648_s8, %s11_s8   ;;  %s1628_s7 = sphi %s1646_s7, %s2529_s7   ;;  %s1624_s6 = sphi %s1644_s6, %s2528_s6  }
   0x3   : > { %p25_p1 = scmp.ge.s32.totalorder %s23_s9, 2  ;;  %p106_p2 = scmp.lt.s32.totalorder %s1632_s8, 3 }
   0x5   : > { %s2531_s9 = smov (%p25_p1, %s23_s9), 0  ;;  %p107_p3 = pnand %p1530_p0, %p106_p2 }
   0x6   : > { %p132_p4 = scmp.lt.s32.totalorder (!%p107_p3), %s1624_s6, 1 }
   0x7   : > { %110 = sbr.rel (%p107_p3) target bundleno = 254 (0xfe), region = 24 }
   0xc   : > { %s2533_s6 = smov (!%p132_p4, %s1624_s6), 1  ;;  %vm688_vm0 = vcmask 1046528   ;;  %vm876_vm1 = vcmask 1045504   ;;  %vm1115_vm2 = vcmask 1044480   ;;  %vm1357_vm3 = vcmask 24576  }
   0xd   : > { %s1584_s10 = smul.u32 240, %s2533_s6  ;;  %vm1358_vm4 = vsmask.f32 256  ;;  %vm1354_vm5 = vcmask 27648  }
   0xe   : > { %s1585_s14 = smul.u32 204, %s2533_s6  ;;  %vm1764_vm6 = vmand %vm1357_vm3, %vm1358_vm4 }
   0xf   : > { %s1668_s13 = scalar_lea.vmem %s2524_s0, %s1584_s10 }
  0x10   : > { %v1536_v0 = vld [vmem:[%s1668_s13] sm:$0xff]   ;;  %v151_v1 = vld [vmem:[%s1668_s13 + $0xc] sm:$0xff]   ;;  %v1673_v2 = vld [vmem:[%s1668_s13 + $0x18] sm:$0xff]   ;;  %s1751_s17 = scalar_lea.vmem %s2525_s1, %s1585_s14 }
  0x11   : > { %v1537_v3 = vunpack.c.l.bf16 %v1536_v0  ;;  %v1538_v4 = vunpack.c.h.bf16 %v1536_v0  ;;  %v1541_v5 = vunpack.c.l.bf16 %v1673_v2  ;;  %v1542_v6 = vunpack.c.h.bf16 %v1673_v2  ;;  %v157_v7 = vld [vmem:[%s1668_s13 + $0x24] sm:$0xff]   ;;  %v153_v13 = vld [vmem:[%s1668_s13 + $0x14] sm:$0x3]  ;;  %v1681_v14 = vld [vmem:[%s1668_s13 + $0x20] sm:$0x3] }
  0x12   : > { %v150_v8 = vld [vmem:[%s1668_s13 + $0x8] sm:$0x3]  ;;  %v211_v9 = vunpack.c.l.bf16 %v151_v1  ;;  %v212_v10 = vunpack.c.h.bf16 %v151_v1  ;;  %v217_v11 = vunpack.c.l.bf16 %v157_v7  ;;  %v218_v12 = vunpack.c.h.bf16 %v157_v7  ;;  %v1684_v15 = vld [vmem:[%s1668_s13 + $0x2c] sm:$0x3]  ;;  %v1691_v20 = vld [vmem:[%s1668_s13 + $0x30] sm:$0xff]  }
  0x13   : > { %v268_v16 = vmul.f32 0.125, %v1537_v3  ;;  %v269_v17 = vmul.f32 0.125, %v1538_v4  ;;  %v322_v18 = vmul.f32 0.375, %v1541_v5  ;;  %v323_v19 = vmul.f32 0.375, %v1542_v6  ;;  %v1710_v41 = vld [vmem:[%s1668_s13 + $0x38] sm:$0x3] }
  0x14   : > { %v1693_v21 = vmul.f32 0.125, %v217_v11  ;;  %v1695_v22 = vmul.f32 0.125, %v218_v12  ;;  %v319_v23 = vmul.f32 0.375, %v211_v9  ;;  %v320_v24 = vmul.f32 0.375, %v212_v10 }
  0x15   : > { %v210_v25 = vunpack.c.l.bf16 %v150_v8  ;;  %v213_v26 = vunpack.c.l.bf16 %v153_v13  ;;  %v216_v27 = vunpack.c.l.bf16 %v1681_v14  ;;  %v219_v28 = vunpack.c.l.bf16 %v1684_v15 }
  0x16   : > { %v370_v29 = vadd.f32 %v319_v23, %v268_v16  ;;  %v371_v30 = vadd.f32 %v320_v24, %v269_v17  ;;  %v1545_v31 = vunpack.c.l.bf16 %v1691_v20  ;;  %v1546_v32 = vunpack.c.h.bf16 %v1691_v20 }
  0x17   : > { %v270_v33 = vmul.f32 0.125, %v210_v25  ;;  %v1703_v34 = vmul.f32 0.125, %v219_v28  ;;  %v321_v35 = vmul.f32 0.375, %v213_v26  ;;  %v1707_v36 = vmul.f32 0.375, %v216_v27 }
  0x18   : > { %v424_v37 = vadd.f32 %v370_v29, %v322_v18  ;;  %v425_v38 = vadd.f32 %v371_v30, %v323_v19  ;;  %v271_v39 = vmul.f32 0.125, %v211_v9  ;;  %v272_v40 = vmul.f32 0.125, %v212_v10 }
  0x19   : > { %v372_v42 = vadd.f32 %v321_v35, %v270_v33  ;;  %v1714_v43 = vmul.f32 0.125, %v1545_v31  ;;  %v1718_v44 = vmul.f32 0.125, %v1546_v32  ;;  %v1720_v45 = vmul.f32 0.375, %v217_v11 }
  0x1a   : > { %v484_v46 = vadd.f32 %v424_v37, %v1693_v21  ;;  %v485_v47 = vadd.f32 %v425_v38, %v1695_v22  ;;  %v1724_v48 = vmul.f32 0.375, %v218_v12  ;;  %v373_v49 = vadd.f32 %v322_v18, %v271_v39 }
  0x1b   : > { %v426_v50 = vadd.f32 %v372_v42, %v1707_v36  ;;  %v374_v51 = vadd.f32 %v323_v19, %v272_v40  ;;  %v222_v52 = vunpack.c.l.bf16 %v1710_v41  ;;  %v273_v53 = vmul.f32 0.125, %v213_v26 }
  0x1c   : > { %v535_v54 = vmul.f32 0.125, %v484_v46  ;;  %v536_v55 = vmul.f32 0.125, %v485_v47  ;;  %v586_v56 = vmul.f32 0.375, %v484_v46  ;;  %v587_v57 = vmul.f32 0.375, %v485_v47 }
  0x1d   : > { %v486_v58 = vadd.f32 %v426_v50, %v1703_v34  ;;  %v427_v59 = vadd.f32 %v373_v49, %v1720_v45  ;;  %v428_v60 = vadd.f32 %v374_v51, %v1724_v48  ;;  %v1733_v61 = vmul.f32 0.125, %v222_v52 }
  0x1e   : > { %v689_v62 = vrot.slane %v586_v56, 1  ;;  %v690_v63 = vrot.slane %v587_v57, 1  ;;  %v877_v0 = vrot.slane %v586_v56, 2  ;;  %v878_v1 = vrot.slane %v587_v57, 2 }
  0x1f   : > { %v1116_v3 = vrot.slane %v535_v54, 3  ;;  %v1117_v4 = vrot.slane %v536_v55, 3  ;;  %v537_v7 = vmul.f32 0.125, %v486_v58  ;;  %v588_v8 = vmul.f32 0.375, %v486_v58 }
  0x20   : > { %v691_v9 = vsel %vm688_vm0, %v689_v62, %v690_v63  ;;  %v879_v10 = vsel %vm876_vm1, %v877_v0, %v878_v1  ;;  %v487_v11 = vadd.f32 %v427_v59, %v1714_v43  ;;  %v488_v12 = vadd.f32 %v428_v60, %v1718_v44 }
  0x21   : > { %v825_v13 = vadd.f32 %v691_v9, %v535_v54  ;;  %v1118_v16 = vsel %vm1115_vm2, %v1116_v3, %v1117_v4  ;;  %v692_v17 = vrot.slane %v588_v8, 1  ;;  %v880_v18 = vrot.slane %v588_v8, 2 }
  0x22   : > { %v1119_v19 = vrot.slane %v537_v7, 3  ;;  %v538_v23 = vmul.f32 0.125, %v487_v11  ;;  %v1741_v24 = vmul.f32 0.125, %v488_v12  ;;  %v589_v25 = vmul.f32 0.375, %v487_v11 }
  0x23   : > { %v1013_v26 = vadd.f32 %v879_v10, %v825_v13  ;;  %v693_v29 = vsel %vm688_vm0, %v690_v63, %v692_v17  ;;  %v881_v30 = vsel %vm876_vm1, %v878_v1, %v880_v18  ;;  %v827_v33 = vadd.f32 %v692_v17, %v537_v7  ;;  %v1360_v63 = vld [vmem:[%s1751_s17 + $0x8] sm:$0x1] }
  0x24   : > { %v826_v35 = vadd.f32 %v693_v29, %v536_v55  ;;  %v1120_v37 = vsel %vm1115_vm2, %v1117_v4, %v1119_v19  ;;  %v1746_v38 = vmul.f32 0.375, %v488_v12  ;;  %v694_v39 = vrot.slane %v589_v25, 1  ;;  %v1757_v55 = vld [vmem:[%s1668_s13 + $0x3c] sm:$0xff]  }
  0x25   : > { %v1252_v40 = vadd.f32 %v1118_v16, %v1013_v26  ;;  %v1015_v42 = vadd.f32 %v880_v18, %v827_v33  ;;  %v882_v46 = vrot.slane %v589_v25, 2  ;;  %v1121_v47 = vrot.slane %v538_v23, 3  ;;  %v1788_v16 = vld [vmem:[%s1668_s13 + $0x44] sm:$0x3] }
  0x26   : > { %v1014_v49 = vadd.f32 %v881_v30, %v826_v35  ;;  %v695_v50 = vrot.slane %v1746_v38, 1  ;;  %v883_v51 = vrot.slane %v1746_v38, 2  ;;  %v1122_v54 = vrot.slane %v1741_v24, 3 }
  0x27   : > { %v1303_v56 = vpack.c.bf16 %v1252_v40, %v1252_v40  ;;  %v1254_v57 = vadd.f32 %v1119_v19, %v1015_v42  ;;  %v327_v58 = vmul.f32 0.375, %v219_v28  ;;  %v375_v59 = vadd.f32 %v1707_v36, %v273_v53 }
  0x28   : > { %v1253_v60 = vadd.f32 %v1120_v37, %v1014_v49  ;;  %v696_v0 = vsel %vm688_vm0, %v694_v39, %v695_v50  ;;  %v884_v1 = vsel %vm876_vm1, %v882_v46, %v883_v51  ;;  %v1123_v3 = vsel %vm1115_vm2, %v1121_v47, %v1122_v54  ;;  %v1822_v39 = vld [vmem:[%s1668_s13 + $0x48] sm:$0xff]  }
  0x29   : > { %1355 = vst.msk [vmem:[%s1751_s17] sm:$0xf] %vm1354_vm5, %v1303_v56  ;;  %v1305_v15 = vpack.c.bf16 %v1254_v57, %v1254_v57  ;;  %v828_v28 = vadd.f32 %v696_v0, %v538_v23  ;;  %v429_v36 = vadd.f32 %v375_v59, %v327_v58  ;;  %v223_v53 = vunpack.c.l.bf16 %v1757_v55 }
  0x2a   : > { %v1304_v4 = vpack.c.bf16 %v1253_v60, %v1253_v60  ;;  %v224_v7 = vunpack.c.h.bf16 %v1757_v55  ;;  %v274_v8 = vmul.f32 0.125, %v1541_v5  ;;  %v275_v9 = vmul.f32 0.125, %v1542_v6 }
  0x2b   : > { %v1361_v10 = vsel %vm1764_vm6, %v1305_v15, %v1360_v63  ;;  %v1016_v11 = vadd.f32 %v884_v1, %v828_v28  ;;  %v489_v12 = vadd.f32 %v429_v36, %v1733_v61  ;;  %v1785_v13 = vmul.f32 0.125, %v223_v53 }
  0x2c   : > { %1356 = vst.msk [vmem:[%s1751_s17 + $0x4] sm:$0xf] %vm1354_vm5, %v1304_v4  ;;  %v1794_v5 = vmul.f32 0.125, %v224_v7  ;;  %v1798_v2 = vmul.f32 0.375, %v1545_v31  ;;  %v1802_v6 = vmul.f32 0.375, %v1546_v32  ;;  %v376_v17 = vadd.f32 %v1720_v45, %v274_v8 }
  0x2d   : > { %1362 = vst [vmem:[%s1751_s17 + $0x8] sm:$0x1] %v1361_v10  ;;  %v1255_v18 = vadd.f32 %v1123_v3, %v1016_v11  ;;  %v540_v19 = vmul.f32 0.125, %v489_v12  ;;  %v591_v23 = vmul.f32 0.375, %v489_v12  ;;  %v377_v25 = vadd.f32 %v1724_v48, %v275_v9  ;;  %v1365_v3 = vld [vmem:[%s1751_s17 + $0x14] sm:$0x1] }
  0x2e   : > { %v430_v26 = vadd.f32 %v376_v17, %v1798_v2  ;;  %v225_v29 = vunpack.c.l.bf16 %v1788_v16  ;;  %v276_v31 = vmul.f32 0.125, %v216_v27  ;;  %v1813_v20 = vmul.f32 0.375, %v222_v52 }
  0x2f   : > { %v1306_v32 = vpack.c.bf16 %v1255_v18, %v1255_v18  ;;  %v697_v45 = vrot.slane %v591_v23, 1  ;;  %v885_v30 = vrot.slane %v591_v23, 2  ;;  %v1124_v33 = vrot.slane %v540_v19, 3 }
  0x30   : > { %v431_v35 = vadd.f32 %v377_v25, %v1802_v6  ;;  %v490_v37 = vadd.f32 %v430_v26, %v1785_v13  ;;  %v1819_v48 = vmul.f32 0.125, %v225_v29  ;;  %v378_v38 = vadd.f32 %v327_v58, %v276_v31  ;;  %v1846_v31 = vld [vmem:[%s1668_s13 + $0x50] sm:$0x3] }
  0x31   : > { %1363 = vst.msk [vmem:[%s1751_s17 + $0xc] sm:$0xf] %vm1354_vm5, %v1306_v32  ;;  %v698_v14 = vsel %vm688_vm0, %v695_v50, %v697_v45  ;;  %v886_v27 = vsel %vm876_vm1, %v883_v51, %v885_v30  ;;  %v1125_v41 = vsel %vm1115_vm2, %v1122_v54, %v1124_v33  ;;  %v830_v52 = vadd.f32 %v697_v45, %v540_v19 }
  0x32   : > { %v829_v40 = vadd.f32 %v698_v14, %v1741_v24  ;;  %v491_v42 = vadd.f32 %v431_v35, %v1794_v5  ;;  %v541_v46 = vmul.f32 0.125, %v490_v37  ;;  %v592_v47 = vmul.f32 0.375, %v490_v37 }
  0x33   : > { %v1018_v49 = vadd.f32 %v885_v30, %v830_v52  ;;  %v432_v56 = vadd.f32 %v378_v38, %v1813_v20  ;;  %v1549_v57 = vunpack.c.l.bf16 %v1822_v39  ;;  %v1550_v58 = vunpack.c.h.bf16 %v1822_v39 }
  0x34   : > { %v1017_v50 = vadd.f32 %v886_v27, %v829_v40  ;;  %v542_v59 = vmul.f32 0.125, %v491_v42  ;;  %v593_v51 = vmul.f32 0.375, %v491_v42  ;;  %v699_v60 = vrot.slane %v592_v47, 1  ;;  %v1867_v40 = vld [vmem:[%s1668_s13 + $0x54] sm:$0xff]  }
  0x35   : > { %v1257_v54 = vadd.f32 %v1124_v33, %v1018_v49  ;;  %v887_v63 = vrot.slane %v592_v47, 2  ;;  %v1126_v0 = vrot.slane %v541_v46, 3  ;;  %v492_v24 = vadd.f32 %v432_v56, %v1819_v48 }
  0x36   : > { %v1256_v1 = vadd.f32 %v1125_v41, %v1017_v50  ;;  %v700_v15 = vrot.slane %v593_v51, 1  ;;  %v888_v28 = vrot.slane %v593_v51, 2  ;;  %v1127_v36 = vrot.slane %v542_v59, 3  ;;  %v1370_v51 = vld [vmem:[%s1751_s17 + $0x20] sm:$0x1] }
  0x37   : > { %v1308_v4 = vpack.c.bf16 %v1257_v54, %v1257_v54  ;;  %v543_v8 = vmul.f32 0.125, %v492_v24  ;;  %v594_v9 = vmul.f32 0.375, %v492_v24  ;;  %v1838_v10 = vmul.f32 0.125, %v1549_v57 }
  0x38   : > { %v1307_v11 = vpack.c.bf16 %v1256_v1, %v1256_v1  ;;  %v701_v12 = vsel %vm688_vm0, %v699_v60, %v700_v15  ;;  %v889_v17 = vsel %vm876_vm1, %v887_v63, %v888_v28  ;;  %v1128_v18 = vsel %vm1115_vm2, %v1126_v0, %v1127_v36 }
  0x39   : > { %v1366_v19 = vsel %vm1764_vm6, %v1308_v4, %v1365_v3  ;;  %v831_v23 = vadd.f32 %v701_v12, %v541_v46  ;;  %v702_v25 = vrot.slane %v594_v9, 1  ;;  %v890_v26 = vrot.slane %v594_v9, 2 }
  0x3a   : > { %1364 = vst.msk [vmem:[%s1751_s17 + $0x10] sm:$0xf] %vm1354_vm5, %v1307_v11  ;;  %v1129_v32 = vrot.slane %v543_v8, 3  ;;  %v1852_v45 = vmul.f32 0.125, %v1550_v58  ;;  %v331_v30 = vmul.f32 0.375, %v223_v53  ;;  %v332_v33 = vmul.f32 0.375, %v224_v7 }
  0x3b   : > { %1367 = vst [vmem:[%s1751_s17 + $0x14] sm:$0x1] %v1366_v19  ;;  %v1019_v35 = vadd.f32 %v889_v17, %v831_v23  ;;  %v703_v37 = vsel %vm688_vm0, %v700_v15, %v702_v25  ;;  %v891_v38 = vsel %vm876_vm1, %v888_v28, %v890_v26  ;;  %v833_v14 = vadd.f32 %v702_v25, %v543_v8 }
  0x3c   : > { %v832_v27 = vadd.f32 %v703_v37, %v542_v59  ;;  %v1130_v41 = vsel %vm1115_vm2, %v1127_v36, %v1129_v32  ;;  %v379_v52 = vadd.f32 %v1798_v2, %v1693_v21  ;;  %v380_v53 = vadd.f32 %v1802_v6, %v1695_v22 }
  0x3d   : > { %v1258_v55 = vadd.f32 %v1128_v18, %v1019_v35  ;;  %v1021_v7 = vadd.f32 %v890_v26, %v833_v14  ;;  %v228_v42 = vunpack.c.l.bf16 %v1846_v31  ;;  %v1872_v46 = vmul.f32 0.375, %v225_v29 }
  0x3e   : > { %v1020_v47 = vadd.f32 %v891_v38, %v832_v27  ;;  %v433_v49 = vadd.f32 %v379_v52, %v331_v30  ;;  %v434_v56 = vadd.f32 %v380_v53, %v332_v33  ;;  %v381_v21 = vadd.f32 %v1813_v20, %v1703_v34 }
  0x3f   : > { %v1309_v2 = vpack.c.bf16 %v1258_v55, %v1258_v55  ;;  %v1260_v50 = vadd.f32 %v1129_v32, %v1021_v7  ;;  %v1876_v22 = vmul.f32 0.125, %v228_v42  ;;  %v229_v6 = vunpack.c.l.bf16 %v1867_v40  ;;  %v1912_v32 = vld [vmem:[%s1668_s13 + $0x5c] sm:$0x3] }
  0x40   : > { %v1259_v59 = vadd.f32 %v1130_v41, %v1020_v47  ;;  %v493_v60 = vadd.f32 %v433_v49, %v1838_v10  ;;  %v494_v16 = vadd.f32 %v434_v56, %v1852_v45  ;;  %v435_v29 = vadd.f32 %v381_v21, %v1872_v46 }
  0x41   : > { %1368 = vst.msk [vmem:[%s1751_s17 + $0x18] sm:$0xf] %vm1354_vm5, %v1309_v2  ;;  %v1311_v54 = vpack.c.bf16 %v1260_v50, %v1260_v50  ;;  %v230_v34 = vunpack.c.h.bf16 %v1867_v40  ;;  %v1888_v20 = vmul.f32 0.125, %v229_v6  ;;  %v1892_v63 = vmul.f32 0.375, %v1549_v57 }
  0x42   : > { %v1310_v0 = vpack.c.bf16 %v1259_v59, %v1259_v59  ;;  %v544_v24 = vmul.f32 0.125, %v493_v60  ;;  %v545_v1 = vmul.f32 0.125, %v494_v16  ;;  %v595_v3 = vmul.f32 0.375, %v493_v60 }
  0x43   : > { %v1371_v15 = vsel %vm1764_vm6, %v1311_v54, %v1370_v51  ;;  %v596_v28 = vmul.f32 0.375, %v494_v16  ;;  %v495_v36 = vadd.f32 %v435_v29, %v1876_v22  ;;  %v1899_v4 = vmul.f32 0.125, %v230_v34 }
  0x44   : > { %1369 = vst.msk [vmem:[%s1751_s17 + $0x1c] sm:$0xf] %vm1354_vm5, %v1310_v0  ;;  %v704_v8 = vrot.slane %v595_v3, 1  ;;  %v892_v57 = vrot.slane %v595_v3, 2  ;;  %v1131_v9 = vrot.slane %v544_v24, 3  ;;  %v1132_v11 = vrot.slane %v545_v1, 3 }
  0x45   : > { %1372 = vst [vmem:[%s1751_s17 + $0x20] sm:$0x1] %v1371_v15  ;;  %v705_v12 = vrot.slane %v596_v28, 1  ;;  %v893_v17 = vrot.slane %v596_v28, 2  ;;  %v546_v18 = vmul.f32 0.125, %v495_v36  ;;  %v597_v19 = vmul.f32 0.375, %v495_v36 }
  0x46   : > { %v1133_v23 = vsel %vm1115_vm2, %v1131_v9, %v1132_v11  ;;  %v1907_v25 = vmul.f32 0.375, %v1550_v58  ;;  %v382_v26 = vadd.f32 %v331_v30, %v1714_v43  ;;  %v383_v31 = vadd.f32 %v332_v33, %v1718_v44  ;;  %v1929_v0 = vld [vmem:[%s1668_s13 + $0x60] sm:$0xff]   ;;  %v1375_v3 = vld [vmem:[%s1751_s17 + $0x2c] sm:$0x1] }
  0x47   : > { %v706_v35 = vsel %vm688_vm0, %v704_v8, %v705_v12  ;;  %v894_v37 = vsel %vm876_vm1, %v892_v57, %v893_v17  ;;  %v707_v38 = vrot.slane %v597_v19, 1  ;;  %v895_v14 = vrot.slane %v597_v19, 2 }
  0x48   : > { %v834_v27 = vadd.f32 %v706_v35, %v544_v24  ;;  %v1134_v41 = vrot.slane %v546_v18, 3  ;;  %v436_v52 = vadd.f32 %v382_v26, %v1892_v63  ;;  %v437_v39 = vadd.f32 %v383_v31, %v1907_v25  ;;  %v1949_v35 = vld [vmem:[%s1668_s13 + $0x68] sm:$0x3] }
  0x49   : > { %v708_v58 = vsel %vm688_vm0, %v705_v12, %v707_v38  ;;  %v896_v43 = vsel %vm876_vm1, %v893_v17, %v895_v14  ;;  %v836_v30 = vadd.f32 %v707_v38, %v546_v18  ;;  %v231_v44 = vunpack.c.l.bf16 %v1912_v32 }
  0x4a   : > { %v1022_v33 = vadd.f32 %v894_v37, %v834_v27  ;;  %v835_v53 = vadd.f32 %v708_v58, %v545_v1  ;;  %v1135_v55 = vsel %vm1115_vm2, %v1132_v11, %v1134_v41  ;;  %v496_v7 = vadd.f32 %v436_v52, %v1888_v20 }
  0x4b   : > { %v1024_v47 = vadd.f32 %v895_v14, %v836_v30  ;;  %v497_v49 = vadd.f32 %v437_v39, %v1899_v4  ;;  %v1924_v56 = vmul.f32 0.125, %v231_v44  ;;  %v336_v21 = vmul.f32 0.375, %v228_v42 }
  0x4c   : > { %v1261_v2 = vadd.f32 %v1133_v23, %v1022_v33  ;;  %v1023_v50 = vadd.f32 %v896_v43, %v835_v53  ;;  %v547_v59 = vmul.f32 0.125, %v496_v7  ;;  %v598_v51 = vmul.f32 0.375, %v496_v7  ;;  %v1981_v7 = vld [vmem:[%s1668_s13 + $0x6c] sm:$0xff]  }
  0x4d   : > { %v1263_v60 = vadd.f32 %v1134_v41, %v1024_v47  ;;  %v548_v16 = vmul.f32 0.125, %v497_v49  ;;  %v599_v29 = vmul.f32 0.375, %v497_v49  ;;  %v384_v54 = vadd.f32 %v1872_v46, %v1733_v61 }
  0x4e   : > { %v1312_v24 = vpack.c.bf16 %v1261_v2, %v1261_v2  ;;  %v1262_v1 = vadd.f32 %v1135_v55, %v1023_v50  ;;  %v709_v15 = vrot.slane %v598_v51, 1  ;;  %v897_v28 = vrot.slane %v598_v51, 2 }
  0x4f   : > { %v1314_v42 = vpack.c.bf16 %v1263_v60, %v1263_v60  ;;  %v710_v36 = vrot.slane %v599_v29, 1  ;;  %v898_v8 = vrot.slane %v599_v29, 2  ;;  %v1136_v57 = vrot.slane %v547_v59, 3 }
  0x50   : > { %1373 = vst.msk [vmem:[%s1751_s17 + $0x24] sm:$0xf] %vm1354_vm5, %v1312_v24  ;;  %v1313_v9 = vpack.c.bf16 %v1262_v1, %v1262_v1  ;;  %v1137_v11 = vrot.slane %v548_v16, 3  ;;  %v438_v12 = vadd.f32 %v384_v54, %v336_v21  ;;  %v1553_v61 = vunpack.c.l.bf16 %v1929_v0 }
  0x51   : > { %v1376_v46 = vsel %vm1764_vm6, %v1314_v42, %v1375_v3  ;;  %v711_v17 = vsel %vm688_vm0, %v709_v15, %v710_v36  ;;  %v899_v18 = vsel %vm876_vm1, %v897_v28, %v898_v8  ;;  %v1554_v19 = vunpack.c.h.bf16 %v1929_v0 }
  0x52   : > { %1374 = vst.msk [vmem:[%s1751_s17 + $0x28] sm:$0xf] %vm1354_vm5, %v1313_v9  ;;  %v837_v23 = vadd.f32 %v711_v17, %v547_v59  ;;  %v1138_v26 = vsel %vm1115_vm2, %v1136_v57, %v1137_v11  ;;  %v498_v31 = vadd.f32 %v438_v12, %v1924_v56  ;;  %v1946_v32 = vmul.f32 0.125, %v1553_v61  ;;  %v1380_v12 = vld [vmem:[%s1751_s17 + $0x38] sm:$0x1] }
  0x53   : > { %1377 = vst [vmem:[%s1751_s17 + $0x2c] sm:$0x1] %v1376_v46  ;;  %v1954_v37 = vmul.f32 0.125, %v1554_v19  ;;  %v1958_v38 = vmul.f32 0.375, %v229_v6  ;;  %v1962_v14 = vmul.f32 0.375, %v230_v34  ;;  %v385_v27 = vadd.f32 %v1892_v63, %v1785_v13 }
  0x54   : > { %v1025_v41 = vadd.f32 %v899_v18, %v837_v23  ;;  %v549_v52 = vmul.f32 0.125, %v498_v31  ;;  %v600_v39 = vmul.f32 0.375, %v498_v31  ;;  %v386_v58 = vadd.f32 %v1907_v25, %v1794_v5 }
  0x55   : > { %v439_v43 = vadd.f32 %v385_v27, %v1958_v38  ;;  %v234_v30 = vunpack.c.l.bf16 %v1949_v35  ;;  %v1970_v6 = vmul.f32 0.375, %v231_v44  ;;  %v387_v40 = vadd.f32 %v336_v21, %v1819_v48 }
  0x56   : > { %v1264_v34 = vadd.f32 %v1138_v26, %v1025_v41  ;;  %v712_v33 = vrot.slane %v600_v39, 1  ;;  %v900_v53 = vrot.slane %v600_v39, 2  ;;  %v1139_v13 = vrot.slane %v549_v52, 3 }
  0x57   : > { %v440_v63 = vadd.f32 %v386_v58, %v1962_v14  ;;  %v499_v55 = vadd.f32 %v439_v43, %v1946_v32  ;;  %v1977_v5 = vmul.f32 0.125, %v234_v30  ;;  %v441_v25 = vadd.f32 %v387_v40, %v1970_v6 }
  0x58   : > { %v1315_v44 = vpack.c.bf16 %v1264_v34, %v1264_v34  ;;  %v713_v48 = vsel %vm688_vm0, %v710_v36, %v712_v33  ;;  %v901_v47 = vsel %vm876_vm1, %v898_v8, %v900_v53  ;;  %v1140_v49 = vsel %vm1115_vm2, %v1137_v11, %v1139_v13 }
  0x59   : > { %v838_v21 = vadd.f32 %v713_v48, %v548_v16  ;;  %v839_v2 = vadd.f32 %v712_v33, %v549_v52  ;;  %v500_v50 = vadd.f32 %v440_v63, %v1954_v37  ;;  %v550_v59 = vmul.f32 0.125, %v499_v55 }
  0x5a   : > { %1378 = vst.msk [vmem:[%s1751_s17 + $0x30] sm:$0xf] %vm1354_vm5, %v1315_v44  ;;  %v601_v51 = vmul.f32 0.375, %v499_v55  ;;  %v501_v60 = vadd.f32 %v441_v25, %v1977_v5  ;;  %v235_v29 = vunpack.c.l.bf16 %v1981_v7  ;;  %v236_v54 = vunpack.c.h.bf16 %v1981_v7 }
  0x5b   : > { %v1026_v24 = vadd.f32 %v901_v47, %v838_v21  ;;  %v1027_v1 = vadd.f32 %v900_v53, %v839_v2  ;;  %v551_v3 = vmul.f32 0.125, %v500_v50  ;;  %v602_v15 = vmul.f32 0.375, %v500_v50  ;;  %v2024_v21 = vld [vmem:[%s1668_s13 + $0x78] sm:$0xff]  }
  0x5c   : > { %v714_v28 = vrot.slane %v601_v51, 1  ;;  %v902_v16 = vrot.slane %v601_v51, 2  ;;  %v1141_v42 = vrot.slane %v550_v59, 3  ;;  %v552_v36 = vmul.f32 0.125, %v501_v60 }
  0x5d   : > { %v1265_v8 = vadd.f32 %v1140_v49, %v1026_v24  ;;  %v1266_v57 = vadd.f32 %v1139_v13, %v1027_v1  ;;  %v715_v9 = vrot.slane %v602_v15, 1  ;;  %v903_v11 = vrot.slane %v602_v15, 2  ;;  %v2012_v13 = vld [vmem:[%s1668_s13 + $0x74] sm:$0x3] }
  0x5e   : > { %v1142_v46 = vrot.slane %v551_v3, 3  ;;  %v603_v17 = vmul.f32 0.375, %v501_v60  ;;  %v1144_v18 = vrot.slane %v552_v36, 3  ;;  %v1995_v23 = vmul.f32 0.125, %v235_v29 }
  0x5f   : > { %v1316_v26 = vpack.c.bf16 %v1265_v8, %v1265_v8  ;;  %v1317_v31 = vpack.c.bf16 %v1266_v57, %v1266_v57  ;;  %v716_v27 = vsel %vm688_vm0, %v714_v28, %v715_v9  ;;  %v904_v41 = vsel %vm876_vm1, %v902_v16, %v903_v11 }
  0x60   : > { %v840_v52 = vadd.f32 %v716_v27, %v550_v59  ;;  %v1143_v39 = vsel %vm1115_vm2, %v1141_v42, %v1142_v46  ;;  %v717_v58 = vrot.slane %v603_v17, 1  ;;  %v905_v43 = vrot.slane %v603_v17, 2 }
  0x61   : > { %1379 = vst.msk [vmem:[%s1751_s17 + $0x34] sm:$0xf] %vm1354_vm5, %v1316_v26  ;;  %v1381_v40 = vsel %vm1764_vm6, %v1317_v31, %v1380_v12  ;;  %v1145_v34 = vsel %vm1115_vm2, %v1142_v46, %v1144_v18  ;;  %v2007_v33 = vmul.f32 0.125, %v236_v54  ;;  %v340_v53 = vmul.f32 0.375, %v1553_v61 }
  0x62   : > { %1382 = vst [vmem:[%s1751_s17 + $0x38] sm:$0x1] %v1381_v40  ;;  %v1028_v63 = vadd.f32 %v904_v41, %v840_v52  ;;  %v718_v55 = vsel %vm688_vm0, %v715_v9, %v717_v58  ;;  %v906_v25 = vsel %vm876_vm1, %v903_v11, %v905_v43  ;;  %v842_v44 = vadd.f32 %v717_v58, %v552_v36 }
  0x63   : > { %v841_v48 = vadd.f32 %v718_v55, %v551_v3  ;;  %v341_v47 = vmul.f32 0.375, %v1554_v19  ;;  %v388_v49 = vadd.f32 %v1958_v38, %v1838_v10  ;;  %v389_v61 = vadd.f32 %v1962_v14, %v1852_v45  ;;  %v1385_v3 = vld [vmem:[%s1751_s17 + $0x44] sm:$0x1] }
  0x64   : > { %v1267_v2 = vadd.f32 %v1143_v39, %v1028_v63  ;;  %v1030_v50 = vadd.f32 %v905_v43, %v842_v44  ;;  %v237_v59 = vunpack.c.l.bf16 %v2012_v13  ;;  %v2029_v51 = vmul.f32 0.375, %v234_v30 }
  0x65   : > { %v1029_v0 = vadd.f32 %v906_v25, %v841_v48  ;;  %v442_v19 = vadd.f32 %v388_v49, %v340_v53  ;;  %v443_v60 = vadd.f32 %v389_v61, %v341_v47  ;;  %v390_v10 = vadd.f32 %v1970_v6, %v1876_v22 }
  0x66   : > { %v1318_v38 = vpack.c.bf16 %v1267_v2, %v1267_v2  ;;  %v1269_v24 = vadd.f32 %v1144_v18, %v1030_v50  ;;  %v2033_v45 = vmul.f32 0.125, %v237_v59  ;;  %v1557_v14 = vunpack.c.l.bf16 %v2024_v21 }
  0x67   : > { %v1268_v1 = vadd.f32 %v1145_v34, %v1029_v0  ;;  %v502_v15 = vadd.f32 %v442_v19, %v1995_v23  ;;  %v503_v35 = vadd.f32 %v443_v60, %v2007_v33  ;;  %v444_v30 = vadd.f32 %v390_v10, %v2029_v51  ;;  %v2069_v34 = vld [vmem:[%s1668_s13 + $0x80] sm:$0x3] }
  0x68   : > { %1383 = vst.msk [vmem:[%s1751_s17 + $0x3c] sm:$0xf] %vm1354_vm5, %v1318_v38  ;;  %v1320_v28 = vpack.c.bf16 %v1269_v24, %v1269_v24  ;;  %v1558_v22 = vunpack.c.h.bf16 %v2024_v21  ;;  %v2045_v6 = vmul.f32 0.125, %v1557_v14  ;;  %v2049_v16 = vmul.f32 0.375, %v235_v29 }
  0x69   : > { %v1319_v42 = vpack.c.bf16 %v1268_v1, %v1268_v1  ;;  %v553_v36 = vmul.f32 0.125, %v502_v15  ;;  %v554_v8 = vmul.f32 0.125, %v503_v35  ;;  %v604_v57 = vmul.f32 0.375, %v502_v15 }
  0x6a   : > { %v1386_v9 = vsel %vm1764_vm6, %v1320_v28, %v1385_v3  ;;  %v605_v11 = vmul.f32 0.375, %v503_v35  ;;  %v504_v12 = vadd.f32 %v444_v30, %v2033_v45  ;;  %v2056_v46 = vmul.f32 0.125, %v1558_v22 }
  0x6b   : > { %1384 = vst.msk [vmem:[%s1751_s17 + $0x40] sm:$0xf] %vm1354_vm5, %v1319_v42  ;;  %v719_v17 = vrot.slane %v604_v57, 1  ;;  %v907_v29 = vrot.slane %v604_v57, 2  ;;  %v1146_v18 = vrot.slane %v553_v36, 3  ;;  %v1147_v26 = vrot.slane %v554_v8, 3 }
  0x6c   : > { %1387 = vst [vmem:[%s1751_s17 + $0x44] sm:$0x1] %v1386_v9  ;;  %v720_v31 = vrot.slane %v605_v11, 1  ;;  %v908_v27 = vrot.slane %v605_v11, 2  ;;  %v555_v41 = vmul.f32 0.125, %v504_v12  ;;  %v606_v52 = vmul.f32 0.375, %v504_v12 }
  0x6d   : > { %v1148_v39 = vsel %vm1115_vm2, %v1146_v18, %v1147_v26  ;;  %v2064_v58 = vmul.f32 0.375, %v236_v54  ;;  %v391_v43 = vadd.f32 %v340_v53, %v1888_v20  ;;  %v392_v40 = vadd.f32 %v341_v47, %v1899_v4  ;;  %v2086_v42 = vld [vmem:[%s1668_s13 + $0x84] sm:$0xff]   ;;  %v1390_v57 = vld [vmem:[%s1751_s17 + $0x50] sm:$0x1] }
  0x6e   : > { %v721_v13 = vsel %vm688_vm0, %v719_v17, %v720_v31  ;;  %v909_v63 = vsel %vm876_vm1, %v907_v29, %v908_v27  ;;  %v722_v55 = vrot.slane %v606_v52, 1  ;;  %v910_v25 = vrot.slane %v606_v52, 2 }
  0x6f   : > { %v843_v44 = vadd.f32 %v721_v13, %v553_v36  ;;  %v1149_v48 = vrot.slane %v555_v41, 3  ;;  %v445_v49 = vadd.f32 %v391_v43, %v2049_v16  ;;  %v446_v7 = vadd.f32 %v392_v40, %v2064_v58  ;;  %v2106_v13 = vld [vmem:[%s1668_s13 + $0x8c] sm:$0x3] }
  0x70   : > { %v723_v54 = vsel %vm688_vm0, %v720_v31, %v722_v55  ;;  %v911_v20 = vsel %vm876_vm1, %v908_v27, %v910_v25  ;;  %v845_v53 = vadd.f32 %v722_v55, %v555_v41  ;;  %v240_v4 = vunpack.c.l.bf16 %v2069_v34 }
  0x71   : > { %v1031_v47 = vadd.f32 %v909_v63, %v843_v44  ;;  %v844_v61 = vadd.f32 %v723_v54, %v554_v8  ;;  %v1150_v2 = vsel %vm1115_vm2, %v1147_v26, %v1149_v48  ;;  %v505_v50 = vadd.f32 %v445_v49, %v2045_v6 }
  0x72   : > { %v1033_v0 = vadd.f32 %v910_v25, %v845_v53  ;;  %v506_v19 = vadd.f32 %v446_v7, %v2056_v46  ;;  %v2081_v60 = vmul.f32 0.125, %v240_v4  ;;  %v345_v10 = vmul.f32 0.375, %v237_v59 }
  0x73   : > { %v1270_v38 = vadd.f32 %v1148_v39, %v1031_v47  ;;  %v1032_v24 = vadd.f32 %v911_v20, %v844_v61  ;;  %v556_v1 = vmul.f32 0.125, %v505_v50  ;;  %v607_v3 = vmul.f32 0.375, %v505_v50  ;;  %v2138_v50 = vld [vmem:[%s1668_s13 + $0x90] sm:$0xff]  }
  0x74   : > { %v1272_v15 = vadd.f32 %v1149_v48, %v1033_v0  ;;  %v557_v35 = vmul.f32 0.125, %v506_v19  ;;  %v608_v30 = vmul.f32 0.375, %v506_v19  ;;  %v393_v28 = vadd.f32 %v2029_v51, %v1924_v56 }
  0x75   : > { %v1321_v36 = vpack.c.bf16 %v1270_v38, %v1270_v38  ;;  %v1271_v8 = vadd.f32 %v1150_v2, %v1032_v24  ;;  %v724_v9 = vrot.slane %v607_v3, 1  ;;  %v912_v11 = vrot.slane %v607_v3, 2 }
  0x76   : > { %v1323_v59 = vpack.c.bf16 %v1272_v15, %v1272_v15  ;;  %v725_v12 = vrot.slane %v608_v30, 1  ;;  %v913_v17 = vrot.slane %v608_v30, 2  ;;  %v1151_v29 = vrot.slane %v556_v1, 3 }
  0x77   : > { %1388 = vst.msk [vmem:[%s1751_s17 + $0x48] sm:$0xf] %vm1354_vm5, %v1321_v36  ;;  %v1322_v18 = vpack.c.bf16 %v1271_v8, %v1271_v8  ;;  %v1152_v26 = vrot.slane %v557_v35, 3  ;;  %v447_v31 = vadd.f32 %v393_v28, %v345_v10  ;;  %v241_v56 = vunpack.c.l.bf16 %v2086_v42 }
  0x78   : > { %v1391_v51 = vsel %vm1764_vm6, %v1323_v59, %v1390_v57  ;;  %v726_v27 = vsel %vm688_vm0, %v724_v9, %v725_v12  ;;  %v914_v41 = vsel %vm876_vm1, %v912_v11, %v913_v17  ;;  %v242_v52 = vunpack.c.h.bf16 %v2086_v42 }
  0x79   : > { %1389 = vst.msk [vmem:[%s1751_s17 + $0x4c] sm:$0xf] %vm1354_vm5, %v1322_v18  ;;  %v846_v39 = vadd.f32 %v726_v27, %v556_v1  ;;  %v1153_v43 = vsel %vm1115_vm2, %v1151_v29, %v1152_v26  ;;  %v507_v40 = vadd.f32 %v447_v31, %v2081_v60  ;;  %v2103_v34 = vmul.f32 0.125, %v241_v56  ;;  %v1395_v31 = vld [vmem:[%s1751_s17 + $0x5c] sm:$0x1] }
  0x7a   : > { %1392 = vst [vmem:[%s1751_s17 + $0x50] sm:$0x1] %v1391_v51  ;;  %v2111_v63 = vmul.f32 0.125, %v242_v52  ;;  %v2115_v55 = vmul.f32 0.375, %v1557_v14  ;;  %v2119_v25 = vmul.f32 0.375, %v1558_v22  ;;  %v394_v44 = vadd.f32 %v2049_v16, %v1946_v32 }
  0x7b   : > { %v1034_v48 = vadd.f32 %v914_v41, %v846_v39  ;;  %v558_v49 = vmul.f32 0.125, %v507_v40  ;;  %v609_v7 = vmul.f32 0.375, %v507_v40  ;;  %v395_v54 = vadd.f32 %v2064_v58, %v1954_v37 }
  0x7c   : > { %v448_v20 = vadd.f32 %v394_v44, %v2115_v55  ;;  %v243_v53 = vunpack.c.l.bf16 %v2106_v13  ;;  %v2127_v14 = vmul.f32 0.375, %v240_v4  ;;  %v396_v21 = vadd.f32 %v345_v10, %v1977_v5 }
  0x7d   : > { %v1273_v22 = vadd.f32 %v1153_v43, %v1034_v48  ;;  %v727_v47 = vrot.slane %v609_v7, 1  ;;  %v915_v61 = vrot.slane %v609_v7, 2  ;;  %v1154_v32 = vrot.slane %v558_v49, 3 }
  0x7e   : > { %v449_v16 = vadd.f32 %v395_v54, %v2119_v25  ;;  %v508_v2 = vadd.f32 %v448_v20, %v2103_v34  ;;  %v2134_v37 = vmul.f32 0.125, %v243_v53  ;;  %v450_v58 = vadd.f32 %v396_v21, %v2127_v14 }
  0x7f   : > { %v1324_v4 = vpack.c.bf16 %v1273_v22, %v1273_v22  ;;  %v728_v5 = vsel %vm688_vm0, %v725_v12, %v727_v47  ;;  %v916_v0 = vsel %vm876_vm1, %v913_v17, %v915_v61  ;;  %v1155_v19 = vsel %vm1115_vm2, %v1152_v26, %v1154_v32 }
  0x80   : > { %v847_v10 = vadd.f32 %v728_v5, %v557_v35  ;;  %v848_v38 = vadd.f32 %v727_v47, %v558_v49  ;;  %v509_v24 = vadd.f32 %v449_v16, %v2111_v63  ;;  %v559_v1 = vmul.f32 0.125, %v508_v2 }
  0x81   : > { %1393 = vst.msk [vmem:[%s1751_s17 + $0x54] sm:$0xf] %vm1354_vm5, %v1324_v4  ;;  %v610_v3 = vmul.f32 0.375, %v508_v2  ;;  %v510_v15 = vadd.f32 %v450_v58, %v2134_v37  ;;  %v1561_v30 = vunpack.c.l.bf16 %v2138_v50  ;;  %v1562_v28 = vunpack.c.h.bf16 %v2138_v50 }
  0x82   : > { %v1035_v36 = vadd.f32 %v916_v0, %v847_v10  ;;  %v1036_v8 = vadd.f32 %v915_v61, %v848_v38  ;;  %v560_v57 = vmul.f32 0.125, %v509_v24  ;;  %v611_v9 = vmul.f32 0.375, %v509_v24  ;;  %v2181_v10 = vld [vmem:[%s1668_s13 + $0x9c] sm:$0xff]  }
  0x83   : > { %v729_v11 = vrot.slane %v610_v3, 1  ;;  %v917_v35 = vrot.slane %v610_v3, 2  ;;  %v1156_v59 = vrot.slane %v559_v1, 3  ;;  %v561_v12 = vmul.f32 0.125, %v510_v15 }
  0x84   : > { %v1274_v17 = vadd.f32 %v1155_v19, %v1035_v36  ;;  %v1275_v29 = vadd.f32 %v1154_v32, %v1036_v8  ;;  %v730_v18 = vrot.slane %v611_v9, 1  ;;  %v918_v26 = vrot.slane %v611_v9, 2  ;;  %v2169_v32 = vld [vmem:[%s1668_s13 + $0x98] sm:$0x3] }
  0x85   : > { %v1157_v51 = vrot.slane %v560_v57, 3  ;;  %v612_v27 = vmul.f32 0.375, %v510_v15  ;;  %v1159_v41 = vrot.slane %v561_v12, 3  ;;  %v2152_v39 = vmul.f32 0.125, %v1561_v30 }
  0x86   : > { %v1325_v43 = vpack.c.bf16 %v1274_v17, %v1274_v17  ;;  %v1326_v40 = vpack.c.bf16 %v1275_v29, %v1275_v29  ;;  %v731_v44 = vsel %vm688_vm0, %v729_v11, %v730_v18  ;;  %v919_v48 = vsel %vm876_vm1, %v917_v35, %v918_v26 }
  0x87   : > { %v849_v49 = vadd.f32 %v731_v44, %v559_v1  ;;  %v1158_v7 = vsel %vm1115_vm2, %v1156_v59, %v1157_v51  ;;  %v732_v54 = vrot.slane %v612_v27, 1  ;;  %v920_v20 = vrot.slane %v612_v27, 2 }
  0x88   : > { %1394 = vst.msk [vmem:[%s1751_s17 + $0x58] sm:$0xf] %vm1354_vm5, %v1325_v43  ;;  %v1396_v21 = vsel %vm1764_vm6, %v1326_v40, %v1395_v31  ;;  %v1160_v22 = vsel %vm1115_vm2, %v1157_v51, %v1159_v41  ;;  %v2164_v47 = vmul.f32 0.125, %v1562_v28  ;;  %v349_v61 = vmul.f32 0.375, %v241_v56 }
  0x89   : > { %1397 = vst [vmem:[%s1751_s17 + $0x5c] sm:$0x1] %v1396_v21  ;;  %v1037_v16 = vadd.f32 %v919_v48, %v849_v49  ;;  %v733_v2 = vsel %vm688_vm0, %v730_v18, %v732_v54  ;;  %v921_v58 = vsel %vm876_vm1, %v918_v26, %v920_v20  ;;  %v851_v4 = vadd.f32 %v732_v54, %v561_v12 }
  0x8a   : > { %v850_v5 = vadd.f32 %v733_v2, %v560_v57  ;;  %v350_v0 = vmul.f32 0.375, %v242_v52  ;;  %v397_v19 = vadd.f32 %v2115_v55, %v1995_v23  ;;  %v398_v56 = vadd.f32 %v2119_v25, %v2007_v33  ;;  %v1400_v57 = vld [vmem:[%s1751_s17 + $0x68] sm:$0x1] }
  0x8b   : > { %v1276_v38 = vadd.f32 %v1158_v7, %v1037_v16  ;;  %v1039_v24 = vadd.f32 %v920_v20, %v851_v4  ;;  %v246_v1 = vunpack.c.l.bf16 %v2169_v32  ;;  %v2186_v3 = vmul.f32 0.375, %v243_v53 }
  0x8c   : > { %v1038_v42 = vadd.f32 %v921_v58, %v850_v5  ;;  %v451_v52 = vadd.f32 %v397_v19, %v349_v61  ;;  %v452_v15 = vadd.f32 %v398_v56, %v350_v0  ;;  %v399_v23 = vadd.f32 %v2127_v14, %v2033_v45 }
  0x8d   : > { %v1327_v55 = vpack.c.bf16 %v1276_v38, %v1276_v38  ;;  %v1278_v36 = vadd.f32 %v1159_v41, %v1039_v24  ;;  %v2190_v33 = vmul.f32 0.125, %v246_v1  ;;  %v247_v25 = vunpack.c.l.bf16 %v2181_v10 }
  0x8e   : > { %v1277_v8 = vadd.f32 %v1160_v22, %v1038_v42  ;;  %v511_v9 = vadd.f32 %v451_v52, %v2152_v39  ;;  %v512_v13 = vadd.f32 %v452_v15, %v2164_v47  ;;  %v453_v53 = vadd.f32 %v399_v23, %v2186_v3  ;;  %v2226_v22 = vld [vmem:[%s1668_s13 + $0xa4] sm:$0x3] }
  0x8f   : > { %1398 = vst.msk [vmem:[%s1751_s17 + $0x60] sm:$0xf] %vm1354_vm5, %v1327_v55  ;;  %v1329_v11 = vpack.c.bf16 %v1278_v36, %v1278_v36  ;;  %v248_v45 = vunpack.c.h.bf16 %v2181_v10  ;;  %v2202_v14 = vmul.f32 0.125, %v247_v25  ;;  %v2206_v35 = vmul.f32 0.375, %v1561_v30 }
  0x90   : > { %v1328_v59 = vpack.c.bf16 %v1277_v8, %v1277_v8  ;;  %v562_v12 = vmul.f32 0.125, %v511_v9  ;;  %v563_v17 = vmul.f32 0.125, %v512_v13  ;;  %v613_v29 = vmul.f32 0.375, %v511_v9 }
  0x91   : > { %v1401_v18 = vsel %vm1764_vm6, %v1329_v11, %v1400_v57  ;;  %v614_v26 = vmul.f32 0.375, %v512_v13  ;;  %v513_v31 = vadd.f32 %v453_v53, %v2190_v33  ;;  %v2213_v51 = vmul.f32 0.125, %v248_v45 }
  0x92   : > { %1399 = vst.msk [vmem:[%s1751_s17 + $0x64] sm:$0xf] %vm1354_vm5, %v1328_v59  ;;  %v734_v27 = vrot.slane %v613_v29, 1  ;;  %v922_v30 = vrot.slane %v613_v29, 2  ;;  %v1161_v41 = vrot.slane %v562_v12, 3  ;;  %v1162_v43 = vrot.slane %v563_v17, 3 }
  0x93   : > { %1402 = vst [vmem:[%s1751_s17 + $0x68] sm:$0x1] %v1401_v18  ;;  %v735_v40 = vrot.slane %v614_v26, 1  ;;  %v923_v44 = vrot.slane %v614_v26, 2  ;;  %v564_v48 = vmul.f32 0.125, %v513_v31  ;;  %v615_v49 = vmul.f32 0.375, %v513_v31 }
  0x94   : > { %v1163_v7 = vsel %vm1115_vm2, %v1161_v41, %v1162_v43  ;;  %v2221_v54 = vmul.f32 0.375, %v1562_v28  ;;  %v400_v20 = vadd.f32 %v349_v61, %v2045_v6  ;;  %v401_v21 = vadd.f32 %v350_v0, %v2056_v46  ;;  %v2243_v59 = vld [vmem:[%s1668_s13 + $0xa8] sm:$0xff]   ;;  %v1405_v29 = vld [vmem:[%s1751_s17 + $0x74] sm:$0x1] }
  0x95   : > { %v736_v32 = vsel %vm688_vm0, %v734_v27, %v735_v40  ;;  %v924_v16 = vsel %vm876_vm1, %v922_v30, %v923_v44  ;;  %v737_v2 = vrot.slane %v615_v49, 1  ;;  %v925_v58 = vrot.slane %v615_v49, 2 }
  0x96   : > { %v852_v4 = vadd.f32 %v736_v32, %v562_v12  ;;  %v1164_v5 = vrot.slane %v564_v48, 3  ;;  %v454_v19 = vadd.f32 %v400_v20, %v2206_v35  ;;  %v455_v50 = vadd.f32 %v401_v21, %v2221_v54  ;;  %v2263_v32 = vld [vmem:[%s1668_s13 + $0xb0] sm:$0x3] }
  0x97   : > { %v738_v28 = vsel %vm688_vm0, %v735_v40, %v737_v2  ;;  %v926_v6 = vsel %vm876_vm1, %v923_v44, %v925_v58  ;;  %v854_v61 = vadd.f32 %v737_v2, %v564_v48  ;;  %v249_v46 = vunpack.c.l.bf16 %v2226_v22 }
  0x98   : > { %v1040_v0 = vadd.f32 %v924_v16, %v852_v4  ;;  %v853_v56 = vadd.f32 %v738_v28, %v563_v17  ;;  %v1165_v38 = vsel %vm1115_vm2, %v1162_v43, %v1164_v5  ;;  %v514_v24 = vadd.f32 %v454_v19, %v2202_v14 }
  0x99   : > { %v1042_v42 = vadd.f32 %v925_v58, %v854_v61  ;;  %v515_v52 = vadd.f32 %v455_v50, %v2213_v51  ;;  %v2238_v15 = vmul.f32 0.125, %v249_v46  ;;  %v354_v23 = vmul.f32 0.375, %v246_v1 }
  0x9a   : > { %v1279_v55 = vadd.f32 %v1163_v7, %v1040_v0  ;;  %v1041_v36 = vadd.f32 %v926_v6, %v853_v56  ;;  %v565_v8 = vmul.f32 0.125, %v514_v24  ;;  %v616_v57 = vmul.f32 0.375, %v514_v24  ;;  %v2295_v24 = vld [vmem:[%s1668_s13 + $0xb4] sm:$0xff]  }
  0x9b   : > { %v1281_v9 = vadd.f32 %v1164_v5, %v1042_v42  ;;  %v566_v13 = vmul.f32 0.125, %v515_v52  ;;  %v617_v53 = vmul.f32 0.375, %v515_v52  ;;  %v402_v11 = vadd.f32 %v2186_v3, %v2081_v60 }
  0x9c   : > { %v1330_v12 = vpack.c.bf16 %v1279_v55, %v1279_v55  ;;  %v1280_v17 = vadd.f32 %v1165_v38, %v1041_v36  ;;  %v739_v18 = vrot.slane %v616_v57, 1  ;;  %v927_v26 = vrot.slane %v616_v57, 2 }
  0x9d   : > { %v1332_v1 = vpack.c.bf16 %v1281_v9, %v1281_v9  ;;  %v740_v31 = vrot.slane %v617_v53, 1  ;;  %v928_v27 = vrot.slane %v617_v53, 2  ;;  %v1166_v30 = vrot.slane %v565_v8, 3 }
  0x9e   : > { %1403 = vst.msk [vmem:[%s1751_s17 + $0x6c] sm:$0xf] %vm1354_vm5, %v1330_v12  ;;  %v1331_v41 = vpack.c.bf16 %v1280_v17, %v1280_v17  ;;  %v1167_v43 = vrot.slane %v566_v13, 3  ;;  %v456_v40 = vadd.f32 %v402_v11, %v354_v23  ;;  %v1565_v60 = vunpack.c.l.bf16 %v2243_v59 }
  0x9f   : > { %v1406_v3 = vsel %vm1764_vm6, %v1332_v1, %v1405_v29  ;;  %v741_v44 = vsel %vm688_vm0, %v739_v18, %v740_v31  ;;  %v929_v48 = vsel %vm876_vm1, %v927_v26, %v928_v27  ;;  %v1566_v49 = vunpack.c.h.bf16 %v2243_v59 }
  0xa0   : > { %1404 = vst.msk [vmem:[%s1751_s17 + $0x70] sm:$0xf] %vm1354_vm5, %v1331_v41  ;;  %v855_v7 = vadd.f32 %v741_v44, %v565_v8  ;;  %v1168_v20 = vsel %vm1115_vm2, %v1166_v30, %v1167_v43  ;;  %v516_v21 = vadd.f32 %v456_v40, %v2238_v15  ;;  %v2260_v22 = vmul.f32 0.125, %v1565_v60  ;;  %v1410_v40 = vld [vmem:[%s1751_s17 + $0x80] sm:$0x1] }
  0xa1   : > { %1407 = vst [vmem:[%s1751_s17 + $0x74] sm:$0x1] %v1406_v3  ;;  %v2268_v16 = vmul.f32 0.125, %v1566_v49  ;;  %v2272_v2 = vmul.f32 0.375, %v247_v25  ;;  %v2276_v58 = vmul.f32 0.375, %v248_v45  ;;  %v403_v4 = vadd.f32 %v2206_v35, %v2103_v34 }
  0xa2   : > { %v1043_v5 = vadd.f32 %v929_v48, %v855_v7  ;;  %v567_v19 = vmul.f32 0.125, %v516_v21  ;;  %v618_v50 = vmul.f32 0.375, %v516_v21  ;;  %v404_v28 = vadd.f32 %v2221_v54, %v2111_v63 }
  0xa3   : > { %v457_v6 = vadd.f32 %v403_v4, %v2272_v2  ;;  %v252_v61 = vunpack.c.l.bf16 %v2263_v32  ;;  %v2284_v25 = vmul.f32 0.375, %v249_v46  ;;  %v405_v10 = vadd.f32 %v354_v23, %v2134_v37 }
  0xa4   : > { %v1282_v45 = vadd.f32 %v1168_v20, %v1043_v5  ;;  %v742_v0 = vrot.slane %v618_v50, 1  ;;  %v930_v56 = vrot.slane %v618_v50, 2  ;;  %v1169_v34 = vrot.slane %v567_v19, 3 }
  0xa5   : > { %v458_v35 = vadd.f32 %v404_v28, %v2276_v58  ;;  %v517_v38 = vadd.f32 %v457_v6, %v2260_v22  ;;  %v2291_v63 = vmul.f32 0.125, %v252_v61  ;;  %v459_v54 = vadd.f32 %v405_v10, %v2284_v25 }
  0xa6   : > { %v1333_v46 = vpack.c.bf16 %v1282_v45, %v1282_v45  ;;  %v743_v37 = vsel %vm688_vm0, %v740_v31, %v742_v0  ;;  %v931_v42 = vsel %vm876_vm1, %v928_v27, %v930_v56  ;;  %v1170_v52 = vsel %vm1115_vm2, %v1167_v43, %v1169_v34 }
  0xa7   : > { %v856_v23 = vadd.f32 %v743_v37, %v566_v13  ;;  %v857_v55 = vadd.f32 %v742_v0, %v567_v19  ;;  %v518_v36 = vadd.f32 %v458_v35, %v2268_v16  ;;  %v568_v8 = vmul.f32 0.125, %v517_v38 }
  0xa8   : > { %1408 = vst.msk [vmem:[%s1751_s17 + $0x78] sm:$0xf] %vm1354_vm5, %v1333_v46  ;;  %v619_v57 = vmul.f32 0.375, %v517_v38  ;;  %v519_v9 = vadd.f32 %v459_v54, %v2291_v63  ;;  %v253_v53 = vunpack.c.l.bf16 %v2295_v24  ;;  %v254_v11 = vunpack.c.h.bf16 %v2295_v24 }
  0xa9   : > { %v1044_v12 = vadd.f32 %v931_v42, %v856_v23  ;;  %v1045_v17 = vadd.f32 %v930_v56, %v857_v55  ;;  %v569_v29 = vmul.f32 0.125, %v518_v36  ;;  %v620_v18 = vmul.f32 0.375, %v518_v36  ;;  %v2338_v23 = vld [vmem:[%s1668_s13 + $0xc0] sm:$0xff]  }
  0xaa   : > { %v744_v26 = vrot.slane %v619_v57, 1  ;;  %v932_v13 = vrot.slane %v619_v57, 2  ;;  %v1171_v1 = vrot.slane %v568_v8, 3  ;;  %v570_v31 = vmul.f32 0.125, %v519_v9 }
  0xab   : > { %v1283_v27 = vadd.f32 %v1170_v52, %v1044_v12  ;;  %v1284_v30 = vadd.f32 %v1169_v34, %v1045_v17  ;;  %v745_v41 = vrot.slane %v620_v18, 1  ;;  %v933_v43 = vrot.slane %v620_v18, 2  ;;  %v2326_v34 = vld [vmem:[%s1668_s13 + $0xbc] sm:$0x3] }
  0xac   : > { %v1172_v3 = vrot.slane %v569_v29, 3  ;;  %v621_v44 = vmul.f32 0.375, %v519_v9  ;;  %v1174_v48 = vrot.slane %v570_v31, 3  ;;  %v2309_v7 = vmul.f32 0.125, %v253_v53 }
  0xad   : > { %v1334_v20 = vpack.c.bf16 %v1283_v27, %v1283_v27  ;;  %v1335_v21 = vpack.c.bf16 %v1284_v30, %v1284_v30  ;;  %v746_v4 = vsel %vm688_vm0, %v744_v26, %v745_v41  ;;  %v934_v5 = vsel %vm876_vm1, %v932_v13, %v933_v43 }
  0xae   : > { %v858_v19 = vadd.f32 %v746_v4, %v568_v8  ;;  %v1173_v50 = vsel %vm1115_vm2, %v1171_v1, %v1172_v3  ;;  %v747_v28 = vrot.slane %v621_v44, 1  ;;  %v935_v6 = vrot.slane %v621_v44, 2 }
  0xaf   : > { %1409 = vst.msk [vmem:[%s1751_s17 + $0x7c] sm:$0xf] %vm1354_vm5, %v1334_v20  ;;  %v1411_v10 = vsel %vm1764_vm6, %v1335_v21, %v1410_v40  ;;  %v1175_v45 = vsel %vm1115_vm2, %v1172_v3, %v1174_v48  ;;  %v2321_v0 = vmul.f32 0.125, %v254_v11  ;;  %v358_v56 = vmul.f32 0.375, %v1565_v60 }
  0xb0   : > { %1412 = vst [vmem:[%s1751_s17 + $0x80] sm:$0x1] %v1411_v10  ;;  %v1046_v35 = vadd.f32 %v934_v5, %v858_v19  ;;  %v748_v38 = vsel %vm688_vm0, %v745_v41, %v747_v28  ;;  %v936_v54 = vsel %vm876_vm1, %v933_v43, %v935_v6  ;;  %v860_v46 = vadd.f32 %v747_v28, %v570_v31 }
  0xb1   : > { %v859_v37 = vadd.f32 %v748_v38, %v569_v29  ;;  %v359_v42 = vmul.f32 0.375, %v1566_v49  ;;  %v406_v52 = vadd.f32 %v2272_v2, %v2152_v39  ;;  %v407_v60 = vadd.f32 %v2276_v58, %v2164_v47  ;;  %v1415_v29 = vld [vmem:[%s1751_s17 + $0x8c] sm:$0x1] }
  0xb2   : > { %v1285_v55 = vadd.f32 %v1173_v50, %v1046_v35  ;;  %v1048_v36 = vadd.f32 %v935_v6, %v860_v46  ;;  %v255_v8 = vunpack.c.l.bf16 %v2326_v34  ;;  %v2343_v57 = vmul.f32 0.375, %v252_v61 }
  0xb3   : > { %v1047_v59 = vadd.f32 %v936_v54, %v859_v37  ;;  %v460_v49 = vadd.f32 %v406_v52, %v358_v56  ;;  %v461_v9 = vadd.f32 %v407_v60, %v359_v42  ;;  %v408_v39 = vadd.f32 %v2284_v25, %v2190_v33 }
  0xb4   : > { %v1336_v2 = vpack.c.bf16 %v1285_v55, %v1285_v55  ;;  %v1287_v12 = vadd.f32 %v1174_v48, %v1048_v36  ;;  %v2347_v47 = vmul.f32 0.125, %v255_v8  ;;  %v1569_v58 = vunpack.c.l.bf16 %v2338_v23 }
  0xb5   : > { %v1286_v17 = vadd.f32 %v1175_v45, %v1047_v59  ;;  %v520_v18 = vadd.f32 %v460_v49, %v2309_v7  ;;  %v521_v32 = vadd.f32 %v461_v9, %v2321_v0  ;;  %v462_v61 = vadd.f32 %v408_v39, %v2343_v57  ;;  %v2381_v45 = vld [vmem:[%s1668_s13 + $0xc8] sm:$0x3] }
  0xb6   : > { %1413 = vst.msk [vmem:[%s1751_s17 + $0x84] sm:$0xf] %vm1354_vm5, %v1336_v2  ;;  %v1338_v26 = vpack.c.bf16 %v1287_v12, %v1287_v12  ;;  %v1570_v33 = vunpack.c.h.bf16 %v2338_v23  ;;  %v2359_v25 = vmul.f32 0.125, %v1569_v58  ;;  %v2363_v13 = vmul.f32 0.375, %v253_v53 }
  0xb7   : > { %v1337_v1 = vpack.c.bf16 %v1286_v17, %v1286_v17  ;;  %v571_v31 = vmul.f32 0.125, %v520_v18  ;;  %v572_v27 = vmul.f32 0.125, %v521_v32  ;;  %v622_v30 = vmul.f32 0.375, %v520_v18 }
  0xb8   : > { %v1416_v41 = vsel %vm1764_vm6, %v1338_v26, %v1415_v29  ;;  %v623_v43 = vmul.f32 0.375, %v521_v32  ;;  %v522_v40 = vadd.f32 %v462_v61, %v2347_v47  ;;  %v2370_v3 = vmul.f32 0.125, %v1570_v33 }
  0xb9   : > { %1414 = vst.msk [vmem:[%s1751_s17 + $0x88] sm:$0xf] %vm1354_vm5, %v1337_v1  ;;  %v749_v44 = vrot.slane %v622_v30, 1  ;;  %v937_v53 = vrot.slane %v622_v30, 2  ;;  %v1176_v48 = vrot.slane %v571_v31, 3  ;;  %v1177_v20 = vrot.slane %v572_v27, 3 }
  0xba   : > { %1417 = vst [vmem:[%s1751_s17 + $0x8c] sm:$0x1] %v1416_v41  ;;  %v750_v21 = vrot.slane %v623_v43, 1  ;;  %v938_v4 = vrot.slane %v623_v43, 2  ;;  %v573_v5 = vmul.f32 0.125, %v522_v40  ;;  %v624_v19 = vmul.f32 0.375, %v522_v40 }
  0xbb   : > { %v1178_v50 = vsel %vm1115_vm2, %v1176_v48, %v1177_v20  ;;  %v362_v28 = vmul.f32 0.375, %v254_v11  ;;  %v409_v6 = vadd.f32 %v358_v56, %v2202_v14  ;;  %v410_v10 = vadd.f32 %v359_v42, %v2213_v51  ;;  %v2397_v1 = vld [vmem:[%s1668_s13 + $0xcc] sm:$0xff]   ;;  %v1420_v30 = vld [vmem:[%s1751_s17 + $0x98] sm:$0x1] }
  0xbc   : > { %v751_v34 = vsel %vm688_vm0, %v749_v44, %v750_v21  ;;  %v939_v35 = vsel %vm876_vm1, %v937_v53, %v938_v4  ;;  %v752_v38 = vrot.slane %v624_v19, 1  ;;  %v940_v54 = vrot.slane %v624_v19, 2 }
  0xbd   : > { %v861_v46 = vadd.f32 %v751_v34, %v571_v31  ;;  %v1179_v37 = vrot.slane %v573_v5, 3  ;;  %v463_v52 = vadd.f32 %v409_v6, %v2363_v13  ;;  %v464_v60 = vadd.f32 %v410_v10, %v362_v28  ;;  %v2415_v34 = vld [vmem:[%s1668_s13 + $0xd4] sm:$0x3] }
  0xbe   : > { %v753_v24 = vsel %vm688_vm0, %v750_v21, %v752_v38  ;;  %v941_v11 = vsel %vm876_vm1, %v938_v4, %v940_v54  ;;  %v863_v14 = vadd.f32 %v752_v38, %v573_v5  ;;  %v258_v51 = vunpack.c.l.bf16 %v2381_v45 }
  0xbf   : > { %v1049_v56 = vadd.f32 %v939_v35, %v861_v46  ;;  %v862_v42 = vadd.f32 %v753_v24, %v572_v27  ;;  %v1180_v55 = vsel %vm1115_vm2, %v1177_v20, %v1179_v37  ;;  %v523_v36 = vadd.f32 %v463_v52, %v2359_v25 }
  0xc0   : > { %v1051_v59 = vadd.f32 %v940_v54, %v863_v14  ;;  %v524_v49 = vadd.f32 %v464_v60, %v2370_v3  ;;  %v2392_v9 = vmul.f32 0.125, %v258_v51  ;;  %v363_v39 = vmul.f32 0.375, %v255_v8 }
  0xc1   : > { %v1288_v2 = vadd.f32 %v1178_v50, %v1049_v56  ;;  %v1050_v12 = vadd.f32 %v941_v11, %v862_v42  ;;  %v574_v17 = vmul.f32 0.125, %v523_v36  ;;  %v625_v29 = vmul.f32 0.375, %v523_v36  ;;  %v2432_v36 = vld [vmem:[%s1668_s13 + $0xd8] sm:$0xff]  }
  0xc2   : > { %v1290_v18 = vadd.f32 %v1179_v37, %v1051_v59  ;;  %v575_v32 = vmul.f32 0.125, %v524_v49  ;;  %v626_v61 = vmul.f32 0.375, %v524_v49  ;;  %v411_v26 = vadd.f32 %v2343_v57, %v2238_v15 }
  0xc3   : > { %v1339_v31 = vpack.c.bf16 %v1288_v2, %v1288_v2  ;;  %v1289_v27 = vadd.f32 %v1180_v55, %v1050_v12  ;;  %v754_v41 = vrot.slane %v625_v29, 1  ;;  %v942_v43 = vrot.slane %v625_v29, 2 }
  0xc4   : > { %v1341_v8 = vpack.c.bf16 %v1290_v18, %v1290_v18  ;;  %v755_v40 = vrot.slane %v626_v61, 1  ;;  %v943_v44 = vrot.slane %v626_v61, 2  ;;  %v1181_v53 = vrot.slane %v574_v17, 3 }
  0xc5   : > { %1418 = vst.msk [vmem:[%s1751_s17 + $0x90] sm:$0xf] %vm1354_vm5, %v1339_v31  ;;  %v1340_v48 = vpack.c.bf16 %v1289_v27, %v1289_v27  ;;  %v1182_v20 = vrot.slane %v575_v32, 3  ;;  %v465_v21 = vadd.f32 %v411_v26, %v363_v39  ;;  %v259_v15 = vunpack.c.l.bf16 %v2397_v1 }
  0xc6   : > { %v1421_v57 = vsel %vm1764_vm6, %v1341_v8, %v1420_v30  ;;  %v756_v4 = vsel %vm688_vm0, %v754_v41, %v755_v40  ;;  %v944_v5 = vsel %vm876_vm1, %v942_v43, %v943_v44  ;;  %v260_v19 = vunpack.c.h.bf16 %v2397_v1 }
  0xc7   : > { %1419 = vst.msk [vmem:[%s1751_s17 + $0x94] sm:$0xf] %vm1354_vm5, %v1340_v48  ;;  %v864_v50 = vadd.f32 %v756_v4, %v574_v17  ;;  %v1183_v6 = vsel %vm1115_vm2, %v1181_v53, %v1182_v20  ;;  %v525_v10 = vadd.f32 %v465_v21, %v2392_v9  ;;  %v364_v45 = vmul.f32 0.375, %v1569_v58  ;;  %v1425_v21 = vld [vmem:[%s1751_s17 + $0xa4] sm:$0x1] }
  0xc8   : > { %1422 = vst [vmem:[%s1751_s17 + $0x98] sm:$0x1] %v1421_v57  ;;  %v365_v35 = vmul.f32 0.375, %v1570_v33  ;;  %v412_v38 = vadd.f32 %v2363_v13, %v2260_v22  ;;  %v413_v54 = vadd.f32 %v362_v28, %v2268_v16  ;;  %v475_v46 = vmul.f32 0.125, %v259_v15 }
  0xc9   : > { %v1052_v37 = vadd.f32 %v944_v5, %v864_v50  ;;  %v576_v52 = vmul.f32 0.125, %v525_v10  ;;  %v627_v60 = vmul.f32 0.375, %v525_v10  ;;  %v476_v24 = vmul.f32 0.125, %v260_v19 }
  0xca   : > { %v466_v58 = vadd.f32 %v412_v38, %v364_v45  ;;  %v467_v11 = vadd.f32 %v413_v54, %v365_v35  ;;  %v261_v14 = vunpack.c.l.bf16 %v2415_v34  ;;  %v2426_v56 = vmul.f32 0.375, %v258_v51 }
  0xcb   : > { %v1291_v23 = vadd.f32 %v1183_v6, %v1052_v37  ;;  %v757_v33 = vrot.slane %v627_v60, 1  ;;  %v945_v22 = vrot.slane %v627_v60, 2  ;;  %v1184_v13 = vrot.slane %v576_v52, 3 }
  0xcc   : > { %v526_v16 = vadd.f32 %v475_v46, %v466_v58  ;;  %v527_v28 = vadd.f32 %v476_v24, %v467_v11  ;;  %v414_v42 = vadd.f32 %v363_v39, %v2291_v63  ;;  %v477_v55 = vmul.f32 0.125, %v261_v14  ;;  %v2451_v24 = vld [vmem:[%s1668_s13 + $0xe0] sm:$0x3] }
  0xcd   : > { %v1342_v59 = vpack.c.bf16 %v1291_v23, %v1291_v23  ;;  %v758_v49 = vsel %vm688_vm0, %v755_v40, %v757_v33  ;;  %v946_v51 = vsel %vm876_vm1, %v943_v44, %v945_v22  ;;  %v1185_v2 = vsel %vm1115_vm2, %v1182_v20, %v1184_v13 }
  0xce   : > { %v865_v12 = vadd.f32 %v758_v49, %v575_v32  ;;  %v866_v17 = vadd.f32 %v757_v33, %v576_v52  ;;  %v577_v29 = vmul.f32 0.125, %v526_v16  ;;  %v578_v18 = vmul.f32 0.125, %v527_v28 }
  0xcf   : > { %1423 = vst.msk [vmem:[%s1751_s17 + $0x9c] sm:$0xf] %vm1354_vm5, %v1342_v59  ;;  %v628_v61 = vmul.f32 0.375, %v526_v16  ;;  %v629_v63 = vmul.f32 0.375, %v527_v28  ;;  %v468_v39 = vadd.f32 %v414_v42, %v2426_v56  ;;  %v1573_v26 = vunpack.c.l.bf16 %v2432_v36 }
  0xd0   : > { %v1053_v31 = vadd.f32 %v946_v51, %v865_v12  ;;  %v1054_v27 = vadd.f32 %v945_v22, %v866_v17  ;;  %v1186_v30 = vrot.slane %v577_v29, 3  ;;  %v1187_v41 = vrot.slane %v578_v18, 3 }
  0xd1   : > { %v759_v43 = vrot.slane %v628_v61, 1  ;;  %v760_v8 = vrot.slane %v629_v63, 1  ;;  %v947_v40 = vrot.slane %v628_v61, 2  ;;  %v948_v32 = vrot.slane %v629_v63, 2 }
  0xd2   : > { %v1292_v44 = vadd.f32 %v1185_v2, %v1053_v31  ;;  %v1293_v53 = vadd.f32 %v1184_v13, %v1054_v27  ;;  %v1188_v48 = vsel %vm1115_vm2, %v1186_v30, %v1187_v41  ;;  %v528_v20 = vadd.f32 %v477_v55, %v468_v39  ;;  %v205_v27 = vld [vmem:[%s1668_s13 + $0xe4] sm:$0xff]  }
  0xd3   : > { %v761_v57 = vsel %vm688_vm0, %v759_v43, %v760_v8  ;;  %v949_v4 = vsel %vm876_vm1, %v947_v40, %v948_v32  ;;  %v1574_v5 = vunpack.c.h.bf16 %v2432_v36  ;;  %v367_v50 = vmul.f32 0.375, %v259_v15 }
  0xd4   : > { %v1343_v6 = vpack.c.bf16 %v1292_v44, %v1292_v44  ;;  %v1344_v10 = vpack.c.bf16 %v1293_v53, %v1293_v53  ;;  %v867_v38 = vadd.f32 %v761_v57, %v577_v29  ;;  %v579_v54 = vmul.f32 0.125, %v528_v20 }
  0xd5   : > { %v630_v46 = vmul.f32 0.375, %v528_v20  ;;  %v368_v37 = vmul.f32 0.375, %v260_v19  ;;  %v415_v52 = vadd.f32 %v364_v45, %v2309_v7  ;;  %v416_v60 = vadd.f32 %v365_v35, %v2321_v0 }
  0xd6   : > { %1424 = vst.msk [vmem:[%s1751_s17 + $0xa0] sm:$0xf] %vm1354_vm5, %v1343_v6  ;;  %v1426_v58 = vsel %vm1764_vm6, %v1344_v10, %v1425_v21  ;;  %v1055_v15 = vadd.f32 %v949_v4, %v867_v38  ;;  %v1189_v11 = vrot.slane %v579_v54, 3  ;;  %v478_v23 = vmul.f32 0.125, %v1573_v26 }
  0xd7   : > { %1427 = vst [vmem:[%s1751_s17 + $0xa4] sm:$0x1] %v1426_v58  ;;  %v762_v33 = vrot.slane %v630_v46, 1  ;;  %v950_v1 = vrot.slane %v630_v46, 2  ;;  %v469_v19 = vadd.f32 %v415_v52, %v367_v50  ;;  %v470_v22 = vadd.f32 %v416_v60, %v368_v37 }
  0xd8   : > { %v1294_v7 = vadd.f32 %v1188_v48, %v1055_v15  ;;  %v1190_v0 = vsel %vm1115_vm2, %v1187_v41, %v1189_v11  ;;  %v479_v45 = vmul.f32 0.125, %v1574_v5  ;;  %v264_v35 = vunpack.c.l.bf16 %v2451_v24 }
  0xd9   : > { %v763_v13 = vsel %vm688_vm0, %v760_v8, %v762_v33  ;;  %v951_v16 = vsel %vm876_vm1, %v948_v32, %v950_v1  ;;  %v869_v28 = vadd.f32 %v762_v33, %v579_v54  ;;  %v529_v42 = vadd.f32 %v478_v23, %v469_v19  ;;  %v207_v54 = vld [vmem:[%s1668_s13 + $0xec] sm:$0x3] }
  0xda   : > { %v1345_v55 = vpack.c.bf16 %v1294_v7, %v1294_v7  ;;  %v868_v59 = vadd.f32 %v763_v13, %v578_v18  ;;  %v530_v49 = vadd.f32 %v479_v45, %v470_v22  ;;  %v369_v51 = vmul.f32 0.375, %v261_v14  ;;  %v1430_v14 = vld [vmem:[%s1751_s17 + $0xb0] sm:$0x1] }
  0xdb   : > { %v1057_v2 = vadd.f32 %v950_v1, %v869_v28  ;;  %v580_v12 = vmul.f32 0.125, %v529_v42  ;;  %v631_v17 = vmul.f32 0.375, %v529_v42  ;;  %v417_v29 = vadd.f32 %v2426_v56, %v2347_v47 }
  0xdc   : > { %1428 = vst.msk [vmem:[%s1751_s17 + $0xa8] sm:$0xf] %vm1354_vm5, %v1345_v55  ;;  %v1056_v61 = vadd.f32 %v951_v16, %v868_v59  ;;  %v581_v63 = vmul.f32 0.125, %v530_v49  ;;  %v632_v39 = vmul.f32 0.375, %v530_v49  ;;  %v480_v31 = vmul.f32 0.125, %v264_v35 }
  0xdd   : > { %v1296_v30 = vadd.f32 %v1189_v11, %v1057_v2  ;;  %v764_v18 = vrot.slane %v631_v17, 1  ;;  %v952_v41 = vrot.slane %v631_v17, 2  ;;  %v1191_v43 = vrot.slane %v580_v12, 3 }
  0xde   : > { %v1295_v34 = vadd.f32 %v1190_v0, %v1056_v61  ;;  %v765_v8 = vrot.slane %v632_v39, 1  ;;  %v953_v40 = vrot.slane %v632_v39, 2  ;;  %v1192_v32 = vrot.slane %v581_v63, 3 }
  0xdf   : > { %v1347_v44 = vpack.c.bf16 %v1296_v30, %v1296_v30  ;;  %v471_v47 = vadd.f32 %v417_v29, %v369_v51  ;;  %v265_v56 = vunpack.c.l.bf16 %v205_v27  ;;  %v266_v53 = vunpack.c.h.bf16 %v205_v27 }
  0xe0   : > { %v1346_v48 = vpack.c.bf16 %v1295_v34, %v1295_v34  ;;  %v766_v20 = vsel %vm688_vm0, %v764_v18, %v765_v8  ;;  %v954_v21 = vsel %vm876_vm1, %v952_v41, %v953_v40  ;;  %v1193_v57 = vsel %vm1115_vm2, %v1191_v43, %v1192_v32  ;;  %v1435_v18 = vld [vmem:[%s1751_s17 + $0xbc] sm:$0x1] }
  0xe1   : > { %v1431_v4 = vsel %vm1764_vm6, %v1347_v44, %v1430_v14  ;;  %v870_v6 = vadd.f32 %v766_v20, %v580_v12  ;;  %v531_v10 = vadd.f32 %v480_v31, %v471_v47  ;;  %v418_v38 = vadd.f32 %v367_v50, %v2359_v25 }
  0xe2   : > { %1429 = vst.msk [vmem:[%s1751_s17 + $0xac] sm:$0xf] %vm1354_vm5, %v1346_v48  ;;  %v419_v46 = vadd.f32 %v368_v37, %v2370_v3  ;;  %v421_v52 = vmul.f32 0.375, %v1573_v26  ;;  %v422_v60 = vmul.f32 0.375, %v1574_v5  ;;  %v481_v24 = vmul.f32 0.125, %v265_v56 }
  0xe3   : > { %1432 = vst [vmem:[%s1751_s17 + $0xb0] sm:$0x1] %v1431_v4  ;;  %v1058_v58 = vadd.f32 %v954_v21, %v870_v6  ;;  %v582_v15 = vmul.f32 0.125, %v531_v10  ;;  %v633_v11 = vmul.f32 0.375, %v531_v10  ;;  %v482_v23 = vmul.f32 0.125, %v266_v53 }
  0xe4   : > { %v472_v33 = vadd.f32 %v421_v52, %v418_v38  ;;  %v473_v1 = vadd.f32 %v422_v60, %v419_v46  ;;  %v267_v25 = vunpack.c.l.bf16 %v207_v54  ;;  %v420_v50 = vadd.f32 %v369_v51, %v2392_v9 }
  0xe5   : > { %v1297_v19 = vadd.f32 %v1193_v57, %v1058_v58  ;;  %v767_v3 = vrot.slane %v633_v11, 1  ;;  %v955_v37 = vrot.slane %v633_v11, 2  ;;  %v1194_v22 = vrot.slane %v582_v15, 3  ;;  %v1440_v58 = vld [vmem:[%s1751_s17 + $0xc8] sm:$0x1] }
  0xe6   : > { %v532_v26 = vadd.f32 %v481_v24, %v472_v33  ;;  %v533_v7 = vadd.f32 %v482_v23, %v473_v1  ;;  %v423_v36 = vmul.f32 0.375, %v264_v35  ;;  %v483_v13 = vmul.f32 0.125, %v267_v25 }
  0xe7   : > { %v1348_v5 = vpack.c.bf16 %v1297_v19, %v1297_v19  ;;  %v768_v0 = vsel %vm688_vm0, %v765_v8, %v767_v3  ;;  %v956_v45 = vsel %vm876_vm1, %v953_v40, %v955_v37  ;;  %v872_v28 = vadd.f32 %v767_v3, %v582_v15 }
  0xe8   : > { %v871_v16 = vadd.f32 %v768_v0, %v581_v63  ;;  %v583_v42 = vmul.f32 0.125, %v532_v26  ;;  %v584_v55 = vmul.f32 0.125, %v533_v7  ;;  %v1195_v9 = vsel %vm1115_vm2, %v1192_v32, %v1194_v22 }
  0xe9   : > { %1433 = vst.msk [vmem:[%s1751_s17 + $0xb4] sm:$0xf] %vm1354_vm5, %v1348_v5  ;;  %v634_v59 = vmul.f32 0.375, %v532_v26  ;;  %v635_v49 = vmul.f32 0.375, %v533_v7  ;;  %v474_v51 = vadd.f32 %v423_v36, %v420_v50  ;;  %v1060_v35 = vadd.f32 %v955_v37, %v872_v28 }
  0xea   : > { %v1059_v2 = vadd.f32 %v956_v45, %v871_v16  ;;  %v1196_v12 = vrot.slane %v583_v42, 3  ;;  %v1197_v17 = vrot.slane %v584_v55, 3 }
  0xeb   : > { %v769_v29 = vrot.slane %v634_v59, 1  ;;  %v770_v61 = vrot.slane %v635_v49, 1  ;;  %v957_v39 = vrot.slane %v634_v59, 2  ;;  %v958_v63 = vrot.slane %v635_v49, 2 }
  0xec   : > { %v1298_v31 = vadd.f32 %v1195_v9, %v1059_v2  ;;  %v1299_v27 = vadd.f32 %v1194_v22, %v1060_v35  ;;  %v534_v30 = vadd.f32 %v483_v13, %v474_v51  ;;  %v1198_v40 = vsel %vm1115_vm2, %v1196_v12, %v1197_v17 }
  0xed   : > { %v771_v41 = vsel %vm688_vm0, %v769_v29, %v770_v61  ;;  %v959_v43 = vsel %vm876_vm1, %v957_v39, %v958_v63 }
  0xee   : > { %v1349_v34 = vpack.c.bf16 %v1298_v31, %v1298_v31  ;;  %v1350_v14 = vpack.c.bf16 %v1299_v27, %v1299_v27  ;;  %v873_v8 = vadd.f32 %v771_v41, %v583_v42  ;;  %v585_v32 = vmul.f32 0.125, %v534_v30 }
  0xef   : > { %v636_v44 = vmul.f32 0.375, %v534_v30 }
  0xf0   : > { %1434 = vst.msk [vmem:[%s1751_s17 + $0xb8] sm:$0xf] %vm1354_vm5, %v1349_v34  ;;  %v1436_v47 = vsel %vm1764_vm6, %v1350_v14, %v1435_v18  ;;  %v1061_v56 = vadd.f32 %v959_v43, %v873_v8  ;;  %v1199_v20 = vrot.slane %v585_v32, 3 }
  0xf1   : > { %1437 = vst [vmem:[%s1751_s17 + $0xbc] sm:$0x1] %v1436_v47  ;;  %v772_v53 = vrot.slane %v636_v44, 1  ;;  %v960_v48 = vrot.slane %v636_v44, 2 }
  0xf2   : > { %v1300_v21 = vadd.f32 %v1198_v40, %v1061_v56  ;;  %v1200_v54 = vsel %vm1115_vm2, %v1197_v17, %v1199_v20 }
  0xf3   : > { %v773_v57 = vsel %vm688_vm0, %v770_v61, %v772_v53  ;;  %v961_v4 = vsel %vm876_vm1, %v958_v63, %v960_v48  ;;  %v875_v6 = vadd.f32 %v772_v53, %v585_v32 }
  0xf4   : > { %v1351_v10 = vpack.c.bf16 %v1300_v21, %v1300_v21  ;;  %v874_v38 = vadd.f32 %v773_v57, %v584_v55 }
  0xf5   : > { %v1063_v46 = vadd.f32 %v960_v48, %v875_v6 }
  0xf6   : > { %1438 = vst.msk [vmem:[%s1751_s17 + $0xc0] sm:$0xf] %vm1354_vm5, %v1351_v10  ;;  %v1062_v52 = vadd.f32 %v961_v4, %v874_v38 }
  0xf7   : > { %v1302_v60 = vadd.f32 %v1199_v20, %v1063_v46 }
  0xf8   : > { %v1301_v24 = vadd.f32 %v1200_v54, %v1062_v52 }
  0xf9   : > { %v1353_v15 = vpack.c.bf16 %v1302_v60, %v1302_v60 }
  0xfa   : > { %v1352_v11 = vpack.c.bf16 %v1301_v24, %v1301_v24 }
  0xfb   : > { %v1441_v23 = vsel %vm1764_vm6, %v1353_v15, %v1440_v58 }
  0xfc   : > { %1439 = vst.msk [vmem:[%s1751_s17 + $0xc4] sm:$0xf] %vm1354_vm5, %v1352_v11 }
  0xfd   : > { %1442 = vst [vmem:[%s1751_s17 + $0xc8] sm:$0x1] %v1441_v23 }
  0xfe PF: > { %s11_s8 = sadd.s32 1, %s1632_s8   ;;  %s2528_s6 = smov %s1628_s7 }
  0xff   : > { %p8_p5 = scmp.ge.s32.totalorder %s11_s8, 4   ;;  %s2529_s7 = smov %s2531_s9 }
 0x101   :  { %10 = sbr.rel (!%p8_p5) target bundleno = 2 (0x2), region = 54 }

// kernel: resblock_forward.4
= control target key start
LH: loop header
LB: loop body
LE: loop exit
PB: predicated region body
PF: predicated region fallthrough
CT: control target
= control target key end

     0   :  { %s3869_s12 = smov 0   ;;  %s3871_s13 = smov 0   ;;  %s5091_s0 = inlined_call_operand.vmem [shape: bf16[2,342,4], index: 0, kind: input, shape index: {}]   ;;  %s5092_s1 = inlined_call_operand.vmem [shape: bf16[9,4,4], index: 1, kind: input, shape index: {}]   ;;  %s5093_s2 = inlined_call_operand.vmem [shape: f32[1,4], index: 2, kind: input, shape index: {}]   ;;  %s5094_s3 = inlined_call_operand.vmem [shape: bf16[2,288,4], index: 3, kind: output, shape index: {}]  }
   0x1   :  { %s3873_s14 = smov 0  }
   0x2 LB: > { %s25_s15 = sadd.s32 1, %s3843_s13  ;;  %p3337_p0 = scmp.ge.s32.totalorder %s3847_s14, 1  ;;  %s3847_s14 = sphi %s3873_s14, %s13_s14   ;;  %s3843_s13 = sphi %s3871_s13, %s5126_s13   ;;  %s3839_s12 = sphi %s3869_s12, %s5125_s12  }
   0x3   : > { %p27_p1 = scmp.ge.s32.totalorder %s25_s15, 2  ;;  %p168_p2 = scmp.lt.s32.totalorder %s3847_s14, 3 }
   0x5   : > { %s5128_s15 = smov (%p27_p1, %s25_s15), 0  ;;  %p169_p3 = pnand %p3337_p0, %p168_p2 }
   0x7   : > { %172 = sbr.rel (%p169_p3) target bundleno = 823 (0x337), region = 32 }
   0xc   : > { %v3340_v0 = vld [vmem:[%s5092_s1 + $0x2] sm:$0x3]  ;;  %vm560_vm0 = vcmask 1041408   ;;  %p202_p4 = scmp.lt.s32.totalorder %s3839_s12, 1  ;;  %v3445_v2 = vld [vmem:[%s5092_s1 + $0x4] sm:$0x3] }
   0xd   : > { %v562_v1 = vsel %vm560_vm0, %v3340_v0, 0  ;;  %v259_v3 = vld [vmem:[%s5092_s1] sm:$0x3]  ;;  %v900_v4 = vsel %vm560_vm0, %v3445_v2, 0  ;;  %v3551_v6 = vld [vmem:[%s5092_s1 + $0x8] sm:$0x3] }
   0xe   : > { %3774 = vmatpush.bf16.msra.mxu1 %v562_v1  ;;  %3775 = vmatpush.bf16.msra.mxu2 %v562_v1  ;;  %s5130_s12 = smov (!%p202_p4, %s3839_s12), 1  ;;  %v700_v5 = vsel %vm560_vm0, %v259_v3, 0  ;;  %v1630_v7 = vsel %vm560_vm0, %v3551_v6, 0  ;;  %vm356_vm1 = vsmask.f32 7424  ;;  %vm505_vm2 = vcmask 31744  }
   0xf   : > { %571 = vmatpush.bf16.msra.mxu0 %v562_v1  ;;  %s3777_s24 = smul.u32 172, %s5130_s12  ;;  %3776 = vmatpush.bf16.msra.mxu3 %v562_v1  ;;  %v3464_v45 = vld [vmem:[%s5092_s1 + $0x6] sm:$0x3]  ;;  %vm807_vm3 = vcmask 1046528   ;;  %vm1404_vm4 = vsmask.f32 6400 }
  0x10   : > { %v1261_v53 = vsel %vm560_vm0, %v3464_v45, 0  ;;  %vm2370_vm5 = vsmask.f32 5376  ;;  %vm1773_vm6 = vcmask 1045504   ;;  %vm2739_vm7 = vcmask 1044480   ;;  %s3778_s17 = smul.u32 144, %s5130_s12 }
  0x11   : > { %s3909_s27 = scalar_lea.vmem %s5091_s0, %s3777_s24  ;;  %vm3189_vm9 = vcmask 27648  }
  0x12   : > { %909 = vmatpush.bf16.msrb.mxu2 %v900_v4  ;;  %709 = vmatpush.bf16.msrb.mxu1 %v700_v5  ;;  %v3912_v8 = vld [vmem:[%s3909_s27 + $0x28] sm:$0xff]  ;;  %v3915_v9 = vld [vmem:[%s3909_s27 + $0x30] sm:$0xff]  ;;  %v3921_v11 = vld [vmem:[%s3909_s27 + $0x58] sm:$0xff]  ;;  %s4686_s19 = scalar_lea.vmem %s5094_s3, %s3778_s17 }
  0x13   : > { %1639 = vmatpush.bf16.msrb.mxu0 %v1630_v7  ;;  %v3918_v10 = vld [vmem:[%s3909_s27 + $0x50] sm:$0xff]  ;;  %v3924_v12 = vld [vmem:[%s3909_s27] sm:$0xff]   ;;  %v3927_v13 = vld [vmem:[%s3909_s27 + $0x8] sm:$0xff]  ;;  %v397_v14 = vshll.u32 %v3912_v8, 16  ;;  %v401_v15 = vshrl.u32 %v3912_v8, 16  ;;  %v405_v16 = vshll.u32 %v3915_v9, 16  ;;  %1270 = vmatpush.bf16.msrb.mxu3 %v1261_v53 }
  0x14   : > { %v437_v17 = vshll.u32 %v3918_v10, 16  ;;  %v441_v18 = vshrl.u32 %v3918_v10, 16  ;;  %v445_v19 = vshll.u32 %v3921_v11, 16  ;;  %v358_v20 = vshrl.u32 %v3924_v12, 16  ;;  %v3945_v31 = vld [vmem:[%s3909_s27 + $0x78] sm:$0xff]  ;;  %v3731_v32 = vld [vmem:[%s3909_s27 + $0x80] sm:$0xff] }
  0x15   : > { %v360_v21 = vshll.u32 %v3924_v12, 16  ;;  %v3937_v22 = vrot.slane %v397_v14, 1  ;;  %v407_v23 = vrot.slane %v405_v16, 1  ;;  %v365_v25 = vshll.u32 %v3927_v13, 16  ;;  %v3954_v37 = vld [vmem:[%s3909_s27 + $0x38] sm:$0xff]  ;;  %v3958_v38 = vld [vmem:[%s3909_s27 + $0x60] sm:$0xff] }
  0x16   : > { %v3939_v24 = vrot.slane %v437_v17, 1  ;;  %v447_v26 = vrot.slane %v445_v19, 1  ;;  %v477_v39 = vshll.u32 %v3945_v31, 16  ;;  %v481_v40 = vshrl.u32 %v3945_v31, 16  ;;  %v3963_v42 = vld [vmem:[%s3909_s27 + $0x10] sm:$0xff]  ;;  %v3732_v59 = vld [vmem:[%s3909_s27 + $0x88] sm:$0xff] }
  0x17   : > { %v362_v27 = vrot.slane %v360_v21, 1  ;;  %v403_v28 = vor.u32 %v401_v15, %v3937_v22  ;;  %v367_v30 = vrot.slane %v365_v25, 1  ;;  %v485_v41 = vshll.u32 %v3731_v32, 16  ;;  %v3982_v60 = vld [vmem:[%s3909_s27 + $0x48] sm:$0xff]  ;;  %v3991_v5 = vld [vmem:[%s3909_s27 + $0x40] sm:$0xff]  ;;  %v3999_v17 = vld [vmem:[%s3909_s27 + $0x18] sm:$0xff] }
  0x18   : > { %v443_v29 = vor.u32 %v441_v18, %v3939_v24  ;;  %v3965_v43 = vrot.slane %v477_v39, 1  ;;  %v409_v46 = vshrl.u32 %v3915_v9, 16  ;;  %v413_v47 = vshll.u32 %v3954_v37, 16  ;;  %v3994_v6 = vld [vmem:[%s3909_s27 + $0x68] sm:$0xff]  ;;  %v260_v18 = vld [vmem:[%s3909_s27 + $0x90] sm:$0x1] }
  0x19   : > { %v363_v33 = vor.u32 %v362_v27, %v358_v20  ;;  %v408_v34 = vsel %vm356_vm1, %v403_v28, %v407_v23  ;;  %v487_v44 = vrot.slane %v485_v41, 1  ;;  %v449_v48 = vshrl.u32 %v3921_v11, 16  ;;  %v4008_v27 = vld [vmem:[%s3909_s27 + $0x20] sm:$0xff] }
  0x1a   : > { %v448_v35 = vsel %vm356_vm1, %v443_v29, %v447_v26  ;;  %3414 = vmatmul.msk.bf16.vlgmr.msra.gmra.mxu1 %vm505_vm2, %v408_v34  ;;  %v453_v49 = vshll.u32 %v3958_v38, 16  ;;  %v483_v50 = vor.u32 %v481_v40, %v3965_v43  ;;  %v369_v51 = vshrl.u32 %v3927_v13, 16 }
  0x1b   : > { %3419 = vmatmul.msk.bf16.vlgmr.msra.gmra.mxu2 %vm505_vm2, %v448_v35  ;;  %v368_v36 = vsel %vm356_vm1, %v363_v33, %v367_v30  ;;  %v373_v52 = vshll.u32 %v3963_v42, 16  ;;  %v411_v55 = vor.u32 %v409_v46, %v407_v23  ;;  %v415_v56 = vrot.slane %v413_v47, 1 }
  0x1c   : > { %3409 = vmatmul.msk.bf16.vlgmr.msra.gmra.mxu0 %vm505_vm2, %v368_v36  ;;  %v488_v54 = vsel %vm356_vm1, %v483_v50, %v487_v44  ;;  %v451_v57 = vor.u32 %v449_v48, %v447_v26  ;;  %v455_v58 = vrot.slane %v453_v49, 1  ;;  %v371_v61 = vor.u32 %v369_v51, %v367_v30 }
  0x1d   : > { %3424 = vmatmul.msk.bf16.vlgmr.msra.gmra.mxu3 %vm505_vm2, %v488_v54  ;;  %v375_v62 = vrot.slane %v373_v52, 1  ;;  %v416_v63 = vsel %vm356_vm1, %v411_v55, %v415_v56  ;;  %v489_v1 = vshrl.u32 %v3731_v32, 16  ;;  %v493_v2 = vshll.u32 %v3732_v59, 16  ;;  %v4029_v52 = vld [vmem:[%s3909_s27 + $0x70] sm:$0xff] }
  0x1e   : > { %v456_v0 = vsel %vm356_vm1, %v451_v57, %v455_v58  ;;  %v429_v3 = vshll.u32 %v3982_v60, 16  ;;  %v433_v16 = vshrl.u32 %v3982_v60, 16  ;;  %v417_v20 = vshrl.u32 %v3954_v37, 16 }
  0x1f   : > { %v376_v4 = vsel %vm356_vm1, %v371_v61, %v375_v62  ;;  %v491_v7 = vor.u32 %v489_v1, %v487_v44  ;;  %v495_v14 = vrot.slane %v493_v2, 1  ;;  %v421_v21 = vshll.u32 %v3991_v5, 16 }
  0x20   : > { %v431_v15 = vrot.slane %v429_v3, 1  ;;  %v457_v23 = vshrl.u32 %v3958_v38, 16  ;;  %v461_v25 = vshll.u32 %v3994_v6, 16  ;;  %v336_v28 = vunpack.c.l.b16 %v260_v18 }
  0x21   : > { %v496_v26 = vsel %vm356_vm1, %v491_v7, %v495_v14  ;;  %v377_v30 = vshrl.u32 %v3963_v42, 16  ;;  %v381_v32 = vshll.u32 %v3999_v17, 16  ;;  %v419_v33 = vor.u32 %v417_v20, %v415_v56  ;;  %v3733_v7 = vld [vmem:[%s3909_s27 + $0x10] sm:$0xff] }
  0x22   : > { %v435_v19 = vor.u32 %v433_v16, %v431_v15  ;;  %v423_v34 = vrot.slane %v421_v21, 1  ;;  %v459_v35 = vor.u32 %v457_v23, %v455_v58  ;;  %v463_v36 = vrot.slane %v461_v25, 1  ;;  %v3589_v21 = vld [vmem:[%s5092_s1 + $0xc] sm:$0x3]  ;;  %v3676_v25 = vld [vmem:[%s5092_s1 + $0xe] sm:$0x3] }
  0x23   : > { %v389_v39 = vshll.u32 %v4008_v27, 16  ;;  %v4018_v40 = vpack.c.b16 %v336_v28, %v336_v28  ;;  %v379_v41 = vor.u32 %v377_v30, %v375_v62  ;;  %v383_v44 = vrot.slane %v381_v32, 1  ;;  %v1037_v62 = vld [vmem:[%s3909_s27 + $0x8] sm:$0xe]  ;;  %v3695_v32 = vld [vmem:[%s5092_s1 + $0x10] sm:$0x3] }
  0x24   : > { %v4012_v29 = vsel %vm356_vm1, %v435_v19, %v3939_v24  ;;  %v424_v24 = vsel %vm356_vm1, %v419_v33, %v423_v34  ;;  %v464_v45 = vsel %vm356_vm1, %v459_v35, %v463_v36  ;;  %v497_v47 = vshrl.u32 %v3732_v59, 16 }
  0x25   : > { %v391_v46 = vrot.slane %v389_v39, 1  ;;  %v501_v48 = vshll.u32 %v4018_v40, 16  ;;  %v393_v49 = vshrl.u32 %v4008_v27, 16  ;;  %v384_v50 = vsel %vm356_vm1, %v379_v41, %v383_v44  ;;  %v3734_v41 = vld [vmem:[%s3909_s27 + $0x18] sm:$0xff] }
  0x26   : > { %v499_v53 = vor.u32 %v497_v47, %v495_v14  ;;  %v425_v56 = vshrl.u32 %v3991_v5, 16  ;;  %v465_v57 = vshrl.u32 %v3994_v6, 16  ;;  %v469_v58 = vshll.u32 %v4029_v52, 16 }
  0x27   : > { %v395_v51 = vor.u32 %v393_v49, %v391_v46  ;;  %v503_v54 = vrot.slane %v501_v48, 1  ;;  %v385_v61 = vshrl.u32 %v3999_v17, 16  ;;  %v1113_v3 = vunpack.c.l.b16 %v1037_v62 }
  0x28   : > { %v467_v1 = vor.u32 %v465_v57, %v463_v36  ;;  %v471_v2 = vrot.slane %v469_v58, 1  ;;  %v1170_v20 = vrot.slane %v3733_v7, 1  ;;  %v2596_v28 = vsel %vm560_vm0, %v3676_v25, 0 }
  0x29   : > { %v400_v55 = vsel %vm356_vm1, %v395_v51, %v3937_v22  ;;  %v504_v59 = vsel %vm356_vm1, %v499_v53, %v503_v54  ;;  %2605 = vmatpush.bf16.msra.mxu3 %v2596_v28  ;;  %v2832_v33 = vsel %vm560_vm0, %v3695_v32, 0  ;;  %v1414_v48 = vshrl.u32 %v3733_v7, 16 }
  0x2a   : > { %3415 = vmatmul.msk.bf16.gmra.mxu1 %vm505_vm2, %v416_v63  ;;  %v4040_v63 = vld [vmem:[%s3909_s27 + $0xc] sm:$0xf]  ;;  %v472_v16 = vsel %vm356_vm1, %v467_v1, %v471_v2  ;;  %2841 = vmatpush.bf16.msra.mxu0 %v2832_v33  ;;  %v1417_v49 = vshll.u32 %v3733_v7, 16  ;;  %v1423_v1 = vshrl.u32 %v3734_v41, 16  ;;  %v813_v28 = vrot.slane %v3999_v17, 1  ;;  %v3737_v33 = vld [vmem:[%s3909_s27 + $0x30] sm:$0xff] }
  0x2b   : > { %3420 = vmatmul.msk.bf16.gmra.mxu2 %vm505_vm2, %v456_v0  ;;  %v427_v0 = vor.u32 %v425_v56, %v423_v34  ;;  %v5095_v22 = vunpack.c.l.b16 %v4040_v63  ;;  %v473_v34 = vshrl.u32 %v4029_v52, 16  ;;  %v1416_v54 = vrot.slane %v1414_v48, 1 }
  0x2c   : > { %3410 = vmatmul.msk.bf16.gmra.mxu0 %vm505_vm2, %v376_v4  ;;  %v387_v4 = vor.u32 %v385_v61, %v383_v44  ;;  %v3771_v44 = vld [vmem:[%s3909_s27] sm:$0xf0]  ;;  %v1419_v56 = vrot.slane %v1417_v49, 2 }
  0x2d   : > { %3425 = vmatmul.msk.bf16.gmra.mxu3 %vm505_vm2, %v496_v26  ;;  %v432_v14 = vsel %vm356_vm1, %v427_v0, %v431_v15  ;;  %v1150_v18 = vpack.c.b16 %v5095_v22, %v1113_v3  ;;  %v2227_v15 = vsel %vm560_vm0, %v3589_v21, 0  ;;  %v3570_v26 = vld [vmem:[%s5092_s1 + $0xa] sm:$0x3]  ;;  %v475_v36 = vor.u32 %v473_v34, %v471_v2  ;;  %v3735_v61 = vld [vmem:[%s3909_s27 + $0x20] sm:$0xff] }
  0x2e   : > { %v392_v19 = vsel %vm356_vm1, %v387_v4, %v391_v46  ;;  %2236 = vmatpush.bf16.msra.mxu2 %v2227_v15  ;;  %v1866_v30 = vsel %vm560_vm0, %v3570_v26, 0  ;;  %v1420_v58 = vor.u32 %v1419_v56, %v1416_v54  ;;  %v1174_v0 = vrot.slane %v3735_v61, 1  ;;  %v3743_v22 = vld [vmem:[%s3909_s27 + $0x60] sm:$0xff] }
  0x2f   : > { %v1169_v23 = vrot.slane %v1150_v18, 1  ;;  %1875 = vmatpush.bf16.msra.mxu1 %v1866_v30  ;;  %v480_v39 = vsel %vm356_vm1, %v475_v36, %v3965_v43  ;;  %v1406_v46 = vshrl.u32 %v1150_v18, 16  ;;  %v1409_v47 = vshll.u32 %v1150_v18, 16 }
  0x30   : > { %v1426_v2 = vshll.u32 %v3734_v41, 16  ;;  %v1425_v4 = vrot.slane %v1423_v1, 1  ;;  %v1432_v21 = vshrl.u32 %v3735_v61, 16  ;;  %v1178_v34 = vrot.slane %v3737_v33, 1  ;;  %v3739_v1 = vld [vmem:[%s3909_s27 + $0x40] sm:$0xff] }
  0x31   : > { %v1171_v35 = vsel %vm807_vm3, %v1169_v23, %v1170_v20  ;;  %v1408_v43 = vrot.slane %v1406_v46, 1  ;;  %v1411_v53 = vrot.slane %v1409_v47, 2  ;;  %v1435_v23 = vshll.u32 %v3735_v61, 16  ;;  %v3738_v47 = vld [vmem:[%s3909_s27 + $0x38] sm:$0xff] }
  0x32   : > { %v1428_v7 = vrot.slane %v1426_v2, 2  ;;  %v1434_v25 = vrot.slane %v1432_v21, 1 }
  0x33   : > { %v1412_v57 = vor.u32 %v1411_v53, %v1408_v43  ;;  %v1437_v26 = vrot.slane %v1435_v23, 2  ;;  %v1453_v43 = vshll.u32 %v3737_v33, 16  ;;  %v819_v23 = vrot.slane %v3915_v9, 1 }
  0x35   : > { %v1421_v62 = vsel %vm1404_vm4, %v1412_v57, %v1420_v58  ;;  %v1438_v30 = vor.u32 %v1437_v26, %v1434_v25  ;;  %v1455_v57 = vrot.slane %v1453_v43, 2 }
  0x3a   : > { %3416 = vmatmul.msk.bf16.gmra.mxu1 %vm505_vm2, %v424_v24  ;;  %v1172_v24 = vrot.slane %v3734_v41, 1 }
  0x3b   : > { %3421 = vmatmul.msk.bf16.gmra.mxu2 %vm505_vm2, %v464_v45  ;;  %v3772_v45 = vld [vmem:[%s3909_s27] sm:$0xe] }
  0x3c   : > { %3411 = vmatmul.msk.bf16.gmra.mxu0 %vm505_vm2, %v384_v50  ;;  %v3773_v50 = vor.u32 %v3772_v45, %v3771_v44  ;;  %v1173_v51 = vsel %vm807_vm3, %v1170_v20, %v1172_v24  ;;  %v1175_v3 = vsel %vm807_vm3, %v1172_v24, %v1174_v0  ;;  %v815_v24 = vrot.slane %v4008_v27, 1 }
  0x3d   : > { %3426 = vmatmul.msk.bf16.gmra.mxu3 %vm505_vm2, %v504_v59 }
  0x4a   : > { %3417 = vmatmul.msk.bf16.gmra.mxu1 %vm505_vm2, %v432_v14  ;;  %v811_v14 = vrot.slane %v3963_v42, 1 }
  0x4b   : > { %3422 = vmatmul.msk.bf16.gmra.mxu2 %vm505_vm2, %v472_v16  ;;  %v1429_v16 = vor.u32 %v1428_v7, %v1425_v4  ;;  %v1182_v4 = vrot.slane %v3739_v1, 1  ;;  %v1459_v7 = vshrl.u32 %v3738_v47, 16 }
  0x4c   : > { %3412 = vmatmul.msk.bf16.gmra.mxu0 %vm505_vm2, %v392_v19  ;;  %v814_v32 = vsel %vm807_vm3, %v811_v14, %v813_v28 }
  0x4d   : > { %3533 = vmatmul.msk.bf16.vlgmr.msrb.gmra.mxu3 %vm505_vm2, %v1171_v35  ;;  %v1430_v19 = vsel %vm1404_vm4, %v1420_v58, %v1429_v16  ;;  %v1461_v21 = vrot.slane %v1459_v7, 1 }
  0x5a   : > { %3418 = vmatmul.msk.bf16.gmra.mxu1 %vm505_vm2, %v4012_v29  ;;  %v808_v29 = vrot.slane %v3773_v50, 1  ;;  %v1180_v50 = vrot.slane %v3738_v47, 1 }
  0x5b   : > { %3423 = vmatmul.msk.bf16.gmra.mxu2 %vm505_vm2, %v480_v39 }
  0x5c   : > { %3413 = vmatmul.msk.bf16.gmra.mxu0 %vm505_vm2, %v400_v55  ;;  %v809_v55 = vrot.slane %v3927_v13, 1  ;;  %v1181_v56 = vsel %vm807_vm3, %v1178_v34, %v1180_v50 }
  0x5d   : > { %3534 = vmatmul.msk.bf16.gmra.mxu3 %vm505_vm2, %v1173_v51  ;;  %v1450_v51 = vshrl.u32 %v3737_v33, 16 }
  0x5e   : > { %v810_v59 = vsel %vm807_vm3, %v808_v29, %v809_v55  ;;  %v812_v18 = vsel %vm807_vm3, %v809_v55, %v811_v14  ;;  %v1462_v14 = vshll.u32 %v3738_v47, 16  ;;  %v821_v47 = vrot.slane %v3954_v37, 1 }
  0x5f   : > { %v1452_v55 = vrot.slane %v1450_v51, 1 }
  0x61   : > { %v1456_v58 = vor.u32 %v1455_v57, %v1452_v55  ;;  %v3741_v55 = vld [vmem:[%s3909_s27 + $0x50] sm:$0xff] }
  0x6a   : > { %3427 = vmatmul.msk.bf16.vlgmr.msrb.gmra.mxu1 %vm505_vm2, %v3924_v12  ;;  %v3736_v12 = vld [vmem:[%s3909_s27 + $0x28] sm:$0xff] }
  0x6b   : > { %3446 = vmatmul.msk.bf16.vlgmr.msrb.gmra.mxu2 %vm505_vm2, %v810_v59  ;;  %v1176_v20 = vrot.slane %v3736_v12, 1  ;;  %v1441_v35 = vshrl.u32 %v3736_v12, 16  ;;  %v1444_v36 = vshll.u32 %v3736_v12, 16 }
  0x6c   : > { %3552 = vmatmul.msk.bf16.vlgmr.msrb.gmra.mxu0 %vm505_vm2, %v1421_v62 }
  0x6d   : > { %3535 = vmatmul.msk.bf16.gmra.mxu3 %vm505_vm2, %v1175_v3  ;;  %v1177_v15 = vsel %vm807_vm3, %v1174_v0, %v1176_v20  ;;  %v1179_v39 = vsel %vm807_vm3, %v1176_v20, %v1178_v34  ;;  %v1443_v41 = vrot.slane %v1441_v35, 1  ;;  %v1446_v44 = vrot.slane %v1444_v36, 2 }
  0x6e   : > { %v1468_v35 = vshrl.u32 %v3739_v1, 16  ;;  %v1471_v36 = vshll.u32 %v3739_v1, 16 }
  0x6f   : > { %v1447_v45 = vor.u32 %v1446_v44, %v1443_v41 }
  0x71   : > { %v1448_v49 = vsel %vm1404_vm4, %v1438_v30, %v1447_v45  ;;  %v1457_v3 = vsel %vm1404_vm4, %v1447_v45, %v1456_v58 }
  0x7a   : > { %3428 = vmatmul.msk.bf16.gmra.mxu1 %vm505_vm2, %v3927_v13  ;;  %v1439_v13 = vsel %vm1404_vm4, %v1429_v16, %v1438_v30 }
  0x7b   : > { %3447 = vmatmul.msk.bf16.gmra.mxu2 %vm505_vm2, %v812_v18 }
  0x7c   : > { %3553 = vmatmul.msk.bf16.gmra.mxu0 %vm505_vm2, %v1430_v19  ;;  %v1183_v19 = vsel %vm807_vm3, %v1180_v50, %v1182_v4 }
  0x7d   : > { %3536 = vmatmul.msk.bf16.gmra.mxu3 %vm505_vm2, %v1177_v15 }
  0x8a   : > { %3429 = vmatmul.msk.bf16.gmra.mxu1 %vm505_vm2, %v3963_v42  ;;  %v816_v42 = vsel %vm807_vm3, %v813_v28, %v815_v24 }
  0x8b   : > { %3448 = vmatmul.msk.bf16.gmra.mxu2 %vm505_vm2, %v814_v32  ;;  %v3740_v32 = vld [vmem:[%s3909_s27 + $0x48] sm:$0xff] }
  0x8c   : > { %3554 = vmatmul.msk.bf16.gmra.mxu0 %vm505_vm2, %v1439_v13  ;;  %v1184_v34 = vrot.slane %v3740_v32, 1  ;;  %v1480_v1 = vshll.u32 %v3740_v32, 16 }
  0x8d   : > { %3537 = vmatmul.msk.bf16.gmra.mxu3 %vm505_vm2, %v1179_v39 }
  0x97   : > { %v4114_v46 = vpop.f32.mrf.mxu1 }
  0x99   : > { %v4118_v48 = vpop.f32.mrf.mxu0 }
  0x9a   : > { %3430 = vmatmul.msk.bf16.gmra.mxu1 %vm505_vm2, %v3999_v17  ;;  %v817_v17 = vrot.slane %v3912_v8, 1 }
  0x9b   : > { %3449 = vmatmul.msk.bf16.gmra.mxu2 %vm505_vm2, %v816_v42  ;;  %v1470_v42 = vrot.slane %v1468_v35, 1  ;;  %v3742_v35 = vld [vmem:[%s3909_s27 + $0x58] sm:$0xff] }
  0x9c   : > { %3555 = vmatmul.msk.bf16.gmra.mxu0 %vm505_vm2, %v1448_v49  ;;  %v818_v0 = vsel %vm807_vm3, %v815_v24, %v817_v17  ;;  %v820_v30 = vsel %vm807_vm3, %v817_v17, %v819_v23  ;;  %v1185_v24 = vsel %vm807_vm3, %v1182_v4, %v1184_v34 }
  0x9d   : > { %3538 = vmatmul.msk.bf16.gmra.mxu3 %vm505_vm2, %v1181_v56  ;;  %v822_v56 = vsel %vm807_vm3, %v819_v23, %v821_v47 }
  0x9e   : > { %v4125_v53 = vpop.f32.mrf.mxu2 }
  0x9f   : > { %v4127_v54 = vpop.f32.mrf.mxu1 }
  0xa0   : > { %v4136_v61 = vpop.f32.mrf.mxu3 }
  0xa1   : > { %v4130_v29 = vpop.f32.mrf.mxu0  ;;  %5097 = vst [vmem:[#allocation2_spill] sm:$0xff] %v4136_v61 }
  0xa6   : > { %v4134_v59 = vpop.f32.mrf.mxu2 }
  0xa7   : > { %v4138_v62 = vpop.f32.mrf.mxu1 }
  0xa8   : > { %v4151_v18 = vpop.f32.mrf.mxu3 }
  0xa9   : > { %v4142_v2 = vpop.f32.mrf.mxu0  ;;  %5098 = vst [vmem:[#allocation3_spill] sm:$0xff] %v4151_v18 }
  0xaa   : > { %3431 = vmatmul.msk.bf16.gmra.mxu1 %vm505_vm2, %v4008_v27  ;;  %v1464_v27 = vrot.slane %v1462_v14, 2 }
  0xab   : > { %3450 = vmatmul.msk.bf16.gmra.mxu2 %vm505_vm2, %v818_v0  ;;  %v1477_v0 = vshrl.u32 %v3740_v32, 16 }
  0xac   : > { %3556 = vmatmul.msk.bf16.gmra.mxu0 %vm505_vm2, %v1457_v3  ;;  %v1465_v15 = vor.u32 %v1464_v27, %v1461_v21  ;;  %v823_v27 = vrot.slane %v3991_v5, 1 }
  0xad   : > { %3539 = vmatmul.msk.bf16.gmra.mxu3 %vm505_vm2, %v1183_v19  ;;  %v1479_v21 = vrot.slane %v1477_v0, 1 }
  0xae   : > { %v4149_v16 = vpop.f32.mrf.mxu2  ;;  %v1466_v13 = vsel %vm1404_vm4, %v1456_v58, %v1465_v15  ;;  %v1186_v58 = vrot.slane %v3741_v55, 1 }
  0xaf   : > { %v4153_v12 = vpop.f32.mrf.mxu1 }
  0xb0   : > { %v4162_v26 = vpop.f32.mrf.mxu3  ;;  %v1187_v14 = vsel %vm807_vm3, %v1184_v34, %v1186_v58 }
  0xb1   : > { %v4156_v20 = vpop.f32.mrf.mxu0  ;;  %5099 = vst [vmem:[#allocation4_spill] sm:$0xff] %v4162_v26 }
  0xb6   : > { %v4160_v25 = vpop.f32.mrf.mxu2 }
  0xb7   : > { %v4164_v28 = vpop.f32.mrf.mxu1 }
  0xb8   : > { %v4177_v41 = vpop.f32.mrf.mxu3 }
  0xb9   : > { %v4168_v33 = vpop.f32.mrf.mxu0  ;;  %5100 = vst [vmem:[#allocation5_spill] sm:$0xff] %v4177_v41 }
  0xba   : > { %3432 = vmatmul.msk.bf16.gmra.mxu1 %vm505_vm2, %v3912_v8  ;;  %v1473_v8 = vrot.slane %v1471_v36, 2 }
  0xbb   : > { %3451 = vmatmul.msk.bf16.gmra.mxu2 %vm505_vm2, %v820_v30 }
  0xbc   : > { %3557 = vmatmul.msk.bf16.gmra.mxu0 %vm505_vm2, %v1466_v13  ;;  %v1474_v49 = vor.u32 %v1473_v8, %v1470_v42  ;;  %v824_v13 = vsel %vm807_vm3, %v821_v47, %v823_v27  ;;  %v1486_v42 = vshrl.u32 %v3741_v55, 16  ;;  %v1489_v8 = vshll.u32 %v3741_v55, 16 }
  0xbd   : > { %3540 = vmatmul.msk.bf16.gmra.mxu3 %vm505_vm2, %v1185_v24  ;;  %v1188_v24 = vrot.slane %v3742_v35, 1 }
  0xbe   : > { %v4175_v39 = vpop.f32.mrf.mxu2  ;;  %v1475_v17 = vsel %vm1404_vm4, %v1465_v15, %v1474_v49 }
  0xbf   : > { %v4179_v44 = vpop.f32.mrf.mxu1  ;;  %v1189_v0 = vsel %vm807_vm3, %v1186_v58, %v1188_v24  ;;  %v1190_v58 = vrot.slane %v3743_v22, 1 }
  0xc0   : > { %v4188_v51 = vpop.f32.mrf.mxu3 }
  0xc1   : > { %v4182_v45 = vpop.f32.mrf.mxu0  ;;  %5101 = vst [vmem:[#allocation6_spill] sm:$0xff] %v4188_v51  ;;  %v1191_v26 = vsel %vm807_vm3, %v1188_v24, %v1190_v58  ;;  %v3744_v24 = vld [vmem:[%s3909_s27 + $0x68] sm:$0xff] }
  0xc6   : > { %v4186_v50 = vpop.f32.mrf.mxu2 }
  0xc7   : > { %v4190_v43 = vpop.f32.mrf.mxu1 }
  0xc8   : > { %v4203_v4 = vpop.f32.mrf.mxu3 }
  0xc9   : > { %v4194_v57 = vpop.f32.mrf.mxu0  ;;  %5102 = vst [vmem:[#allocation7_spill] sm:$0xff] %v4203_v4 }
  0xca   : > { %3433 = vmatmul.msk.bf16.gmra.mxu1 %vm505_vm2, %v3915_v9  ;;  %v1482_v9 = vrot.slane %v1480_v1, 2 }
  0xcb   : > { %3452 = vmatmul.msk.bf16.gmra.mxu2 %vm505_vm2, %v822_v56 }
  0xcc   : > { %3558 = vmatmul.msk.bf16.gmra.mxu0 %vm505_vm2, %v1475_v17  ;;  %v1483_v23 = vor.u32 %v1482_v9, %v1479_v21 }
  0xcd   : > { %3541 = vmatmul.msk.bf16.gmra.mxu3 %vm505_vm2, %v1187_v14  ;;  %v1491_v14 = vrot.slane %v1489_v8, 2  ;;  %v1495_v8 = vshrl.u32 %v3742_v35, 16 }
  0xce   : > { %v4201_v3 = vpop.f32.mrf.mxu2  ;;  %v1484_v34 = vsel %vm1404_vm4, %v1474_v49, %v1483_v23  ;;  %v1488_v49 = vrot.slane %v1486_v42, 1 }
  0xcf   : > { %v4205_v7 = vpop.f32.mrf.mxu1  ;;  %v1497_v61 = vrot.slane %v1495_v8, 1 }
  0xd0   : > { %v1272_v30 = vpop.f32.mrf.mxu3  ;;  %v1492_v21 = vor.u32 %v1491_v14, %v1488_v49 }
  0xd1   : > { %v4208_v19 = vpop.f32.mrf.mxu0 }
  0xd2   : > { %v1493_v51 = vsel %vm1404_vm4, %v1483_v23, %v1492_v21 }
  0xd6   : > { %v4212_v15 = vpop.f32.mrf.mxu2 }
  0xd7   : > { %v4214_v32 = vpop.f32.mrf.mxu1 }
  0xd8   : > { %v1274_v17 = vpop.f32.mrf.mxu3 }
  0xd9   : > { %v4218_v36 = vpop.f32.mrf.mxu0 }
  0xda   : > { %3434 = vmatmul.msk.bf16.gmra.mxu1 %vm505_vm2, %v3954_v37  ;;  %v825_v37 = vrot.slane %v3982_v60, 1 }
  0xdb   : > { %3453 = vmatmul.msk.bf16.gmra.mxu2 %vm505_vm2, %v824_v13 }
  0xdc   : > { %3559 = vmatmul.msk.bf16.gmra.mxu0 %vm505_vm2, %v1484_v34  ;;  %v826_v34 = vsel %vm807_vm3, %v823_v27, %v825_v37 }
  0xdd   : > { %3542 = vmatmul.msk.bf16.gmra.mxu3 %vm505_vm2, %v1189_v0  ;;  %v1498_v0 = vshll.u32 %v3742_v35, 16 }
  0xde   : > { %v4225_v56 = vpop.f32.mrf.mxu2 }
  0xdf   : > { %5103 = vst [vmem:[#allocation8_spill] sm:$0xff] %v4225_v56  ;;  %v4227_v47 = vpop.f32.mrf.mxu1 }
  0xe0   : > { %v1277_v13 = vpop.f32.mrf.mxu3 }
  0xe1   : > { %v4230_v1 = vpop.f32.mrf.mxu0 }
  0xe6   : > { %v4234_v9 = vpop.f32.mrf.mxu2 }
  0xe7   : > { %5104 = vst [vmem:[#allocation9_spill] sm:$0xff] %v4234_v9  ;;  %v711_v55 = vpop.f32.mrf.mxu1 }
  0xe8   : > { %v712_v42 = vadd.f32 %v711_v55, %v4118_v48  ;;  %v1279_v14 = vpop.f32.mrf.mxu3 }
  0xe9   : > { %v1641_v4 = vpop.f32.mrf.mxu0 }
  0xea   : > { %3435 = vmatmul.msk.bf16.gmra.mxu1 %vm505_vm2, %v3991_v5  ;;  %v1500_v5 = vrot.slane %v1498_v0, 2  ;;  %v1507_v0 = vshll.u32 %v3743_v22, 16 }
  0xeb   : > { %3454 = vmatmul.msk.bf16.gmra.mxu2 %vm505_vm2, %v826_v34 }
  0xec   : > { %3560 = vmatmul.msk.bf16.gmra.mxu0 %vm505_vm2, %v1493_v51  ;;  %v827_v51 = vrot.slane %v3918_v10, 1  ;;  %v1501_v35 = vor.u32 %v1500_v5, %v1497_v61 }
  0xed   : > { %3543 = vmatmul.msk.bf16.gmra.mxu3 %vm505_vm2, %v1191_v26 }
  0xee   : > { %v911_v49 = vpop.f32.mrf.mxu2  ;;  %v828_v56 = vsel %vm807_vm3, %v825_v37, %v827_v51  ;;  %v1502_v8 = vsel %vm1404_vm4, %v1492_v21, %v1501_v35 }
  0xef   : > { %v1001_v41 = vadd.f32 %v911_v49, %v712_v42  ;;  %v713_v27 = vpop.f32.mrf.mxu1 }
  0xf0   : > { %v714_v48 = vadd.f32 %v713_v27, %v4130_v29  ;;  %v1282_v9 = vpop.f32.mrf.mxu3  ;;  %v1192_v29 = vrot.slane %v3744_v24, 1 }
  0xf1   : > { %v1362_v23 = vadd.f32 %v1272_v30, %v1001_v41  ;;  %v1643_v18 = vpop.f32.mrf.mxu0 }
  0xf2   : > { %v1193_v21 = vsel %vm807_vm3, %v1190_v58, %v1192_v29  ;;  %v3745_v58 = vld [vmem:[%s3909_s27 + $0x70] sm:$0xff] }
  0xf3   : > { %v4246_v34 = vadd.f32 %v1641_v4, %v1362_v23  ;;  %v1504_v4 = vshrl.u32 %v3743_v22, 16 }
  0xf6   : > { %v913_v55 = vpop.f32.mrf.mxu2 }
  0xf7   : > { %v1002_v42 = vadd.f32 %v913_v55, %v714_v48  ;;  %v716_v49 = vpop.f32.mrf.mxu1  ;;  %v1506_v48 = vrot.slane %v1504_v4, 1  ;;  %v829_v55 = vrot.slane %v3921_v11, 1 }
  0xf8   : > { %v717_v61 = vadd.f32 %v716_v49, %v4142_v2  ;;  %v1284_v27 = vpop.f32.mrf.mxu3 }
  0xf9   : > { %v1363_v41 = vadd.f32 %v1274_v17, %v1002_v42  ;;  %v1646_v30 = vpop.f32.mrf.mxu0 }
  0xfa   : > { %3436 = vmatmul.msk.bf16.gmra.mxu1 %vm505_vm2, %v3982_v60 }
  0xfb   : > { %3455 = vmatmul.msk.bf16.gmra.mxu2 %vm505_vm2, %v828_v56  ;;  %v4256_v26 = vadd.f32 %v1643_v18, %v1363_v41  ;;  %v1509_v56 = vrot.slane %v1507_v0, 2 }
  0xfc   : > { %3561 = vmatmul.msk.bf16.gmra.mxu0 %vm505_vm2, %v1502_v8 }
  0xfd   : > { %3544 = vmatmul.msk.bf16.gmra.mxu3 %vm505_vm2, %v1193_v21  ;;  %v1510_v22 = vor.u32 %v1509_v56, %v1506_v48 }
  0xfe   : > { %v916_v37 = vpop.f32.mrf.mxu2 }
  0xff   : > { %v1003_v17 = vadd.f32 %v916_v37, %v717_v61  ;;  %v718_v23 = vpop.f32.mrf.mxu1  ;;  %v830_v61 = vsel %vm807_vm3, %v827_v51, %v829_v55  ;;  %v1511_v4 = vsel %vm1404_vm4, %v1501_v35, %v1510_v22 }
 0x100   : > { %v719_v2 = vadd.f32 %v718_v23, %v4156_v20  ;;  %v1287_v49 = vpop.f32.mrf.mxu3  ;;  %v1194_v20 = vrot.slane %v3745_v58, 1  ;;  %v1516_v23 = vshll.u32 %v3744_v24, 16 }
 0x101   : > { %v1364_v5 = vadd.f32 %v1277_v13, %v1003_v17  ;;  %v1648_v60 = vpop.f32.mrf.mxu0  ;;  %v1513_v17 = vshrl.u32 %v3744_v24, 16 }
 0x102   : > { %v1195_v35 = vsel %vm807_vm3, %v1192_v29, %v1194_v20  ;;  %v3746_v29 = vld [vmem:[%s3909_s27 + $0x78] sm:$0xff] }
 0x103   : > { %v4262_v18 = vadd.f32 %v1646_v30, %v1364_v5  ;;  %v1515_v56 = vrot.slane %v1513_v17, 1 }
 0x106   : > { %v918_v42 = vpop.f32.mrf.mxu2 }
 0x107   : > { %v1004_v41 = vadd.f32 %v918_v42, %v719_v2  ;;  %v721_v8 = vpop.f32.mrf.mxu1  ;;  %v1518_v2 = vrot.slane %v1516_v23, 2  ;;  %v831_v42 = vrot.slane %v3958_v38, 1 }
 0x108   : > { %v722_v0 = vadd.f32 %v721_v8, %v4168_v33  ;;  %v1289_v21 = vpop.f32.mrf.mxu3 }
 0x109   : > { %v1365_v13 = vadd.f32 %v1279_v14, %v1004_v41  ;;  %v1651_v37 = vpop.f32.mrf.mxu0  ;;  %v1519_v24 = vor.u32 %v1518_v2, %v1515_v56 }
 0x10a   : > { %3437 = vmatmul.msk.bf16.gmra.mxu1 %vm505_vm2, %v3918_v10 }
 0x10b   : > { %3456 = vmatmul.msk.bf16.gmra.mxu2 %vm505_vm2, %v830_v61  ;;  %v4272_v30 = vadd.f32 %v1648_v60, %v1365_v13  ;;  %v1520_v17 = vsel %vm1404_vm4, %v1510_v22, %v1519_v24 }
 0x10c   : > { %3562 = vmatmul.msk.bf16.gmra.mxu0 %vm505_vm2, %v1511_v4  ;;  %v832_v4 = vsel %vm807_vm3, %v829_v55, %v831_v42 }
 0x10d   : > { %3545 = vmatmul.msk.bf16.gmra.mxu3 %vm505_vm2, %v1195_v35 }
 0x10e   : > { %v921_v51 = vpop.f32.mrf.mxu2 }
 0x10f   : > { %v1005_v14 = vadd.f32 %v921_v51, %v722_v0  ;;  %v723_v5 = vpop.f32.mrf.mxu1  ;;  %v1522_v51 = vshrl.u32 %v3745_v58, 16 }
 0x110   : > { %v724_v33 = vadd.f32 %v723_v5, %v4182_v45  ;;  %v1292_v8 = vpop.f32.mrf.mxu3  ;;  %v1196_v45 = vrot.slane %v3746_v29, 1 }
 0x111   : > { %v1366_v48 = vadd.f32 %v1282_v9, %v1005_v14  ;;  %v1653_v10 = vpop.f32.mrf.mxu0  ;;  %v1525_v14 = vshll.u32 %v3745_v58, 16  ;;  %v1524_v56 = vrot.slane %v1522_v51, 1 }
 0x112   : > { %v1197_v22 = vsel %vm807_vm3, %v1194_v20, %v1196_v45  ;;  %v3747_v20 = vld [vmem:[%s3909_s27 + $0x80] sm:$0xff] }
 0x113   : > { %v4278_v60 = vadd.f32 %v1651_v37, %v1366_v48  ;;  %v1527_v2 = vrot.slane %v1525_v14, 2  ;;  %v1531_v14 = vshrl.u32 %v3746_v29, 16 }
 0x115   : > { %v1528_v58 = vor.u32 %v1527_v2, %v1524_v56  ;;  %v835_v2 = vrot.slane %v4029_v52, 1 }
 0x116   : > { %v923_v41 = vpop.f32.mrf.mxu2 }
 0x117   : > { %v1006_v61 = vadd.f32 %v923_v41, %v724_v33  ;;  %v726_v13 = vpop.f32.mrf.mxu1  ;;  %v833_v33 = vrot.slane %v3994_v6, 1 }
 0x118   : > { %v727_v23 = vadd.f32 %v726_v13, %v4194_v57  ;;  %v1294_v5 = vpop.f32.mrf.mxu3 }
 0x119   : > { %v1367_v9 = vadd.f32 %v1284_v27, %v1006_v61  ;;  %v1656_v0 = vpop.f32.mrf.mxu0 }
 0x11a   : > { %3438 = vmatmul.msk.bf16.gmra.mxu1 %vm505_vm2, %v3921_v11 }
 0x11b   : > { %3457 = vmatmul.msk.bf16.gmra.mxu2 %vm505_vm2, %v832_v4  ;;  %v4288_v37 = vadd.f32 %v1653_v10, %v1367_v9  ;;  %v834_v9 = vsel %vm807_vm3, %v831_v42, %v833_v33 }
 0x11c   : > { %3563 = vmatmul.msk.bf16.gmra.mxu0 %vm505_vm2, %v1520_v17 }
 0x11d   : > { %3546 = vmatmul.msk.bf16.gmra.mxu3 %vm505_vm2, %v1197_v22 }
 0x11e   : > { %v926_v55 = vpop.f32.mrf.mxu2 }
 0x11f   : > { %v1007_v27 = vadd.f32 %v926_v55, %v727_v23  ;;  %v728_v35 = vpop.f32.mrf.mxu1  ;;  %v1529_v23 = vsel %vm1404_vm4, %v1519_v24, %v1528_v58  ;;  %v1534_v55 = vshll.u32 %v3746_v29, 16 }
 0x120   : > { %v729_v57 = vadd.f32 %v728_v35, %v4208_v19  ;;  %v1297_v61 = vpop.f32.mrf.mxu3  ;;  %v1198_v19 = vrot.slane %v3747_v20, 1 }
 0x121   : > { %v1368_v48 = vadd.f32 %v1287_v49, %v1007_v27  ;;  %v1658_v11 = vpop.f32.mrf.mxu0  ;;  %v1536_v56 = vrot.slane %v1534_v55, 2  ;;  %v1543_v55 = vshll.u32 %v3747_v20, 16 }
 0x122   : > { %v1199_v24 = vsel %vm807_vm3, %v1196_v45, %v1198_v19  ;;  %v3748_v45 = vld [vmem:[%s3909_s27 + $0x88] sm:$0xff] }
 0x123   : > { %v4294_v10 = vadd.f32 %v1656_v0, %v1368_v48  ;;  %v1533_v48 = vrot.slane %v1531_v14, 1  ;;  %v1540_v14 = vshrl.u32 %v3747_v20, 16 }
 0x125   : > { %v1537_v29 = vor.u32 %v1536_v56, %v1533_v48  ;;  %v837_v48 = vrot.slane %v3945_v31, 1 }
 0x126   : > { %v928_v41 = vpop.f32.mrf.mxu2 }
 0x127   : > { %v1008_v13 = vadd.f32 %v928_v41, %v729_v57  ;;  %v731_v4 = vpop.f32.mrf.mxu1 }
 0x128   : > { %v732_v51 = vadd.f32 %v731_v4, %v4218_v36  ;;  %v1299_v27 = vpop.f32.mrf.mxu3 }
 0x129   : > { %v1369_v49 = vadd.f32 %v1289_v21, %v1008_v13  ;;  %v1661_v17 = vpop.f32.mrf.mxu0 }
 0x12a   : > { %3439 = vmatmul.msk.bf16.gmra.mxu1 %vm505_vm2, %v3958_v38 }
 0x12b   : > { %3458 = vmatmul.msk.bf16.gmra.mxu2 %vm505_vm2, %v834_v9  ;;  %v4304_v0 = vadd.f32 %v1658_v11, %v1369_v49  ;;  %v836_v9 = vsel %vm807_vm3, %v833_v33, %v835_v2 }
 0x12c   : > { %3564 = vmatmul.msk.bf16.gmra.mxu0 %vm505_vm2, %v1529_v23  ;;  %v1538_v23 = vsel %vm1404_vm4, %v1528_v58, %v1537_v29 }
 0x12d   : > { %3547 = vmatmul.msk.bf16.gmra.mxu3 %vm505_vm2, %v1199_v24  ;;  %v1542_v24 = vrot.slane %v1540_v14, 1 }
 0x12e   : > { %v931_v42 = vpop.f32.mrf.mxu2 }
 0x12f   : > { %v1009_v21 = vadd.f32 %v931_v42, %v732_v51  ;;  %v733_v35 = vpop.f32.mrf.mxu1 }
 0x130   : > { %v734_v36 = vadd.f32 %v733_v35, %v4230_v1  ;;  %v1302_v41 = vpop.f32.mrf.mxu3  ;;  %v1200_v1 = vrot.slane %v3748_v45, 1 }
 0x131   : > { %v1370_v22 = vadd.f32 %v1292_v8, %v1009_v21  ;;  %v1663_v38 = vpop.f32.mrf.mxu0 }
 0x132   : > { %v1201_v58 = vsel %vm807_vm3, %v1198_v19, %v1200_v1  ;;  %v3749_v19 = vld [vmem:[%s3909_s27 + $0x90] sm:$0xff] }
 0x133   : > { %v4310_v11 = vadd.f32 %v1661_v17, %v1370_v22  ;;  %v1545_v22 = vrot.slane %v1543_v55, 2 }
 0x135   : > { %v1546_v20 = vor.u32 %v1545_v22, %v1542_v24 }
 0x136   : > { %v933_v57 = vpop.f32.mrf.mxu2 }
 0x137   : > { %v1010_v13 = vadd.f32 %v933_v57, %v734_v36  ;;  %v736_v4 = vpop.f32.mrf.mxu1 }
 0x138   : > { %v737_v51 = vadd.f32 %v736_v4, %v4114_v46  ;;  %v1304_v42 = vpop.f32.mrf.mxu3  ;;  %v838_v4 = vsel %vm807_vm3, %v835_v2, %v837_v48  ;;  %v1549_v2 = vshrl.u32 %v3748_v45, 16 }
 0x139   : > { %v1371_v8 = vadd.f32 %v1294_v5, %v1010_v13  ;;  %v1666_v49 = vpop.f32.mrf.mxu0 }
 0x13a   : > { %3440 = vmatmul.msk.bf16.gmra.mxu1 %vm505_vm2, %v3994_v6 }
 0x13b   : > { %3459 = vmatmul.msk.bf16.gmra.mxu2 %vm505_vm2, %v836_v9  ;;  %v4320_v17 = vadd.f32 %v1663_v38, %v1371_v8  ;;  %v1547_v8 = vsel %vm1404_vm4, %v1537_v29, %v1546_v20 }
 0x13c   : > { %3565 = vmatmul.msk.bf16.gmra.mxu0 %vm505_vm2, %v1538_v23  ;;  %v1552_v23 = vshll.u32 %v3748_v45, 16 }
 0x13d   : > { %3548 = vmatmul.msk.bf16.gmra.mxu3 %vm505_vm2, %v1201_v58  ;;  %v1073_v58 = vld [vmem:[%s3909_s27 + $0x98] sm:$0x1] }
 0x13e   : > { %v936_v33 = vpop.f32.mrf.mxu2 }
 0x13f   : > { %v1011_v5 = vadd.f32 %v936_v33, %v737_v51  ;;  %v738_v21 = vpop.f32.mrf.mxu1 }
 0x140   : > { %v739_v46 = vadd.f32 %v738_v21, %v4127_v54  ;;  %v1307_v36 = vpop.f32.mrf.mxu3  ;;  %v1202_v54 = vrot.slane %v3749_v19, 1  ;;  %v1554_v21 = vrot.slane %v1552_v23, 2 }
 0x141   : > { %v1372_v35 = vadd.f32 %v1297_v61, %v1011_v5  ;;  %v1668_v6 = vpop.f32.mrf.mxu0  ;;  %v1551_v5 = vrot.slane %v1549_v2, 1  ;;  %v3805_v2 = vld [vmem:[%s3909_s27 + $0x78] sm:$0xff] }
 0x143   : > { %v4326_v38 = vadd.f32 %v1666_v49, %v1372_v35 }
 0x146   : > { %v938_v56 = vpop.f32.mrf.mxu2 }
 0x147   : > { %v1012_v57 = vadd.f32 %v938_v56, %v739_v46  ;;  %v741_v13 = vpop.f32.mrf.mxu1 }
 0x148   : > { %v742_v49 = vadd.f32 %v741_v13, %v4138_v62  ;;  %v4340_v51 = vpop.f32.mrf.mxu3  ;;  %v4348_v62 = vld [vmem:[%s3909_s27 + $0x80] sm:$0xff] }
 0x149   : > { %v1373_v61 = vadd.f32 %v1299_v27, %v1012_v57  ;;  %v1671_v9 = vpop.f32.mrf.mxu0  ;;  %v839_v45 = vrot.slane %v4348_v62, 1 }
 0x14a   : > { %3441 = vmatmul.msk.bf16.gmra.mxu1 %vm505_vm2, %v4029_v52  ;;  %v1203_v52 = vsel %vm807_vm3, %v1200_v1, %v1202_v54  ;;  %v1555_v1 = vor.u32 %v1554_v21, %v1551_v5  ;;  %v4372_v21 = vld [vmem:[%s3909_s27 + $0x18] sm:$0xff] }
 0x14b   : > { %3460 = vmatmul.msk.bf16.gmra.mxu2 %vm505_vm2, %v838_v4  ;;  %v4336_v31 = vadd.f32 %v1668_v6, %v1373_v61  ;;  %v1149_v6 = vunpack.c.l.b16 %v1073_v58  ;;  %v840_v57 = vsel %vm807_vm3, %v837_v48, %v839_v45 }
 0x14c   : > { %3566 = vmatmul.msk.bf16.gmra.mxu0 %vm505_vm2, %v1547_v8  ;;  %v2003_v8 = vld [vmem:[%s3909_s27 + $0x10] sm:$0xc] }
 0x14d   : > { %3549 = vmatmul.msk.bf16.gmra.mxu3 %vm505_vm2, %v1203_v52  ;;  %v1168_v13 = vpack.c.b16 %v1149_v6, %v1149_v6  ;;  %v2079_v48 = vunpack.c.l.b16 %v2003_v8 }
 0x14e   : > { %v941_v27 = vpop.f32.mrf.mxu2 }
 0x14f   : > { %v1013_v29 = vadd.f32 %v941_v27, %v742_v49  ;;  %v743_v14 = vpop.f32.mrf.mxu1  ;;  %v4358_v49 = vld [vmem:[%s3909_s27 + $0x14] sm:$0xf]  ;;  %v1204_v23 = vrot.slane %v1168_v13, 1  ;;  %v1558_v27 = vshrl.u32 %v3749_v19, 16 }
 0x150   : > { %v744_v24 = vadd.f32 %v743_v14, %v4153_v12  ;;  %v4352_v22 = vpop.f32.mrf.mxu3 }
 0x151   : > { %v1374_v55 = vadd.f32 %v1302_v41, %v1013_v29  ;;  %v1673_v33 = vpop.f32.mrf.mxu0  ;;  %v1561_v29 = vshll.u32 %v3749_v19, 16 }
 0x153   : > { %v4345_v35 = vadd.f32 %v1671_v9, %v1374_v55  ;;  %v1556_v9 = vsel %vm1404_vm4, %v1546_v20, %v1555_v1 }
 0x156   : > { %v943_v41 = vpop.f32.mrf.mxu2 }
 0x157   : > { %v1014_v46 = vadd.f32 %v943_v41, %v744_v24  ;;  %v746_v56 = vpop.f32.mrf.mxu1  ;;  %v1560_v41 = vrot.slane %v1558_v27, 1 }
 0x158   : > { %v747_v20 = vadd.f32 %v746_v56, %v4164_v28  ;;  %v4368_v52 = vpop.f32.mrf.mxu3  ;;  %v1398_v28 = vld [vmem:[%s3909_s27 + $0x98] sm:$0x3]  ;;  %v4380_v56 = vld [vmem:[%s3909_s27 + $0x88] sm:$0xff] }
 0x159   : > { %v1375_v4 = vadd.f32 %v1304_v42, %v1014_v46  ;;  %v1676_v61 = vpop.f32.mrf.mxu0  ;;  %v5096_v42 = vunpack.c.l.b16 %v4358_v49  ;;  %v1563_v46 = vrot.slane %v1561_v29, 2  ;;  %v841_v19 = vrot.slane %v4380_v56, 1 }
 0x15a   : > { %3442 = vmatmul.msk.bf16.gmra.mxu1 %vm505_vm2, %v3805_v2  ;;  %v1402_v2 = vunpack.c.l.b16 %v1398_v28 }
 0x15b   : > { %3461 = vmatmul.msk.bf16.gmra.mxu2 %vm505_vm2, %v840_v57  ;;  %v4363_v12 = vadd.f32 %v1673_v33, %v1375_v4  ;;  %v1205_v33 = vsel %vm807_vm3, %v1202_v54, %v1204_v23  ;;  %v4376_v58 = vpack.c.b16 %v5096_v42, %v2079_v48  ;;  %v2380_v4 = vshrl.u32 %v4372_v21, 16 }
 0x15c   : > { %3567 = vmatmul.msk.bf16.gmra.mxu0 %vm505_vm2, %v1556_v9  ;;  %v1564_v8 = vor.u32 %v1563_v46, %v1560_v41  ;;  %v842_v27 = vsel %vm807_vm3, %v839_v45, %v841_v19 }
 0x15d   : > { %5105 = vst [vmem:[#allocation10_spill] sm:$0xff] %v4363_v12  ;;  %3550 = vmatmul.msk.bf16.gmra.mxu3 %vm505_vm2, %v1205_v33  ;;  %v2372_v54 = vshrl.u32 %v4376_v58, 16  ;;  %v2375_v13 = vshll.u32 %v4376_v58, 16  ;;  %v4396_v12 = vpack.c.b16 %v1402_v2, %v1402_v2  ;;  %v843_v2 = vrot.slane %v4018_v40, 1 }
 0x15e   : > { %v946_v14 = vpop.f32.mrf.mxu2 }
 0x15f   : > { %v1015_v55 = vadd.f32 %v946_v14, %v747_v20  ;;  %v748_v5 = vpop.f32.mrf.mxu1  ;;  %v2374_v29 = vrot.slane %v2372_v54, 2  ;;  %v2377_v14 = vrot.slane %v2375_v13, 3 }
 0x160   : > { %v749_v9 = vadd.f32 %v748_v5, %v4179_v44  ;;  %v4391_v48 = vpop.f32.mrf.mxu3 }
 0x161   : > { %v1376_v6 = vadd.f32 %v1307_v36, %v1015_v55  ;;  %v1678_v24 = vpop.f32.mrf.mxu0  ;;  %v2383_v36 = vshll.u32 %v4372_v21, 16  ;;  %v2382_v55 = vrot.slane %v2380_v4, 2  ;;  %v2378_v45 = vor.u32 %v2377_v14, %v2374_v29 }
 0x163   : > { %v4384_v57 = vadd.f32 %v1676_v61, %v1376_v6  ;;  %v2385_v33 = vrot.slane %v2383_v36, 3 }
 0x165   : > { %5106 = vst [vmem:[#allocation11_spill] sm:$0xff] %v4384_v57  ;;  %v1565_v57 = vsel %vm1404_vm4, %v1555_v1, %v1564_v8  ;;  %v2386_v5 = vor.u32 %v2385_v33, %v2382_v55  ;;  %v1570_v1 = vshll.u32 %v4396_v12, 16  ;;  %v844_v33 = vsel %vm807_vm3, %v841_v19, %v843_v2  ;;  %v4441_v2 = vld [vmem:[%s3909_s27 + $0x28] sm:$0xff] }
 0x166   : > { %v948_v23 = vpop.f32.mrf.mxu2 }
 0x167   : > { %v1016_v20 = vadd.f32 %v948_v23, %v749_v9  ;;  %v751_v61 = vpop.f32.mrf.mxu1  ;;  %v2387_v13 = vsel %vm2370_vm5, %v2378_v45, %v2386_v5 }
 0x168   : > { %v752_v41 = vadd.f32 %v751_v61, %v4190_v43  ;;  %v4407_v28 = vpop.f32.mrf.mxu3  ;;  %v1572_v43 = vrot.slane %v1570_v1, 2  ;;  %v2733_v1 = vld [vmem:[%s3909_s27 + $0x10] sm:$0x8] }
 0x169   : > { %v1377_v6 = vadd.f32 %v4340_v51, %v1016_v20  ;;  %v1681_v42 = vpop.f32.mrf.mxu0  ;;  %v1567_v51 = vshrl.u32 %v4396_v12, 16 }
 0x16a   : > { %3443 = vmatmul.msk.bf16.gmra.mxu1 %vm505_vm2, %v4348_v62 }
 0x16b   : > { %3462 = vmatmul.msk.bf16.gmra.mxu2 %vm505_vm2, %v842_v27  ;;  %v4401_v44 = vadd.f32 %v1678_v24, %v1377_v6  ;;  %v4411_v24 = vld [vmem:[%s3909_s27 + $0x20] sm:$0xff]  ;;  %v1569_v36 = vrot.slane %v1567_v51, 1  ;;  %v1767_v6 = vld [vmem:[%s3909_s27 + $0x8] sm:$0xc] }
 0x16c   : > { %3568 = vmatmul.msk.bf16.gmra.mxu0 %vm505_vm2, %v1565_v57  ;;  %v2389_v23 = vshrl.u32 %v4411_v24, 16  ;;  %v2392_v20 = vshll.u32 %v4411_v24, 16 }
 0x16d   : > { %3677 = vmatmul.msk.bf16.vlgmr.msra.gmra.mxu3 %vm505_vm2, %v2387_v13  ;;  %v1573_v61 = vor.u32 %v1572_v43, %v1569_v36 }
 0x16e   : > { %v951_v46 = vpop.f32.mrf.mxu2  ;;  %v2394_v45 = vrot.slane %v2392_v20, 3  ;;  %v5108_v20 = vunpack.c.l.b16 %v4358_v49 }
 0x16f   : > { %v1017_v54 = vadd.f32 %v951_v46, %v752_v41  ;;  %v753_v62 = vpop.f32.mrf.mxu1  ;;  %v1574_v51 = vsel %vm1404_vm4, %v1564_v8, %v1573_v61  ;;  %v3807_v61 = vld [vmem:[%s3909_s27 + $0x10] sm:$0xff] }
 0x170   : > { %v754_v27 = vadd.f32 %v753_v62, %v4205_v7  ;;  %v1771_v7 = vunpack.c.l.b16 %v1767_v6  ;;  %v2741_v6 = vrot.slane %v4372_v21, 3 }
 0x171   : > { %v1378_v57 = vadd.f32 %v4352_v22, %v1017_v54  ;;  %v1683_v4 = vpop.f32.mrf.mxu0  ;;  %v4421_v22 = vpop.f32.mrf.mxu3 }
 0x173   : > { %v4415_v9 = vadd.f32 %v1681_v42, %v1378_v57  ;;  %v2391_v42 = vrot.slane %v2389_v23, 2  ;;  %v5107_v57 = vunpack.c.l.b16 %v4040_v63  ;;  %v2135_v63 = vrot.slane %v4376_v58, 2 }
 0x175   : > { %v2395_v19 = vor.u32 %v2394_v45, %v2391_v42  ;;  %v1772_v36 = vpack.c.b16 %v5107_v57, %v1771_v7 }
 0x176   : > { %v953_v29 = vpop.f32.mrf.mxu2 }
 0x177   : > { %v1018_v14 = vadd.f32 %v953_v29, %v754_v27  ;;  %v756_v55 = vpop.f32.mrf.mxu1  ;;  %v2396_v43 = vsel %vm2370_vm5, %v2386_v5, %v2395_v19  ;;  %v1775_v29 = vrot.slane %v3807_v61, 2  ;;  %v2398_v5 = vshrl.u32 %v4441_v2, 16 }
 0x178   : > { %v757_v54 = vadd.f32 %v756_v55, %v4214_v32  ;;  %v1774_v32 = vrot.slane %v1772_v36, 2  ;;  %v2136_v55 = vrot.slane %v4372_v21, 2 }
 0x179   : > { %v1379_v40 = vadd.f32 %v4368_v52, %v1018_v14  ;;  %v1686_v41 = vpop.f32.mrf.mxu0  ;;  %v2737_v52 = vunpack.c.l.b16 %v2733_v1  ;;  %v4435_v13 = vpop.f32.mrf.mxu3  ;;  %v2400_v1 = vrot.slane %v2398_v5, 2 }
 0x17a   : > { %3444 = vmatmul.msk.bf16.gmra.mxu1 %vm505_vm2, %v4380_v56  ;;  %v2137_v58 = vsel %vm1773_vm6, %v2135_v63, %v2136_v55  ;;  %v2138_v63 = vrot.slane %v4411_v24, 2 }
 0x17b   : > { %3463 = vmatmul.msk.bf16.gmra.mxu2 %vm505_vm2, %v844_v33  ;;  %v4431_v46 = vadd.f32 %v1683_v4, %v1379_v40  ;;  %v2738_v27 = vpack.c.b16 %v5108_v20, %v2737_v52  ;;  %v2401_v33 = vshll.u32 %v4441_v2, 16 }
 0x17c   : > { %3569 = vmatmul.msk.bf16.gmra.mxu0 %vm505_vm2, %v1574_v51  ;;  %v1776_v51 = vsel %vm1773_vm6, %v1774_v32, %v1775_v29  ;;  %v3808_v32 = vld [vmem:[%s3909_s27 + $0x18] sm:$0xff] }
 0x17d   : > { %3678 = vmatmul.msk.bf16.gmra.mxu3 %vm505_vm2, %v2396_v43  ;;  %v2740_v49 = vrot.slane %v2738_v27, 3  ;;  %v2403_v7 = vrot.slane %v2401_v33, 3  ;;  %v1777_v61 = vrot.slane %v3808_v32, 2 }
 0x17e   : > { %v956_v62 = vpop.f32.mrf.mxu2 }
 0x17f   : > { %v1019_v8 = vadd.f32 %v956_v62, %v757_v54  ;;  %v758_v56 = vpop.f32.mrf.mxu1  ;;  %v2404_v62 = vor.u32 %v2403_v7, %v2400_v1 }
 0x181   : > { %v1380_v4 = vadd.f32 %v4391_v48, %v1019_v8  ;;  %v1688_v23 = vpop.f32.mrf.mxu0  ;;  %v759_v48 = vadd.f32 %v758_v56, %v4227_v47  ;;  %v1327_v45 = vpop.f32.mrf.mxu3  ;;  %v2742_v47 = vsel %vm2739_vm7, %v2740_v49, %v2741_v6 }
 0x183   : > { %v4448_v14 = vadd.f32 %v1686_v41, %v1380_v4  ;;  %v4468_v4 = vld [vmem:[%s3909_s27 + $0x30] sm:$0xff] }
 0x184   : > { %v2410_v5 = vshll.u32 %v4468_v4, 16 }
 0x186   : > { %v958_v42 = vpop.f32.mrf.mxu2 }
 0x187   : > { %v1020_v40 = vadd.f32 %v958_v42, %v759_v48  ;;  %v761_v41 = vpop.f32.mrf.mxu1 }
 0x188   : > { %v762_v8 = vadd.f32 %v761_v41, %v4125_v53  ;;  %v2407_v53 = vshrl.u32 %v4468_v4, 16  ;;  %v2139_v41 = vsel %vm1773_vm6, %v2136_v55, %v2138_v63 }
 0x189   : > { %v1381_v54 = vadd.f32 %v4407_v28, %v1020_v40  ;;  %v1691_v52 = vpop.f32.mrf.mxu0  ;;  %v1329_v36 = vpop.f32.mrf.mxu3  ;;  %v2405_v28 = vsel %vm2370_vm5, %v2395_v19, %v2404_v62  ;;  %v2743_v19 = vrot.slane %v4411_v24, 3  ;;  %v1778_v40 = vsel %vm1773_vm6, %v1775_v29, %v1777_v61 }
 0x18a   : > { %3571 = vmatmul.msk.bf16.vlgmr.msra.gmra.mxu1 %vm505_vm2, %v1776_v51  ;;  %v2409_v51 = vrot.slane %v2407_v53, 2 }
 0x18b   : > { %3658 = vmatmul.msk.bf16.vlgmr.msra.gmra.mxu2 %vm505_vm2, %v2137_v58  ;;  %v4462_v21 = vadd.f32 %v1688_v23, %v1381_v54  ;;  %v2412_v58 = vrot.slane %v2410_v5, 3  ;;  %v2744_v54 = vsel %vm2739_vm7, %v2741_v6, %v2743_v19 }
 0x18c   : > { %3696 = vmatmul.msk.bf16.vlgmr.msra.gmra.mxu0 %vm505_vm2, %v2742_v47 }
 0x18d   : > { %3679 = vmatmul.msk.bf16.gmra.mxu3 %vm505_vm2, %v2405_v28  ;;  %v2413_v24 = vor.u32 %v2412_v58, %v2409_v51  ;;  %v3809_v28 = vld [vmem:[%s3909_s27 + $0x20] sm:$0xff] }
 0x18e   : > { %v961_v57 = vpop.f32.mrf.mxu2 }
 0x18f   : > { %v1021_v56 = vadd.f32 %v961_v57, %v762_v8  ;;  %v763_v43 = vpop.f32.mrf.mxu1  ;;  %v4492_v57 = vld [vmem:[%s3909_s27 + $0x38] sm:$0xff] }
 0x190   : > { %v764_v33 = vadd.f32 %v763_v43, %v4134_v59  ;;  %v2419_v32 = vshll.u32 %v4492_v57, 16 }
 0x191   : > { %v1382_v20 = vadd.f32 %v4421_v22, %v1021_v56  ;;  %v1693_v27 = vpop.f32.mrf.mxu0  ;;  %v1332_v49 = vpop.f32.mrf.mxu3 }
 0x193   : > { %v4472_v23 = vadd.f32 %v1691_v52, %v1382_v20  ;;  %v1779_v20 = vrot.slane %v3809_v28, 2 }
 0x196   : > { %v963_v48 = vpop.f32.mrf.mxu2 }
 0x197   : > { %v1022_v22 = vadd.f32 %v963_v48, %v764_v33  ;;  %v766_v42 = vpop.f32.mrf.mxu1 }
 0x198   : > { %v767_v29 = vadd.f32 %v766_v42, %v4149_v16  ;;  %v2416_v16 = vshrl.u32 %v4492_v57, 16 }
 0x199   : > { %v1383_v1 = vadd.f32 %v4435_v13, %v1022_v22  ;;  %v1696_v7 = vpop.f32.mrf.mxu0  ;;  %v1334_v52 = vpop.f32.mrf.mxu3  ;;  %v2414_v13 = vsel %vm2370_vm5, %v2404_v62, %v2413_v24  ;;  %v2745_v62 = vrot.slane %v4441_v2, 3  ;;  %v1780_v22 = vsel %vm1773_vm6, %v1777_v61, %v1779_v20 }
 0x19a   : > { %3572 = vmatmul.msk.bf16.gmra.mxu1 %vm505_vm2, %v1778_v40  ;;  %v2418_v40 = vrot.slane %v2416_v16, 2 }
 0x19b   : > { %3659 = vmatmul.msk.bf16.gmra.mxu2 %vm505_vm2, %v2139_v41  ;;  %v4486_v59 = vadd.f32 %v1693_v27, %v1383_v1  ;;  %v2140_v27 = vrot.slane %v4441_v2, 2  ;;  %v2421_v41 = vrot.slane %v2419_v32, 3  ;;  %v2746_v1 = vsel %vm2739_vm7, %v2743_v19, %v2745_v62 }
 0x19c   : > { %3697 = vmatmul.msk.bf16.gmra.mxu0 %vm505_vm2, %v2744_v54 }
 0x19d   : > { %3680 = vmatmul.msk.bf16.gmra.mxu3 %vm505_vm2, %v2414_v13  ;;  %v2141_v42 = vsel %vm1773_vm6, %v2138_v63, %v2140_v27  ;;  %v2422_v2 = vor.u32 %v2421_v41, %v2418_v40  ;;  %v3810_v13 = vld [vmem:[%s3909_s27 + $0x28] sm:$0xff] }
 0x19e   : > { %v966_v55 = vpop.f32.mrf.mxu2 }
 0x19f   : > { %v1023_v47 = vadd.f32 %v966_v55, %v767_v29  ;;  %v768_v8 = vpop.f32.mrf.mxu1  ;;  %v4514_v55 = vld [vmem:[%s3909_s27 + $0x40] sm:$0xff] }
 0x1a0   : > { %v769_v53 = vadd.f32 %v768_v8, %v4160_v25  ;;  %v2428_v28 = vshll.u32 %v4514_v55, 16 }
 0x1a1   : > { %v1384_v6 = vadd.f32 %v1327_v45, %v1023_v47  ;;  %v1698_v56 = vpop.f32.mrf.mxu0  ;;  %v1337_v33 = vpop.f32.mrf.mxu3 }
 0x1a3   : > { %v4495_v43 = vadd.f32 %v1696_v7, %v1384_v6  ;;  %v1781_v6 = vrot.slane %v3810_v13, 2 }
 0x1a6   : > { %v968_v5 = vpop.f32.mrf.mxu2 }
 0x1a7   : > { %v1024_v45 = vadd.f32 %v968_v5, %v769_v53  ;;  %v771_v48 = vpop.f32.mrf.mxu1 }
 0x1a8   : > { %v772_v61 = vadd.f32 %v771_v48, %v4175_v39  ;;  %v2425_v39 = vshrl.u32 %v4514_v55, 16 }
 0x1a9   : > { %v1385_v51 = vadd.f32 %v1329_v36, %v1024_v45  ;;  %v1701_v58 = vpop.f32.mrf.mxu0  ;;  %v1339_v7 = vpop.f32.mrf.mxu3  ;;  %v2423_v36 = vsel %vm2370_vm5, %v2413_v24, %v2422_v2  ;;  %v2747_v24 = vrot.slane %v4468_v4, 3  ;;  %v1782_v45 = vsel %vm1773_vm6, %v1779_v20, %v1781_v6 }
 0x1aa   : > { %3573 = vmatmul.msk.bf16.gmra.mxu1 %vm505_vm2, %v1780_v22  ;;  %v2427_v22 = vrot.slane %v2425_v39, 2 }
 0x1ab   : > { %3660 = vmatmul.msk.bf16.gmra.mxu2 %vm505_vm2, %v2141_v42  ;;  %v4508_v25 = vadd.f32 %v1698_v56, %v1385_v51  ;;  %v2142_v56 = vrot.slane %v4468_v4, 2  ;;  %v2430_v42 = vrot.slane %v2428_v28, 3  ;;  %v2748_v51 = vsel %vm2739_vm7, %v2745_v62, %v2747_v24 }
 0x1ac   : > { %3698 = vmatmul.msk.bf16.gmra.mxu0 %vm505_vm2, %v2746_v1 }
 0x1ad   : > { %3681 = vmatmul.msk.bf16.gmra.mxu3 %vm505_vm2, %v2423_v36  ;;  %v2143_v48 = vsel %vm1773_vm6, %v2140_v27, %v2142_v56  ;;  %v2431_v4 = vor.u32 %v2430_v42, %v2427_v22  ;;  %v3811_v36 = vld [vmem:[%s3909_s27 + $0x30] sm:$0xff] }
 0x1ae   : > { %v971_v63 = vpop.f32.mrf.mxu2 }
 0x1af   : > { %v1025_v54 = vadd.f32 %v971_v63, %v772_v61  ;;  %v773_v29 = vpop.f32.mrf.mxu1  ;;  %v4536_v63 = vld [vmem:[%s3909_s27 + $0x48] sm:$0xff] }
 0x1b0   : > { %v774_v16 = vadd.f32 %v773_v29, %v4186_v50  ;;  %v2437_v13 = vshll.u32 %v4536_v63, 16 }
 0x1b1   : > { %v1386_v19 = vadd.f32 %v1332_v49, %v1025_v54  ;;  %v1703_v47 = vpop.f32.mrf.mxu0  ;;  %v1342_v53 = vpop.f32.mrf.mxu3 }
 0x1b3   : > { %v4517_v8 = vadd.f32 %v1701_v58, %v1386_v19  ;;  %v1783_v19 = vrot.slane %v3811_v36, 2  ;;  %v2146_v36 = vrot.slane %v4514_v55, 2 }
 0x1b6   : > { %v973_v32 = vpop.f32.mrf.mxu2 }
 0x1b7   : > { %v1026_v49 = vadd.f32 %v973_v32, %v774_v16  ;;  %v776_v5 = vpop.f32.mrf.mxu1 }
 0x1b8   : > { %v777_v20 = vadd.f32 %v776_v5, %v4201_v3  ;;  %v2434_v3 = vshrl.u32 %v4536_v63, 16 }
 0x1b9   : > { %v1387_v40 = vadd.f32 %v1334_v52, %v1026_v49  ;;  %v1706_v41 = vpop.f32.mrf.mxu0  ;;  %v1344_v58 = vpop.f32.mrf.mxu3  ;;  %v2432_v52 = vsel %vm2370_vm5, %v2422_v2, %v2431_v4  ;;  %v2749_v2 = vrot.slane %v4492_v57, 3  ;;  %v1784_v49 = vsel %vm1773_vm6, %v1781_v6, %v1783_v19  ;;  %v5109_v6 = vld [vmem:[#allocation8_spill] sm:$0xff] }
 0x1ba   : > { %3574 = vmatmul.msk.bf16.gmra.mxu1 %vm505_vm2, %v1782_v45  ;;  %v2436_v45 = vrot.slane %v2434_v3, 2 }
 0x1bb   : > { %3661 = vmatmul.msk.bf16.gmra.mxu2 %vm505_vm2, %v2143_v48  ;;  %v4530_v50 = vadd.f32 %v1703_v47, %v1387_v40  ;;  %v2144_v47 = vrot.slane %v4492_v57, 2  ;;  %v2439_v48 = vrot.slane %v2437_v13, 3  ;;  %v2750_v40 = vsel %vm2739_vm7, %v2747_v24, %v2749_v2 }
 0x1bc   : > { %3699 = vmatmul.msk.bf16.gmra.mxu0 %vm505_vm2, %v2748_v51 }
 0x1bd   : > { %3682 = vmatmul.msk.bf16.gmra.mxu3 %vm505_vm2, %v2432_v52  ;;  %v2145_v5 = vsel %vm1773_vm6, %v2142_v56, %v2144_v47  ;;  %v2440_v57 = vor.u32 %v2439_v48, %v2436_v45  ;;  %v2147_v45 = vsel %vm1773_vm6, %v2144_v47, %v2146_v36 }
 0x1be   : > { %v976_v27 = vpop.f32.mrf.mxu2 }
 0x1bf   : > { %v1027_v1 = vadd.f32 %v976_v27, %v777_v20  ;;  %v778_v61 = vpop.f32.mrf.mxu1 }
 0x1c0   : > { %v779_v39 = vadd.f32 %v778_v61, %v4212_v15 }
 0x1c1   : > { %v1388_v62 = vadd.f32 %v1337_v33, %v1027_v1  ;;  %v1708_v54 = vpop.f32.mrf.mxu0  ;;  %v1347_v16 = vpop.f32.mrf.mxu3  ;;  %v4558_v1 = vld [vmem:[%s3909_s27 + $0x50] sm:$0xff] }
 0x1c2   : > { %v2443_v3 = vshrl.u32 %v4558_v1, 16  ;;  %v2446_v13 = vshll.u32 %v4558_v1, 16 }
 0x1c3   : > { %v4539_v29 = vadd.f32 %v1706_v41, %v1388_v62  ;;  %v3812_v62 = vld [vmem:[%s3909_s27 + $0x38] sm:$0xff] }
 0x1c4   : > { %v2445_v48 = vrot.slane %v2443_v3, 2 }
 0x1c6   : > { %v978_v28 = vpop.f32.mrf.mxu2 }
 0x1c7   : > { %v1028_v33 = vadd.f32 %v978_v28, %v779_v39  ;;  %v781_v32 = vpop.f32.mrf.mxu1  ;;  %v5110_v39 = vld [vmem:[#allocation9_spill] sm:$0xff] }
 0x1c8   : > { %v782_v41 = vadd.f32 %v781_v32, %v5109_v6 }
 0x1c9   : > { %v1389_v22 = vadd.f32 %v1339_v7, %v1028_v33  ;;  %v1711_v42 = vpop.f32.mrf.mxu0  ;;  %v1349_v51 = vpop.f32.mrf.mxu3  ;;  %v2441_v7 = vsel %vm2370_vm5, %v2431_v4, %v2440_v57  ;;  %v2751_v4 = vrot.slane %v4514_v55, 3 }
 0x1ca   : > { %3575 = vmatmul.msk.bf16.gmra.mxu1 %vm505_vm2, %v1784_v49 }
 0x1cb   : > { %3662 = vmatmul.msk.bf16.gmra.mxu2 %vm505_vm2, %v2145_v5  ;;  %v4552_v15 = vadd.f32 %v1708_v54, %v1389_v22  ;;  %v1785_v54 = vrot.slane %v3812_v62, 2  ;;  %v2448_v22 = vrot.slane %v2446_v13, 3  ;;  %v2752_v6 = vsel %vm2739_vm7, %v2749_v2, %v2751_v4 }
 0x1cc   : > { %3700 = vmatmul.msk.bf16.gmra.mxu0 %vm505_vm2, %v2750_v40 }
 0x1cd   : > { %3683 = vmatmul.msk.bf16.gmra.mxu3 %vm505_vm2, %v2441_v7  ;;  %v1786_v5 = vsel %vm1773_vm6, %v1783_v19, %v1785_v54  ;;  %v5111_v19 = vld [vmem:[#allocation2_spill] sm:$0xff] }
 0x1ce   : > { %v981_v56 = vpop.f32.mrf.mxu2 }
 0x1cf   : > { %v1029_v20 = vadd.f32 %v981_v56, %v782_v41  ;;  %v783_v27 = vpop.f32.mrf.mxu1  ;;  %v2449_v41 = vor.u32 %v2448_v22, %v2445_v48 }
 0x1d0   : > { %v784_v28 = vadd.f32 %v783_v27, %v5110_v39  ;;  %v2148_v39 = vrot.slane %v4536_v63, 2 }
 0x1d1   : > { %v1390_v24 = vadd.f32 %v1342_v53, %v1029_v20  ;;  %v1713_v61 = vpop.f32.mrf.mxu0  ;;  %v1352_v32 = vpop.f32.mrf.mxu3 }
 0x1d3   : > { %v4561_v52 = vadd.f32 %v1711_v42, %v1390_v24  ;;  %v4580_v24 = vld [vmem:[%s3909_s27 + $0x58] sm:$0xff] }
 0x1d6   : > { %v983_v33 = vpop.f32.mrf.mxu2 }
 0x1d7   : > { %v1030_v53 = vadd.f32 %v983_v33, %v784_v28  ;;  %v786_v49 = vpop.f32.mrf.mxu1  ;;  %v2452_v28 = vshrl.u32 %v4580_v24, 16  ;;  %v2455_v33 = vshll.u32 %v4580_v24, 16 }
 0x1d8   : > { %v787_v56 = vadd.f32 %v786_v49, %v5111_v19 }
 0x1d9   : > { %v1391_v42 = vadd.f32 %v1344_v58, %v1030_v53  ;;  %v1716_v40 = vpop.f32.mrf.mxu0  ;;  %v1354_v20 = vpop.f32.mrf.mxu3  ;;  %v2450_v58 = vsel %vm2370_vm5, %v2440_v57, %v2449_v41  ;;  %v5112_v53 = vld [vmem:[#allocation3_spill] sm:$0xff]  ;;  %v2753_v57 = vrot.slane %v4536_v63, 3 }
 0x1da   : > { %3576 = vmatmul.msk.bf16.gmra.mxu1 %vm505_vm2, %v1786_v5 }
 0x1db   : > { %3663 = vmatmul.msk.bf16.gmra.mxu2 %vm505_vm2, %v2147_v45  ;;  %v4574_v55 = vadd.f32 %v1713_v61, %v1391_v42  ;;  %v3813_v61 = vld [vmem:[%s3909_s27 + $0x40] sm:$0xff]  ;;  %v2149_v42 = vsel %vm1773_vm6, %v2146_v36, %v2148_v39 }
 0x1dc   : > { %3701 = vmatmul.msk.bf16.gmra.mxu0 %vm505_vm2, %v2752_v6  ;;  %v1787_v13 = vrot.slane %v3813_v61, 2  ;;  %v2457_v6 = vrot.slane %v2455_v33, 3 }
 0x1dd   : > { %3684 = vmatmul.msk.bf16.gmra.mxu3 %vm505_vm2, %v2450_v58 }
 0x1de   : > { %v986_v47 = vpop.f32.mrf.mxu2  ;;  %v1788_v22 = vsel %vm1773_vm6, %v1785_v54, %v1787_v13  ;;  %v5113_v54 = vld [vmem:[#allocation4_spill] sm:$0xff] }
 0x1df   : > { %v1031_v27 = vadd.f32 %v986_v47, %v787_v56  ;;  %v788_v7 = vpop.f32.mrf.mxu1  ;;  %v2754_v47 = vsel %vm2739_vm7, %v2751_v4, %v2753_v57 }
 0x1e0   : > { %v789_v49 = vadd.f32 %v788_v7, %v5112_v53 }
 0x1e1   : > { %v1392_v2 = vadd.f32 %v1347_v16, %v1031_v27  ;;  %v1718_v62 = vpop.f32.mrf.mxu0  ;;  %v1357_v45 = vpop.f32.mrf.mxu3 }
 0x1e3   : > { %v4583_v3 = vadd.f32 %v1716_v40, %v1392_v2  ;;  %v2454_v40 = vrot.slane %v2452_v28, 2  ;;  %v4602_v28 = vld [vmem:[%s3909_s27 + $0x60] sm:$0xff] }
 0x1e5   : > { %v2458_v27 = vor.u32 %v2457_v6, %v2454_v40 }
 0x1e6   : > { %v988_v5 = vpop.f32.mrf.mxu2 }
 0x1e7   : > { %v1032_v16 = vadd.f32 %v988_v5, %v789_v49  ;;  %v791_v48 = vpop.f32.mrf.mxu1  ;;  %v2150_v5 = vrot.slane %v4558_v1, 2 }
 0x1e8   : > { %v792_v7 = vadd.f32 %v791_v48, %v5113_v54  ;;  %v2464_v48 = vshll.u32 %v4602_v28, 16 }
 0x1e9   : > { %v1393_v19 = vadd.f32 %v1349_v51, %v1032_v16  ;;  %v1721_v56 = vpop.f32.mrf.mxu0  ;;  %v1359_v58 = vpop.f32.mrf.mxu3  ;;  %v2459_v51 = vsel %vm2370_vm5, %v2449_v41, %v2458_v27  ;;  %v2461_v16 = vshrl.u32 %v4602_v28, 16  ;;  %v2755_v41 = vrot.slane %v4558_v1, 3 }
 0x1ea   : > { %3577 = vmatmul.msk.bf16.gmra.mxu1 %vm505_vm2, %v1788_v22  ;;  %v5114_v22 = vld [vmem:[#allocation5_spill] sm:$0xff] }
 0x1eb   : > { %3664 = vmatmul.msk.bf16.gmra.mxu2 %vm505_vm2, %v2149_v42  ;;  %v4596_v63 = vadd.f32 %v1718_v62, %v1393_v19  ;;  %v3814_v62 = vld [vmem:[%s3909_s27 + $0x48] sm:$0xff]  ;;  %v2463_v54 = vrot.slane %v2461_v16, 2 }
 0x1ec   : > { %3702 = vmatmul.msk.bf16.gmra.mxu0 %vm505_vm2, %v2754_v47  ;;  %v1789_v49 = vrot.slane %v3814_v62, 2 }
 0x1ed   : > { %3685 = vmatmul.msk.bf16.gmra.mxu3 %vm505_vm2, %v2459_v51  ;;  %v2756_v51 = vsel %vm2739_vm7, %v2753_v57, %v2755_v41  ;;  %v4626_v57 = vld [vmem:[%s3909_s27 + $0x68] sm:$0xff] }
 0x1ee   : > { %v991_v36 = vpop.f32.mrf.mxu2  ;;  %v1790_v47 = vsel %vm1773_vm6, %v1787_v13, %v1789_v49  ;;  %v5115_v13 = vld [vmem:[#allocation6_spill] sm:$0xff] }
 0x1ef   : > { %v1033_v2 = vadd.f32 %v991_v36, %v792_v7  ;;  %v793_v61 = vpop.f32.mrf.mxu1  ;;  %v2466_v7 = vrot.slane %v2464_v48, 3 }
 0x1f0   : > { %v794_v42 = vadd.f32 %v793_v61, %v5114_v22 }
 0x1f1   : > { %v1394_v4 = vadd.f32 %v1352_v32, %v1033_v2  ;;  %v1723_v33 = vpop.f32.mrf.mxu0  ;;  %v2607_v6 = vpop.f32.mrf.mxu3  ;;  %v2467_v61 = vor.u32 %v2466_v7, %v2463_v54  ;;  %v5117_v54 = vld [vmem:[#allocation7_spill] sm:$0xff] }
 0x1f3   : > { %v4605_v53 = vadd.f32 %v1721_v56, %v1394_v4  ;;  %v2151_v56 = vsel %vm1773_vm6, %v2148_v39, %v2150_v5  ;;  %v2468_v48 = vsel %vm2370_vm5, %v2458_v27, %v2467_v61  ;;  %v2757_v27 = vrot.slane %v4580_v24, 3 }
 0x1f6   : > { %v993_v40 = vpop.f32.mrf.mxu2 }
 0x1f7   : > { %v1034_v32 = vadd.f32 %v993_v40, %v794_v42  ;;  %v796_v19 = vpop.f32.mrf.mxu1  ;;  %v3815_v40 = vld [vmem:[%s3909_s27 + $0x50] sm:$0xff] }
 0x1f8   : > { %v797_v4 = vadd.f32 %v796_v19, %v5115_v13  ;;  %v2470_v19 = vshrl.u32 %v4626_v57, 16 }
 0x1f9   : > { %v1395_v36 = vadd.f32 %v1354_v20, %v1034_v32  ;;  %v1726_v2 = vpop.f32.mrf.mxu0  ;;  %v4622_v62 = vpop.f32.mrf.mxu3  ;;  %v1791_v32 = vrot.slane %v3815_v40, 2  ;;  %v2758_v40 = vsel %vm2739_vm7, %v2755_v41, %v2757_v27  ;;  %v4652_v41 = vld [vmem:[%s3909_s27 + $0x70] sm:$0xff] }
 0x1fa   : > { %3578 = vmatmul.msk.bf16.gmra.mxu1 %vm505_vm2, %v1790_v47  ;;  %v2152_v47 = vrot.slane %v4580_v24, 2 }
 0x1fb   : > { %3665 = vmatmul.msk.bf16.gmra.mxu2 %vm505_vm2, %v2151_v56  ;;  %v4618_v1 = vadd.f32 %v1723_v33, %v1395_v36  ;;  %v2473_v56 = vshll.u32 %v4626_v57, 16 }
 0x1fc   : > { %3703 = vmatmul.msk.bf16.gmra.mxu0 %vm505_vm2, %v2756_v51 }
 0x1fd   : > { %3686 = vmatmul.msk.bf16.gmra.mxu3 %vm505_vm2, %v2468_v48 }
 0x1fe   : > { %v996_v39 = vpop.f32.mrf.mxu2 }
 0x1ff   : > { %v1035_v16 = vadd.f32 %v996_v39, %v797_v4  ;;  %v798_v20 = vpop.f32.mrf.mxu1  ;;  %v2153_v4 = vsel %vm1773_vm6, %v2150_v5, %v2152_v47  ;;  %v2472_v39 = vrot.slane %v2470_v19, 2 }
 0x200   : > { %v799_v7 = vadd.f32 %v798_v20, %v5117_v54 }
 0x201   : > { %v1396_v22 = vadd.f32 %v1357_v45, %v1035_v16  ;;  %v1728_v42 = vpop.f32.mrf.mxu0  ;;  %v4637_v51 = vpop.f32.mrf.mxu3  ;;  %v2475_v16 = vrot.slane %v2473_v56, 3 }
 0x203   : > { %v4629_v33 = vadd.f32 %v1726_v2, %v1396_v22  ;;  %v1792_v2 = vsel %vm1773_vm6, %v1789_v49, %v1791_v32  ;;  %v2476_v20 = vor.u32 %v2475_v16, %v2472_v39 }
 0x205   : > { %5116 = vst [vmem:[#allocation8_spill] sm:$0xff] %v4629_v33  ;;  %v2477_v54 = vsel %vm2370_vm5, %v2467_v61, %v2476_v20  ;;  %v2479_v61 = vshrl.u32 %v4652_v41, 16 }
 0x206   : > { %v998_v36 = vpop.f32.mrf.mxu2 }
 0x207   : > { %v1036_v45 = vadd.f32 %v998_v36, %v799_v7  ;;  %v1877_v13 = vpop.f32.mrf.mxu1 }
 0x208   : > { %v1967_v49 = vadd.f32 %v1877_v13, %v4246_v34  ;;  %v4661_v34 = vld [vmem:[%s3909_s27 + $0x58] sm:$0xff] }
 0x209   : > { %v1397_v48 = vadd.f32 %v1359_v58, %v1036_v45  ;;  %v2843_v22 = vpop.f32.mrf.mxu0  ;;  %v4648_v19 = vpop.f32.mrf.mxu3  ;;  %v1793_v13 = vrot.slane %v4661_v34, 2 }
 0x20a   : > { %3579 = vmatmul.msk.bf16.gmra.mxu1 %vm505_vm2, %v1792_v2  ;;  %v2154_v2 = vrot.slane %v4602_v28, 2 }
 0x20b   : > { %3666 = vmatmul.msk.bf16.gmra.mxu2 %vm505_vm2, %v2153_v4  ;;  %v4644_v24 = vadd.f32 %v1728_v42, %v1397_v48  ;;  %v4657_v42 = vld [vmem:[%s5093_s2] ss:$0 sm:$0xff]  ;;  %v2482_v4 = vshll.u32 %v4652_v41, 16 }
 0x20c   : > { %3704 = vmatmul.msk.bf16.gmra.mxu0 %vm505_vm2, %v2758_v40 }
 0x20d   : > { %5118 = vst [vmem:[#allocation9_spill] sm:$0xff] %v4644_v24  ;;  %3687 = vmatmul.msk.bf16.gmra.mxu3 %vm505_vm2, %v2477_v54  ;;  %v2155_v54 = vsel %vm1773_vm6, %v2152_v47, %v2154_v2  ;;  %v5119_v24 = vrot.slane %v4602_v28, 3 }
 0x20e   : > { %v2238_v5 = vpop.f32.mrf.mxu2 }
 0x20f   : > { %v2328_v56 = vadd.f32 %v2238_v5, %v1967_v49  ;;  %v1879_v58 = vpop.f32.mrf.mxu1  ;;  %v2760_v33 = vsel %vm2739_vm7, %v2757_v27, %v5119_v24 }
 0x210   : > { %v1968_v39 = vadd.f32 %v1879_v58, %v4256_v26  ;;  %v2484_v26 = vrot.slane %v2482_v4, 3 }
 0x211   : > { %v2697_v7 = vadd.f32 %v2607_v6, %v2328_v56  ;;  %v2845_v36 = vpop.f32.mrf.mxu0  ;;  %v1794_v56 = vsel %vm1773_vm6, %v1791_v32, %v1793_v13 }
 0x213   : > { %v2933_v45 = vadd.f32 %v2843_v22, %v2697_v7  ;;  %v4670_v22 = vpop.f32.mrf.mxu3  ;;  %v2481_v7 = vrot.slane %v2479_v61, 2 }
 0x215   : > { %v2973_v6 = vadd.f32 %v4657_v42, %v2933_v45  ;;  %v2485_v47 = vor.u32 %v2484_v26, %v2481_v7 }
 0x216   : > { %v2240_v48 = vpop.f32.mrf.mxu2 }
 0x217   : > { %vm3009_vm8 = vcmp.ge.f32.partialorder %v2973_v6, 0.0  ;;  %v3045_v40 = vmul.f32 0.2, %v2973_v6  ;;  %v2329_v49 = vadd.f32 %v2240_v48, %v1968_v39  ;;  %v1882_v5 = vpop.f32.mrf.mxu1 }
 0x218   : > { %v1969_v24 = vadd.f32 %v1882_v5, %v4262_v18  ;;  %v4703_v5 = vld [vmem:[%s3909_s27 + $0x60] sm:$0xff] }
 0x219   : > { %v3081_v58 = vsel %vm3009_vm8, %v2973_v6, %v3045_v40  ;;  %v2698_v45 = vadd.f32 %v4622_v62, %v2329_v49  ;;  %v2848_v16 = vpop.f32.mrf.mxu0  ;;  %v2486_v40 = vsel %vm2370_vm5, %v2476_v20, %v2485_v47  ;;  %v4699_v49 = vld [vmem:[%s3909_s27 + $0x78] sm:$0xff]  ;;  %v1795_v26 = vrot.slane %v4703_v5, 2 }
 0x21a   : > { %v3117_v39 = vmul.f32 1.4142135, %v3081_v58  ;;  %3580 = vmatmul.msk.bf16.gmra.mxu1 %vm505_vm2, %v1794_v56  ;;  %v2488_v20 = vshrl.u32 %v4699_v49, 16 }
 0x21b   : > { %v2934_v32 = vadd.f32 %v2845_v36, %v2698_v45  ;;  %3667 = vmatmul.msk.bf16.gmra.mxu2 %vm505_vm2, %v2155_v54  ;;  %v4695_v4 = vpop.f32.mrf.mxu3  ;;  %v2156_v45 = vrot.slane %v4626_v57, 2 }
 0x21c   : > { %v3153_v62 = vpack.c.bf16 %v3117_v39, %v3117_v39  ;;  %3705 = vmatmul.msk.bf16.gmra.mxu0 %vm505_vm2, %v2760_v33  ;;  %v2491_v39 = vshll.u32 %v4699_v49, 16 }
 0x21d   : > { %v2974_v27 = vadd.f32 %v4657_v42, %v2934_v32  ;;  %3688 = vmatmul.msk.bf16.gmra.mxu3 %vm505_vm2, %v2486_v40 }
 0x21e   : > { %3190 = vst.msk [vmem:[%s4686_s19] sm:$0xf] %vm3189_vm9, %v3153_v62  ;;  %v2243_v61 = vpop.f32.mrf.mxu2  ;;  %v2761_v62 = vrot.slane %v4626_v57, 3  ;;  %v2493_v40 = vrot.slane %v2491_v39, 3 }
 0x21f   : > { %vm3010_vm10 = vcmp.ge.f32.partialorder %v2974_v27, 0.0  ;;  %v3046_v36 = vmul.f32 0.2, %v2974_v27  ;;  %v2330_v6 = vadd.f32 %v2243_v61, %v1969_v24  ;;  %v1884_v48 = vpop.f32.mrf.mxu1 }
 0x221   : > { %v3082_v33 = vsel %vm3010_vm10, %v2974_v27, %v3046_v36  ;;  %v2699_v56 = vadd.f32 %v4637_v51, %v2330_v6  ;;  %v2850_v54 = vpop.f32.mrf.mxu0  ;;  %v1970_v51 = vadd.f32 %v1884_v48, %v4272_v30  ;;  %v1796_v6 = vsel %vm1773_vm6, %v1793_v13, %v1795_v26 }
 0x222   : > { %v3118_v7 = vmul.f32 1.4142135, %v3082_v33  ;;  %v2157_v30 = vsel %vm1773_vm6, %v2154_v2, %v2156_v45  ;;  %v2490_v48 = vrot.slane %v2488_v20, 2 }
 0x223   : > { %v2935_v18 = vadd.f32 %v2848_v16, %v2699_v56  ;;  %v4715_v27 = vpop.f32.mrf.mxu3 }
 0x224   : > { %v3154_v58 = vpack.c.bf16 %v3118_v7, %v3118_v7  ;;  %v2494_v20 = vor.u32 %v2493_v40, %v2490_v48 }
 0x225   : > { %v2975_v32 = vadd.f32 %v4657_v42, %v2935_v18  ;;  %v5120_v18 = vrot.slane %v4602_v28, 3 }
 0x226   : > { %3191 = vst.msk [vmem:[%s4686_s19 + $0x4] sm:$0xf] %vm3189_vm9, %v3154_v58  ;;  %v2245_v16 = vpop.f32.mrf.mxu2 }
 0x227   : > { %vm3011_vm11 = vcmp.ge.f32.partialorder %v2975_v32, 0.0  ;;  %v3047_v24 = vmul.f32 0.2, %v2975_v32  ;;  %v2331_v61 = vadd.f32 %v2245_v16, %v1970_v51  ;;  %v1887_v36 = vpop.f32.mrf.mxu1  ;;  %v2762_v34 = vsel %vm2739_vm7, %v5120_v18, %v2761_v62 }
 0x228   : > { %v1971_v39 = vadd.f32 %v1887_v36, %v4278_v60  ;;  %v4748_v36 = vld [vmem:[%s3909_s27 + $0x68] sm:$0xff]  ;;  %v2158_v18 = vrot.slane %v4652_v41, 2 }
 0x229   : > { %v3083_v33 = vsel %vm3011_vm11, %v2975_v32, %v3047_v24  ;;  %v2700_v56 = vadd.f32 %v4648_v19, %v2331_v61  ;;  %v2853_v7 = vpop.f32.mrf.mxu0  ;;  %v2495_v24 = vsel %vm2370_vm5, %v2485_v47, %v2494_v20  ;;  %v4744_v61 = vld [vmem:[%s3909_s27 + $0x80] sm:$0xff] }
 0x22a   : > { %v3119_v13 = vmul.f32 1.4142135, %v3083_v33  ;;  %3581 = vmatmul.msk.bf16.gmra.mxu1 %vm505_vm2, %v1796_v6  ;;  %v1797_v33 = vrot.slane %v4748_v36, 2  ;;  %v2497_v47 = vshrl.u32 %v4744_v61, 16 }
 0x22b   : > { %v2936_v58 = vadd.f32 %v2850_v54, %v2700_v56  ;;  %3668 = vmatmul.msk.bf16.gmra.mxu2 %vm505_vm2, %v2157_v30  ;;  %v4740_v32 = vpop.f32.mrf.mxu3 }
 0x22c   : > { %v3155_v2 = vpack.c.bf16 %v3119_v13, %v3119_v13  ;;  %3706 = vmatmul.msk.bf16.gmra.mxu0 %vm505_vm2, %v2762_v34  ;;  %v2500_v34 = vshll.u32 %v4744_v61, 16 }
 0x22d   : > { %v2976_v19 = vadd.f32 %v4657_v42, %v2936_v58  ;;  %3689 = vmatmul.msk.bf16.gmra.mxu3 %vm505_vm2, %v2495_v24  ;;  %v2763_v58 = vrot.slane %v4652_v41, 3 }
 0x22e   : > { %3192 = vst.msk [vmem:[%s4686_s19 + $0x8] sm:$0xf] %vm3189_vm9, %v3155_v2  ;;  %v2248_v28 = vpop.f32.mrf.mxu2 }
 0x22f   : > { %vm3012_vm12 = vcmp.ge.f32.partialorder %v2976_v19, 0.0  ;;  %v3048_v54 = vmul.f32 0.2, %v2976_v19  ;;  %v2332_v51 = vadd.f32 %v2248_v28, %v1971_v39  ;;  %v1889_v16 = vpop.f32.mrf.mxu1  ;;  %v2764_v5 = vsel %vm2739_vm7, %v2761_v62, %v2763_v58 }
 0x231   : > { %v3084_v6 = vsel %vm3012_vm12, %v2976_v19, %v3048_v54  ;;  %v2701_v30 = vadd.f32 %v4670_v22, %v2332_v51  ;;  %v2855_v48 = vpop.f32.mrf.mxu0  ;;  %v1972_v22 = vadd.f32 %v1889_v16, %v4288_v37  ;;  %v1798_v54 = vsel %vm1773_vm6, %v1795_v26, %v1797_v33 }
 0x232   : > { %v3120_v40 = vmul.f32 1.4142135, %v3084_v6  ;;  %v2159_v37 = vsel %vm1773_vm6, %v2156_v45, %v2158_v18  ;;  %v2499_v51 = vrot.slane %v2497_v47, 2  ;;  %v2502_v16 = vrot.slane %v2500_v34, 3 }
 0x233   : > { %v2937_v60 = vadd.f32 %v2853_v7, %v2701_v30  ;;  %v4760_v2 = vpop.f32.mrf.mxu3 }
 0x234   : > { %v3156_v56 = vpack.c.bf16 %v3120_v40, %v3120_v40 }
 0x235   : > { %v2977_v13 = vadd.f32 %v4657_v42, %v2937_v60  ;;  %v2503_v60 = vor.u32 %v2502_v16, %v2499_v51  ;;  %v2160_v16 = vrot.slane %v4699_v49, 2 }
 0x236   : > { %3193 = vst.msk [vmem:[%s4686_s19 + $0xc] sm:$0xf] %vm3189_vm9, %v3156_v56  ;;  %v2250_v7 = vpop.f32.mrf.mxu2 }
 0x237   : > { %vm3013_vm13 = vcmp.ge.f32.partialorder %v2977_v13, 0.0  ;;  %v3049_v19 = vmul.f32 0.2, %v2977_v13  ;;  %v2333_v39 = vadd.f32 %v2250_v7, %v1972_v22  ;;  %v1892_v28 = vpop.f32.mrf.mxu1  ;;  %v4789_v22 = vld [vmem:[%s3909_s27 + $0x88] sm:$0xff] }
 0x238   : > { %v1973_v56 = vadd.f32 %v1892_v28, %v4294_v10  ;;  %v4793_v28 = vld [vmem:[%s3909_s27 + $0x70] sm:$0xff] }
 0x239   : > { %v3085_v24 = vsel %vm3013_vm13, %v2977_v13, %v3049_v19  ;;  %v2702_v6 = vadd.f32 %v4695_v4, %v2333_v39  ;;  %v2858_v30 = vpop.f32.mrf.mxu0  ;;  %v2504_v13 = vsel %vm2370_vm5, %v2494_v20, %v2503_v60  ;;  %v2506_v20 = vshrl.u32 %v4789_v22, 16 }
 0x23a   : > { %v3121_v26 = vmul.f32 1.4142135, %v3085_v24  ;;  %3582 = vmatmul.msk.bf16.gmra.mxu1 %vm505_vm2, %v1798_v54  ;;  %v2509_v24 = vshll.u32 %v4789_v22, 16 }
 0x23b   : > { %v2938_v40 = vadd.f32 %v2855_v48, %v2702_v6  ;;  %3669 = vmatmul.msk.bf16.gmra.mxu2 %vm505_vm2, %v2159_v37  ;;  %v4785_v62 = vpop.f32.mrf.mxu3  ;;  %v1799_v37 = vrot.slane %v4793_v28, 2 }
 0x23c   : > { %v3157_v45 = vpack.c.bf16 %v3121_v26, %v3121_v26  ;;  %3707 = vmatmul.msk.bf16.gmra.mxu0 %vm505_vm2, %v2764_v5  ;;  %v2765_v5 = vrot.slane %v4699_v49, 3 }
 0x23d   : > { %v2978_v4 = vadd.f32 %v4657_v42, %v2938_v40  ;;  %3690 = vmatmul.msk.bf16.gmra.mxu3 %vm505_vm2, %v2504_v13 }
 0x23e   : > { %3194 = vst.msk [vmem:[%s4686_s19 + $0x10] sm:$0xf] %vm3189_vm9, %v3157_v45  ;;  %v2253_v57 = vpop.f32.mrf.mxu2  ;;  %v2766_v36 = vsel %vm2739_vm7, %v2763_v58, %v2765_v5 }
 0x23f   : > { %vm3014_vm14 = vcmp.ge.f32.partialorder %v2978_v4, 0.0  ;;  %v3050_v48 = vmul.f32 0.2, %v2978_v4  ;;  %v2334_v47 = vadd.f32 %v2253_v57, %v1973_v56  ;;  %v1894_v34 = vpop.f32.mrf.mxu1  ;;  %v1800_v56 = vsel %vm1773_vm6, %v1797_v33, %v1799_v37 }
 0x240   : > { %v2508_v57 = vrot.slane %v2506_v20, 2 }
 0x241   : > { %v3086_v7 = vsel %vm3014_vm14, %v2978_v4, %v3050_v48  ;;  %v2703_v19 = vadd.f32 %v4715_v27, %v2334_v47  ;;  %v2860_v39 = vpop.f32.mrf.mxu0  ;;  %v1974_v27 = vadd.f32 %v1894_v34, %v4304_v0  ;;  %v2161_v0 = vsel %vm1773_vm6, %v2158_v18, %v2160_v16 }
 0x242   : > { %v3122_v54 = vmul.f32 1.4142135, %v3086_v7  ;;  %v2511_v48 = vrot.slane %v2509_v24, 3  ;;  %v4834_v24 = vld [vmem:[%s3909_s27 + $0x90] sm:$0xff] }
 0x243   : > { %v2939_v10 = vadd.f32 %v2858_v30, %v2703_v19  ;;  %v4805_v26 = vpop.f32.mrf.mxu3 }
 0x244   : > { %v3158_v51 = vpack.c.bf16 %v3122_v54, %v3122_v54  ;;  %v2512_v19 = vor.u32 %v2511_v48, %v2508_v57  ;;  %v2518_v57 = vshll.u32 %v4834_v24, 16 }
 0x245   : > { %v2979_v6 = vadd.f32 %v4657_v42, %v2939_v10 }
 0x246   : > { %3195 = vst.msk [vmem:[%s4686_s19 + $0x14] sm:$0xf] %vm3189_vm9, %v3158_v51  ;;  %v2255_v30 = vpop.f32.mrf.mxu2  ;;  %v2513_v20 = vsel %vm2370_vm5, %v2503_v60, %v2512_v19  ;;  %v2515_v60 = vshrl.u32 %v4834_v24, 16 }
 0x247   : > { %vm3015_vm15 = vcmp.ge.f32.partialorder %v2979_v6, 0.0  ;;  %v3051_v40 = vmul.f32 0.2, %v2979_v6  ;;  %v2335_v45 = vadd.f32 %v2255_v30, %v1974_v27  ;;  %v1897_v4 = vpop.f32.mrf.mxu1 }
 0x248   : > { %v1975_v54 = vadd.f32 %v1897_v4, %v4310_v11 }
 0x249   : > { %v3087_v47 = vsel %vm3015_vm15, %v2979_v6, %v3051_v40  ;;  %v2704_v34 = vadd.f32 %v4740_v32, %v2335_v45  ;;  %v2863_v13 = vpop.f32.mrf.mxu0  ;;  %v4838_v45 = vld [vmem:[%s3909_s27 + $0x78] sm:$0xff] }
 0x24a   : > { %v3123_v33 = vmul.f32 1.4142135, %v3087_v47  ;;  %3583 = vmatmul.msk.bf16.gmra.mxu1 %vm505_vm2, %v1800_v56  ;;  %v1801_v4 = vrot.slane %v4838_v45, 2  ;;  %v2767_v47 = vrot.slane %v4744_v61, 3 }
 0x24b   : > { %v2940_v7 = vadd.f32 %v2860_v39, %v2704_v34  ;;  %3670 = vmatmul.msk.bf16.gmra.mxu2 %vm505_vm2, %v2161_v0  ;;  %v4830_v58 = vpop.f32.mrf.mxu3  ;;  %v2162_v0 = vrot.slane %v4744_v61, 2 }
 0x24c   : > { %v3159_v18 = vpack.c.bf16 %v3123_v33, %v3123_v33  ;;  %3708 = vmatmul.msk.bf16.gmra.mxu0 %vm505_vm2, %v2766_v36  ;;  %v2768_v28 = vsel %vm2739_vm7, %v2765_v5, %v2767_v47 }
 0x24d   : > { %v2980_v32 = vadd.f32 %v4657_v42, %v2940_v7  ;;  %3691 = vmatmul.msk.bf16.gmra.mxu3 %vm505_vm2, %v2513_v20 }
 0x24e   : > { %3196 = vst.msk [vmem:[%s4686_s19 + $0x18] sm:$0xf] %vm3189_vm9, %v3159_v18  ;;  %v2258_v41 = vpop.f32.mrf.mxu2  ;;  %v1802_v18 = vsel %vm1773_vm6, %v1799_v37, %v1801_v4 }
 0x24f   : > { %vm3016_vm0 = vcmp.ge.f32.partialorder %v2980_v32, 0.0  ;;  %v3052_v39 = vmul.f32 0.2, %v2980_v32  ;;  %v2336_v10 = vadd.f32 %v2258_v41, %v1975_v54  ;;  %v1899_v51 = vpop.f32.mrf.mxu1  ;;  %v2520_v54 = vrot.slane %v2518_v57, 3 }
 0x251   : > { %v3088_v6 = vsel %vm3016_vm0, %v2980_v32, %v3052_v39  ;;  %v2705_v27 = vadd.f32 %v4760_v2, %v2336_v10  ;;  %v2865_v30 = vpop.f32.mrf.mxu0  ;;  %v1976_v2 = vadd.f32 %v1899_v51, %v4320_v17  ;;  %v2163_v17 = vsel %vm1773_vm6, %v2160_v16, %v2162_v0 }
 0x252   : > { %v3124_v40 = vmul.f32 1.4142135, %v3088_v6  ;;  %v2517_v32 = vrot.slane %v2515_v60, 2 }
 0x253   : > { %v2941_v11 = vadd.f32 %v2863_v13, %v2705_v27  ;;  %v4850_v13 = vpop.f32.mrf.mxu3 }
 0x254   : > { %v3160_v56 = vpack.c.bf16 %v3124_v40, %v3124_v40  ;;  %v2521_v20 = vor.u32 %v2520_v54, %v2517_v32  ;;  %v2769_v32 = vrot.slane %v4789_v22, 3 }
 0x255   : > { %v2981_v48 = vadd.f32 %v4657_v42, %v2941_v11 }
 0x256   : > { %3197 = vst.msk [vmem:[%s4686_s19 + $0x1c] sm:$0xf] %vm3189_vm9, %v3160_v56  ;;  %v2260_v34 = vpop.f32.mrf.mxu2  ;;  %v2522_v11 = vsel %vm2370_vm5, %v2512_v19, %v2521_v20  ;;  %v4879_v56 = vld [vmem:[%s3909_s27 + $0x98] sm:$0xff]  ;;  %v2770_v45 = vsel %vm2739_vm7, %v2767_v47, %v2769_v32 }
 0x257   : > { %vm3017_vm1 = vcmp.ge.f32.partialorder %v2981_v48, 0.0  ;;  %v3053_v36 = vmul.f32 0.2, %v2981_v48  ;;  %v2337_v33 = vadd.f32 %v2260_v34, %v1976_v2  ;;  %v1902_v7 = vpop.f32.mrf.mxu1  ;;  %v4883_v34 = vld [vmem:[%s3909_s27 + $0x80] sm:$0xff]  ;;  %v2524_v19 = vshrl.u32 %v4879_v56, 16 }
 0x258   : > { %v1977_v6 = vadd.f32 %v1902_v7, %v4326_v38  ;;  %v2164_v7 = vrot.slane %v4789_v22, 2 }
 0x259   : > { %v3089_v41 = vsel %vm3017_vm1, %v2981_v48, %v3053_v36  ;;  %v2706_v39 = vadd.f32 %v4785_v62, %v2337_v33  ;;  %v2868_v10 = vpop.f32.mrf.mxu0  ;;  %v1803_v36 = vrot.slane %v4883_v34, 2 }
 0x25a   : > { %v3125_v37 = vmul.f32 1.4142135, %v3089_v41  ;;  %3584 = vmatmul.msk.bf16.gmra.mxu1 %vm505_vm2, %v1802_v18  ;;  %v2527_v18 = vshll.u32 %v4879_v56, 16 }
 0x25b   : > { %v2942_v51 = vadd.f32 %v2865_v30, %v2706_v39  ;;  %3671 = vmatmul.msk.bf16.gmra.mxu2 %vm505_vm2, %v2163_v17  ;;  %v4875_v5 = vpop.f32.mrf.mxu3 }
 0x25c   : > { %v3161_v16 = vpack.c.bf16 %v3125_v37, %v3125_v37  ;;  %3709 = vmatmul.msk.bf16.gmra.mxu0 %vm505_vm2, %v2768_v28  ;;  %v1804_v37 = vsel %vm1773_vm6, %v1801_v4, %v1803_v36  ;;  %v2364_v4 = vld [vmem:[%s3909_s27 + $0xa0] sm:$0x7] }
 0x25d   : > { %v2982_v62 = vadd.f32 %v4657_v42, %v2942_v51  ;;  %3692 = vmatmul.msk.bf16.gmra.mxu3 %vm505_vm2, %v2522_v11  ;;  %v2526_v51 = vrot.slane %v2524_v19, 2  ;;  %v2368_v11 = vunpack.c.l.b16 %v2364_v4 }
 0x25e   : > { %3198 = vst.msk [vmem:[%s4686_s19 + $0x20] sm:$0xf] %vm3189_vm9, %v3161_v16  ;;  %v2263_v49 = vpop.f32.mrf.mxu2  ;;  %v2529_v16 = vrot.slane %v2527_v18, 3 }
 0x25f   : > { %vm3018_vm3 = vcmp.ge.f32.partialorder %v2982_v62, 0.0  ;;  %v3054_v27 = vmul.f32 0.2, %v2982_v62  ;;  %v2338_v30 = vadd.f32 %v2263_v49, %v1977_v6  ;;  %v1904_v40 = vpop.f32.mrf.mxu1 }
 0x261   : > { %v3090_v60 = vsel %vm3018_vm3, %v2982_v62, %v3054_v27  ;;  %v2707_v57 = vadd.f32 %v4805_v26, %v2338_v30  ;;  %v2870_v48 = vpop.f32.mrf.mxu0  ;;  %v1978_v26 = vadd.f32 %v1904_v40, %v4336_v31  ;;  %v2165_v31 = vsel %vm1773_vm6, %v2162_v0, %v2164_v7 }
 0x262   : > { %v3126_v2 = vmul.f32 1.4142135, %v3090_v60  ;;  %v2530_v40 = vor.u32 %v2529_v16, %v2526_v51  ;;  %v5121_v51 = vld [vmem:[#allocation10_spill] sm:$0xff]  ;;  %v2771_v16 = vrot.slane %v4834_v24, 3 }
 0x263   : > { %v2943_v38 = vadd.f32 %v2868_v10, %v2707_v57  ;;  %v4895_v41 = vpop.f32.mrf.mxu3 }
 0x264   : > { %v3162_v33 = vpack.c.bf16 %v3126_v2, %v3126_v2 }
 0x265   : > { %v2983_v17 = vadd.f32 %v4657_v42, %v2943_v38  ;;  %v2531_v38 = vsel %vm2370_vm5, %v2521_v20, %v2530_v40 }
 0x266   : > { %3199 = vst.msk [vmem:[%s4686_s19 + $0x24] sm:$0xf] %vm3189_vm9, %v3162_v33  ;;  %v2265_v54 = vpop.f32.mrf.mxu2  ;;  %v4924_v33 = vpack.c.b16 %v2368_v11, %v2368_v11 }
 0x267   : > { %vm3019_vm4 = vcmp.ge.f32.partialorder %v2983_v17, 0.0  ;;  %v3055_v39 = vmul.f32 0.2, %v2983_v17  ;;  %v2339_v10 = vadd.f32 %v2265_v54, %v1978_v26  ;;  %v1907_v28 = vpop.f32.mrf.mxu1  ;;  %v4928_v54 = vld [vmem:[%s3909_s27 + $0x88] sm:$0xff] }
 0x268   : > { %v1979_v60 = vadd.f32 %v1907_v28, %v4345_v35  ;;  %v2166_v28 = vrot.slane %v4834_v24, 2  ;;  %v2533_v20 = vshrl.u32 %v4924_v33, 16 }
 0x269   : > { %v3091_v62 = vsel %vm3019_vm4, %v2983_v17, %v3055_v39  ;;  %v2708_v6 = vadd.f32 %v4830_v58, %v2339_v10  ;;  %v2873_v49 = vpop.f32.mrf.mxu0  ;;  %v1805_v39 = vrot.slane %v4928_v54, 2 }
 0x26a   : > { %v3127_v27 = vmul.f32 1.4142135, %v3091_v62  ;;  %3585 = vmatmul.msk.bf16.gmra.mxu1 %vm505_vm2, %v1804_v37  ;;  %v2536_v37 = vshll.u32 %v4924_v33, 16 }
 0x26b   : > { %v2944_v30 = vadd.f32 %v2870_v48, %v2708_v6  ;;  %3672 = vmatmul.msk.bf16.gmra.mxu2 %vm505_vm2, %v2165_v31  ;;  %v4921_v47 = vpop.f32.mrf.mxu3 }
 0x26c   : > { %v3163_v0 = vpack.c.bf16 %v3127_v27, %v3127_v27  ;;  %3710 = vmatmul.msk.bf16.gmra.mxu0 %vm505_vm2, %v2770_v45  ;;  %v1806_v27 = vsel %vm1773_vm6, %v1803_v36, %v1805_v39  ;;  %v2538_v24 = vrot.slane %v2536_v37, 3 }
 0x26d   : > { %v2984_v58 = vadd.f32 %v4657_v42, %v2944_v30  ;;  %3693 = vmatmul.msk.bf16.gmra.mxu3 %vm505_vm2, %v2531_v38  ;;  %v2167_v30 = vsel %vm1773_vm6, %v2164_v7, %v2166_v28 }
 0x26e   : > { %3200 = vst.msk [vmem:[%s4686_s19 + $0x28] sm:$0xf] %vm3189_vm9, %v3163_v0  ;;  %v2268_v61 = vpop.f32.mrf.mxu2  ;;  %v2535_v0 = vrot.slane %v2533_v20, 2 }
 0x26f   : > { %vm3020_vm8 = vcmp.ge.f32.partialorder %v2984_v58, 0.0  ;;  %v3056_v57 = vmul.f32 0.2, %v2984_v58  ;;  %v2340_v48 = vadd.f32 %v2268_v61, %v1979_v60  ;;  %v1909_v2 = vpop.f32.mrf.mxu1  ;;  %v2772_v61 = vsel %vm2739_vm7, %v2769_v32, %v2771_v16 }
 0x270   : > { %v2539_v36 = vor.u32 %v2538_v24, %v2535_v0 }
 0x271   : > { %v3092_v19 = vsel %vm3020_vm8, %v2984_v58, %v3056_v57  ;;  %v2709_v18 = vadd.f32 %v4850_v13, %v2340_v48  ;;  %v2875_v17 = vpop.f32.mrf.mxu0  ;;  %v1980_v13 = vadd.f32 %v1909_v2, %v5121_v51  ;;  %v5122_v2 = vld [vmem:[#allocation11_spill] sm:$0xff] }
 0x272   : > { %v3128_v26 = vmul.f32 1.4142135, %v3092_v19 }
 0x273   : > { %v2945_v35 = vadd.f32 %v2873_v49, %v2709_v18  ;;  %v4940_v6 = vpop.f32.mrf.mxu3 }
 0x274   : > { %v3164_v10 = vpack.c.bf16 %v3128_v26, %v3128_v26 }
 0x275   : > { %v2985_v31 = vadd.f32 %v4657_v42, %v2945_v35 }
 0x276   : > { %3201 = vst.msk [vmem:[%s4686_s19 + $0x2c] sm:$0xf] %vm3189_vm9, %v3164_v10  ;;  %v2270_v62 = vpop.f32.mrf.mxu2 }
 0x277   : > { %vm3021_vm10 = vcmp.ge.f32.partialorder %v2985_v31, 0.0  ;;  %v3057_v49 = vmul.f32 0.2, %v2985_v31  ;;  %v2341_v45 = vadd.f32 %v2270_v62, %v1980_v13  ;;  %v1912_v4 = vpop.f32.mrf.mxu1  ;;  %v2168_v13 = vrot.slane %v4879_v56, 2 }
 0x278   : > { %v1981_v38 = vadd.f32 %v1912_v4, %v5122_v2 }
 0x279   : > { %v3093_v11 = vsel %vm3021_vm10, %v2985_v31, %v3057_v49  ;;  %v2710_v58 = vadd.f32 %v4875_v5, %v2341_v45  ;;  %v2878_v60 = vpop.f32.mrf.mxu0  ;;  %v3823_v31 = vld [vmem:[%s3909_s27 + $0x90] sm:$0xff]  ;;  %v2169_v24 = vsel %vm1773_vm6, %v2166_v28, %v2168_v13 }
 0x27a   : > { %v3129_v57 = vmul.f32 1.4142135, %v3093_v11  ;;  %3586 = vmatmul.msk.bf16.gmra.mxu1 %vm505_vm2, %v1806_v27  ;;  %v1807_v51 = vrot.slane %v3823_v31, 2 }
 0x27b   : > { %v2946_v48 = vadd.f32 %v2875_v17, %v2710_v58  ;;  %3673 = vmatmul.msk.bf16.gmra.mxu2 %vm505_vm2, %v2167_v30  ;;  %v4959_v5 = vpop.f32.mrf.mxu3  ;;  %v2540_v17 = vsel %vm2370_vm5, %v2530_v40, %v2539_v36  ;;  %v2773_v40 = vrot.slane %v4879_v56, 3 }
 0x27c   : > { %v3165_v34 = vpack.c.bf16 %v3129_v57, %v3129_v57  ;;  %3711 = vmatmul.msk.bf16.gmra.mxu0 %vm505_vm2, %v2772_v61  ;;  %v1808_v0 = vsel %vm1773_vm6, %v1805_v39, %v1807_v51 }
 0x27d   : > { %v2986_v7 = vadd.f32 %v4657_v42, %v2946_v48  ;;  %3694 = vmatmul.msk.bf16.gmra.mxu3 %vm505_vm2, %v2540_v17  ;;  %v2774_v56 = vsel %vm2739_vm7, %v2771_v16, %v2773_v40 }
 0x27e   : > { %3202 = vst.msk [vmem:[%s4686_s19 + $0x30] sm:$0xf] %vm3189_vm9, %v3165_v34  ;;  %v2273_v22 = vpop.f32.mrf.mxu2 }
 0x27f   : > { %vm3022_vm11 = vcmp.ge.f32.partialorder %v2986_v7, 0.0  ;;  %v3058_v32 = vmul.f32 0.2, %v2986_v7  ;;  %v2342_v19 = vadd.f32 %v2273_v22, %v1981_v38  ;;  %v1914_v18 = vpop.f32.mrf.mxu1 }
 0x280   : > { %v1982_v49 = vadd.f32 %v1914_v18, %v4401_v44 }
 0x281   : > { %v3094_v26 = vsel %vm3022_vm11, %v2986_v7, %v3058_v32  ;;  %v2711_v35 = vadd.f32 %v4895_v41, %v2342_v19  ;;  %v2880_v54 = vpop.f32.mrf.mxu0 }
 0x282   : > { %v3130_v10 = vmul.f32 1.4142135, %v3094_v26 }
 0x283   : > { %v2947_v20 = vadd.f32 %v2878_v60, %v2711_v35  ;;  %v4971_v45 = vpop.f32.mrf.mxu3  ;;  %v2039_v60 = vld [vmem:[%s3909_s27 + $0xa0] sm:$0x3]  ;;  %v1809_v35 = vrot.slane %v4396_v12, 2 }
 0x284   : > { %v3166_v37 = vpack.c.bf16 %v3130_v10, %v3130_v10  ;;  %v2115_v39 = vunpack.c.l.b16 %v2039_v60 }
 0x285   : > { %v2987_v62 = vadd.f32 %v4657_v42, %v2947_v20  ;;  %v2775_v20 = vrot.slane %v4924_v33, 3 }
 0x286   : > { %3203 = vst.msk [vmem:[%s4686_s19 + $0x34] sm:$0xf] %vm3189_vm9, %v3166_v37  ;;  %v2275_v41 = vpop.f32.mrf.mxu2  ;;  %v2134_v38 = vpack.c.b16 %v2115_v39, %v2115_v39 }
 0x287   : > { %vm3023_vm5 = vcmp.ge.f32.partialorder %v2987_v62, 0.0  ;;  %v3059_v4 = vmul.f32 0.2, %v2987_v62  ;;  %v2343_v27 = vadd.f32 %v2275_v41, %v1982_v49  ;;  %v1917_v30 = vpop.f32.mrf.mxu1  ;;  %v1810_v41 = vsel %vm1773_vm6, %v1807_v51, %v1809_v35 }
 0x288   : > { %v1983_v28 = vadd.f32 %v1917_v30, %v4415_v9  ;;  %v2170_v9 = vrot.slane %v2134_v38, 2 }
 0x289   : > { %v3095_v11 = vsel %vm3023_vm5, %v2987_v62, %v3059_v4  ;;  %v2712_v58 = vadd.f32 %v4921_v47, %v2343_v27  ;;  %v2883_v44 = vpop.f32.mrf.mxu0 }
 0x28a   : > { %v3131_v61 = vmul.f32 1.4142135, %v3095_v11  ;;  %3587 = vmatmul.msk.bf16.gmra.mxu1 %vm505_vm2, %v1808_v0  ;;  %v2171_v12 = vsel %vm1773_vm6, %v2168_v13, %v2170_v9 }
 0x28b   : > { %v2948_v57 = vadd.f32 %v2880_v54, %v2712_v58  ;;  %3674 = vmatmul.msk.bf16.gmra.mxu2 %vm505_vm2, %v2169_v24  ;;  %v2654_v36 = vpop.f32.mrf.mxu3 }
 0x28c   : > { %v3167_v48 = vpack.c.bf16 %v3131_v61, %v3131_v61  ;;  %3712 = vmatmul.msk.bf16.gmra.mxu0 %vm505_vm2, %v2774_v56 }
 0x28d   : > { %v2988_v34 = vadd.f32 %v4657_v42, %v2948_v57 }
 0x28e   : > { %3204 = vst.msk [vmem:[%s4686_s19 + $0x38] sm:$0xf] %vm3189_vm9, %v3167_v48  ;;  %v2278_v47 = vpop.f32.mrf.mxu2 }
 0x28f   : > { %vm3024_vm12 = vcmp.ge.f32.partialorder %v2988_v34, 0.0  ;;  %v3060_v16 = vmul.f32 0.2, %v2988_v34  ;;  %v2344_v7 = vadd.f32 %v2278_v47, %v1983_v28  ;;  %v1919_v2 = vpop.f32.mrf.mxu1 }
 0x290   : > { %v1984_v10 = vadd.f32 %v1919_v2, %v4431_v46  ;;  %v2776_v46 = vsel %vm2739_vm7, %v2773_v40, %v2775_v20 }
 0x291   : > { %v3096_v22 = vsel %vm3024_vm12, %v2988_v34, %v3060_v16  ;;  %v2713_v32 = vadd.f32 %v4940_v6, %v2344_v7  ;;  %v2885_v19 = vpop.f32.mrf.mxu0 }
 0x292   : > { %v3132_v18 = vmul.f32 1.4142135, %v3096_v22 }
 0x293   : > { %v2949_v17 = vadd.f32 %v2883_v44, %v2713_v32  ;;  %v2657_v31 = vpop.f32.mrf.mxu3 }
 0x294   : > { %v3168_v26 = vpack.c.bf16 %v3132_v18, %v3132_v18 }
 0x295   : > { %v2989_v54 = vadd.f32 %v4657_v42, %v2949_v17 }
 0x296   : > { %3205 = vst.msk [vmem:[%s4686_s19 + $0x3c] sm:$0xf] %vm3189_vm9, %v3168_v26  ;;  %v2280_v37 = vpop.f32.mrf.mxu2 }
 0x297   : > { %vm3025_vm13 = vcmp.ge.f32.partialorder %v2989_v54, 0.0  ;;  %v3061_v62 = vmul.f32 0.2, %v2989_v54  ;;  %v2345_v6 = vadd.f32 %v2280_v37, %v1984_v10  ;;  %v1922_v49 = vpop.f32.mrf.mxu1 }
 0x298   : > { %v1985_v51 = vadd.f32 %v1922_v49, %v4448_v14 }
 0x299   : > { %v3097_v4 = vsel %vm3025_vm13, %v2989_v54, %v3061_v62  ;;  %v2714_v27 = vadd.f32 %v4959_v5, %v2345_v6  ;;  %v2888_v30 = vpop.f32.mrf.mxu0 }
 0x29a   : > { %v3133_v33 = vmul.f32 1.4142135, %v3097_v4  ;;  %3588 = vmatmul.msk.bf16.gmra.mxu1 %vm505_vm2, %v1810_v41 }
 0x29b   : > { %v2950_v0 = vadd.f32 %v2885_v19, %v2714_v27  ;;  %3675 = vmatmul.msk.bf16.gmra.mxu2 %vm505_vm2, %v2171_v12  ;;  %v2659_v13 = vpop.f32.mrf.mxu3 }
 0x29c   : > { %v3169_v24 = vpack.c.bf16 %v3133_v33, %v3133_v33  ;;  %3713 = vmatmul.msk.bf16.gmra.mxu0 %vm505_vm2, %v2776_v46 }
 0x29d   : > { %v2990_v11 = vadd.f32 %v4657_v42, %v2950_v0 }
 0x29e   : > { %3206 = vst.msk [vmem:[%s4686_s19 + $0x40] sm:$0xf] %vm3189_vm9, %v3169_v24  ;;  %v2283_v5 = vpop.f32.mrf.mxu2 }
 0x29f   : > { %vm3026_vm6 = vcmp.ge.f32.partialorder %v2990_v11, 0.0  ;;  %v3062_v40 = vmul.f32 0.2, %v2990_v11  ;;  %v2346_v58 = vadd.f32 %v2283_v5, %v1985_v51  ;;  %v1924_v44 = vpop.f32.mrf.mxu1 }
 0x2a0   : > { %v1986_v14 = vadd.f32 %v1924_v44, %v4462_v21 }
 0x2a1   : > { %v3098_v56 = vsel %vm3026_vm6, %v2990_v11, %v3062_v40  ;;  %v2715_v60 = vadd.f32 %v4971_v45, %v2346_v58  ;;  %v2890_v61 = vpop.f32.mrf.mxu0 }
 0x2a2   : > { %v3134_v57 = vmul.f32 1.4142135, %v3098_v56 }
 0x2a3   : > { %v2951_v48 = vadd.f32 %v2888_v30, %v2715_v60  ;;  %v2662_v47 = vpop.f32.mrf.mxu3 }
 0x2a4   : > { %v3170_v39 = vpack.c.bf16 %v3134_v57, %v3134_v57 }
 0x2a5   : > { %v2991_v34 = vadd.f32 %v4657_v42, %v2951_v48 }
 0x2a6   : > { %3207 = vst.msk [vmem:[%s4686_s19 + $0x44] sm:$0xf] %vm3189_vm9, %v3170_v39  ;;  %v2285_v28 = vpop.f32.mrf.mxu2 }
 0x2a7   : > { %vm3027_vm2 = vcmp.ge.f32.partialorder %v2991_v34, 0.0  ;;  %v3063_v16 = vmul.f32 0.2, %v2991_v34  ;;  %v2347_v7 = vadd.f32 %v2285_v28, %v1986_v14  ;;  %v1927_v2 = vpop.f32.mrf.mxu1 }
 0x2a8   : > { %v1987_v26 = vadd.f32 %v1927_v2, %v4472_v23 }
 0x2a9   : > { %v3099_v38 = vsel %vm3027_vm2, %v2991_v34, %v3063_v16  ;;  %v2716_v22 = vadd.f32 %v2654_v36, %v2347_v7  ;;  %v2893_v45 = vpop.f32.mrf.mxu0 }
 0x2aa   : > { %v3135_v32 = vmul.f32 1.4142135, %v3099_v38 }
 0x2ab   : > { %v2952_v19 = vadd.f32 %v2890_v61, %v2716_v22  ;;  %v2664_v10 = vpop.f32.mrf.mxu3 }
 0x2ac   : > { %v3171_v18 = vpack.c.bf16 %v3135_v32, %v3135_v32 }
 0x2ad   : > { %v2992_v17 = vadd.f32 %v4657_v42, %v2952_v19 }
 0x2ae   : > { %3208 = vst.msk [vmem:[%s4686_s19 + $0x48] sm:$0xf] %vm3189_vm9, %v3171_v18  ;;  %v2288_v21 = vpop.f32.mrf.mxu2 }
 0x2af   : > { %vm3028_vm7 = vcmp.ge.f32.partialorder %v2992_v17, 0.0  ;;  %v3064_v35 = vmul.f32 0.2, %v2992_v17  ;;  %v2348_v9 = vadd.f32 %v2288_v21, %v1987_v26  ;;  %v1929_v54 = vpop.f32.mrf.mxu1 }
 0x2b0   : > { %v1988_v12 = vadd.f32 %v1929_v54, %v4486_v59 }
 0x2b1   : > { %v3100_v20 = vsel %vm3028_vm7, %v2992_v17, %v3064_v35  ;;  %v2717_v37 = vadd.f32 %v2657_v31, %v2348_v9  ;;  %v2895_v36 = vpop.f32.mrf.mxu0 }
 0x2b2   : > { %v3136_v62 = vmul.f32 1.4142135, %v3100_v20 }
 0x2b3   : > { %v2953_v6 = vadd.f32 %v2893_v45, %v2717_v37  ;;  %v2667_v24 = vpop.f32.mrf.mxu3 }
 0x2b4   : > { %v3172_v49 = vpack.c.bf16 %v3136_v62, %v3136_v62 }
 0x2b5   : > { %v2993_v41 = vadd.f32 %v4657_v42, %v2953_v6 }
 0x2b6   : > { %3209 = vst.msk [vmem:[%s4686_s19 + $0x4c] sm:$0xf] %vm3189_vm9, %v3172_v49  ;;  %v2290_v23 = vpop.f32.mrf.mxu2 }
 0x2b7   : > { %vm3029_vm14 = vcmp.ge.f32.partialorder %v2993_v41, 0.0  ;;  %v3065_v4 = vmul.f32 0.2, %v2993_v41  ;;  %v2349_v27 = vadd.f32 %v2290_v23, %v1988_v12  ;;  %v1932_v30 = vpop.f32.mrf.mxu1 }
 0x2b8   : > { %v1989_v40 = vadd.f32 %v1932_v30, %v4495_v43 }
 0x2b9   : > { %v3101_v46 = vsel %vm3029_vm14, %v2993_v41, %v3065_v4  ;;  %v2718_v33 = vadd.f32 %v2659_v13, %v2349_v27  ;;  %v2898_v0 = vpop.f32.mrf.mxu0 }
 0x2ba   : > { %v3137_v31 = vmul.f32 1.4142135, %v3101_v46 }
 0x2bb   : > { %v2954_v11 = vadd.f32 %v2895_v36, %v2718_v33  ;;  %v2669_v34 = vpop.f32.mrf.mxu3 }
 0x2bc   : > { %v3173_v51 = vpack.c.bf16 %v3137_v31, %v3137_v31 }
 0x2bd   : > { %v2994_v5 = vadd.f32 %v4657_v42, %v2954_v11 }
 0x2be   : > { %3210 = vst.msk [vmem:[%s4686_s19 + $0x50] sm:$0xf] %vm3189_vm9, %v3173_v51  ;;  %v2293_v59 = vpop.f32.mrf.mxu2 }
 0x2bf   : > { %vm3030_vm15 = vcmp.ge.f32.partialorder %v2994_v5, 0.0  ;;  %v3066_v58 = vmul.f32 0.2, %v2994_v5  ;;  %v2350_v44 = vadd.f32 %v2293_v59, %v1989_v40  ;;  %v1934_v56 = vpop.f32.mrf.mxu1 }
 0x2c0   : > { %v1990_v43 = vadd.f32 %v1934_v56, %v4508_v25 }
 0x2c1   : > { %v3102_v60 = vsel %vm3030_vm15, %v2994_v5, %v3066_v58  ;;  %v2719_v61 = vadd.f32 %v2662_v47, %v2350_v44  ;;  %v2900_v13 = vpop.f32.mrf.mxu0 }
 0x2c2   : > { %v3138_v57 = vmul.f32 1.4142135, %v3102_v60 }
 0x2c3   : > { %v2955_v48 = vadd.f32 %v2898_v0, %v2719_v61  ;;  %v2672_v26 = vpop.f32.mrf.mxu3 }
 0x2c4   : > { %v3174_v39 = vpack.c.bf16 %v3138_v57, %v3138_v57 }
 0x2c5   : > { %v2995_v14 = vadd.f32 %v4657_v42, %v2955_v48 }
 0x2c6   : > { %3211 = vst.msk [vmem:[%s4686_s19 + $0x54] sm:$0xf] %vm3189_vm9, %v3174_v39  ;;  %v2295_v28 = vpop.f32.mrf.mxu2 }
 0x2c7   : > { %vm3031_vm0 = vcmp.ge.f32.partialorder %v2995_v14, 0.0  ;;  %v3067_v16 = vmul.f32 0.2, %v2995_v14  ;;  %v2351_v7 = vadd.f32 %v2295_v28, %v1990_v43  ;;  %v1937_v2 = vpop.f32.mrf.mxu1 }
 0x2c8   : > { %v1991_v17 = vadd.f32 %v1937_v2, %v4517_v8 }
 0x2c9   : > { %v3103_v38 = vsel %vm3031_vm0, %v2995_v14, %v3067_v16  ;;  %v2720_v22 = vadd.f32 %v2664_v10, %v2351_v7  ;;  %v2903_v47 = vpop.f32.mrf.mxu0 }
 0x2ca   : > { %v3139_v45 = vmul.f32 1.4142135, %v3103_v38 }
 0x2cb   : > { %v2956_v32 = vadd.f32 %v2900_v13, %v2720_v22  ;;  %v2674_v4 = vpop.f32.mrf.mxu3 }
 0x2cc   : > { %v3175_v19 = vpack.c.bf16 %v3139_v45, %v3139_v45 }
 0x2cd   : > { %v2996_v18 = vadd.f32 %v4657_v42, %v2956_v32 }
 0x2ce   : > { %3212 = vst.msk [vmem:[%s4686_s19 + $0x58] sm:$0xf] %vm3189_vm9, %v3175_v19  ;;  %v2298_v25 = vpop.f32.mrf.mxu2 }
 0x2cf   : > { %vm3032_vm1 = vcmp.ge.f32.partialorder %v2996_v18, 0.0  ;;  %v3068_v21 = vmul.f32 0.2, %v2996_v18  ;;  %v2352_v35 = vadd.f32 %v2298_v25, %v1991_v17  ;;  %v1939_v9 = vpop.f32.mrf.mxu1 }
 0x2d0   : > { %v1992_v49 = vadd.f32 %v1939_v9, %v4530_v50 }
 0x2d1   : > { %v3104_v54 = vsel %vm3032_vm1, %v2996_v18, %v3068_v21  ;;  %v2721_v20 = vadd.f32 %v2667_v24, %v2352_v35  ;;  %v2905_v10 = vpop.f32.mrf.mxu0 }
 0x2d2   : > { %v3140_v37 = vmul.f32 1.4142135, %v3104_v54 }
 0x2d3   : > { %v2957_v36 = vadd.f32 %v2903_v47, %v2721_v20  ;;  %v2677_v60 = vpop.f32.mrf.mxu3 }
 0x2d4   : > { %v3176_v62 = vpack.c.bf16 %v3140_v37, %v3140_v37 }
 0x2d5   : > { %v2997_v6 = vadd.f32 %v4657_v42, %v2957_v36  ;;  %v5035_v42 = vld [vmem:[%s5093_s2] ss:$0 sm:$0xff] }
 0x2d6   : > { %3213 = vst.msk [vmem:[%s4686_s19 + $0x5c] sm:$0xf] %vm3189_vm9, %v3176_v62  ;;  %v2300_v8 = vpop.f32.mrf.mxu2 }
 0x2d7   : > { %vm3033_vm3 = vcmp.ge.f32.partialorder %v2997_v6, 0.0  ;;  %v3069_v41 = vmul.f32 0.2, %v2997_v6  ;;  %v2353_v12 = vadd.f32 %v2300_v8, %v1992_v49  ;;  %v1942_v23 = vpop.f32.mrf.mxu1 }
 0x2d8   : > { %v1993_v24 = vadd.f32 %v1942_v23, %v4539_v29 }
 0x2d9   : > { %v3105_v27 = vsel %vm3033_vm3, %v2997_v6, %v3069_v41  ;;  %v2722_v30 = vadd.f32 %v2669_v34, %v2353_v12  ;;  %v2908_v46 = vpop.f32.mrf.mxu0 }
 0x2da   : > { %v3141_v33 = vmul.f32 1.4142135, %v3105_v27 }
 0x2db   : > { %v2958_v0 = vadd.f32 %v2905_v10, %v2722_v30  ;;  %v2679_v22 = vpop.f32.mrf.mxu3 }
 0x2dc   : > { %v3177_v31 = vpack.c.bf16 %v3141_v33, %v3141_v33 }
 0x2dd   : > { %v2998_v50 = vadd.f32 %v5035_v42, %v2958_v0 }
 0x2de   : > { %3214 = vst.msk [vmem:[%s4686_s19 + $0x60] sm:$0xf] %vm3189_vm9, %v3177_v31  ;;  %v2303_v11 = vpop.f32.mrf.mxu2 }
 0x2df   : > { %vm3034_vm4 = vcmp.ge.f32.partialorder %v2998_v50, 0.0  ;;  %v3070_v51 = vmul.f32 0.2, %v2998_v50  ;;  %v2354_v5 = vadd.f32 %v2303_v11, %v1993_v24  ;;  %v1944_v40 = vpop.f32.mrf.mxu1 }
 0x2e0   : > { %v1994_v48 = vadd.f32 %v1944_v40, %v4552_v15 }
 0x2e1   : > { %v3106_v59 = vsel %vm3034_vm4, %v2998_v50, %v3070_v51  ;;  %v2723_v58 = vadd.f32 %v2672_v26, %v2354_v5  ;;  %v2910_v44 = vpop.f32.mrf.mxu0 }
 0x2e2   : > { %v3142_v56 = vmul.f32 1.4142135, %v3106_v59 }
 0x2e3   : > { %v2959_v61 = vadd.f32 %v2908_v46, %v2723_v58  ;;  %v2682_v10 = vpop.f32.mrf.mxu3 }
 0x2e4   : > { %v3178_v13 = vpack.c.bf16 %v3142_v56, %v3142_v56 }
 0x2e5   : > { %v2999_v57 = vadd.f32 %v5035_v42, %v2959_v61 }
 0x2e6   : > { %3215 = vst.msk [vmem:[%s4686_s19 + $0x64] sm:$0xf] %vm3189_vm9, %v3178_v13  ;;  %v2305_v29 = vpop.f32.mrf.mxu2 }
 0x2e7   : > { %vm3035_vm8 = vcmp.ge.f32.partialorder %v2999_v57, 0.0  ;;  %v3071_v39 = vmul.f32 0.2, %v2999_v57  ;;  %v2355_v34 = vadd.f32 %v2305_v29, %v1994_v48  ;;  %v1947_v14 = vpop.f32.mrf.mxu1 }
 0x2e8   : > { %v1995_v15 = vadd.f32 %v1947_v14, %v4561_v52 }
 0x2e9   : > { %v3107_v43 = vsel %vm3035_vm8, %v2999_v57, %v3071_v39  ;;  %v2724_v28 = vadd.f32 %v2674_v4, %v2355_v34  ;;  %v2913_v16 = vpop.f32.mrf.mxu0 }
 0x2ea   : > { %v3143_v7 = vmul.f32 1.4142135, %v3107_v43 }
 0x2eb   : > { %v2960_v2 = vadd.f32 %v2910_v44, %v2724_v28  ;;  %v2684_v0 = vpop.f32.mrf.mxu3 }
 0x2ec   : > { %v3179_v38 = vpack.c.bf16 %v3143_v7, %v3143_v7 }
 0x2ed   : > { %v3000_v47 = vadd.f32 %v5035_v42, %v2960_v2 }
 0x2ee   : > { %3216 = vst.msk [vmem:[%s4686_s19 + $0x68] sm:$0xf] %vm3189_vm9, %v3179_v38  ;;  %v2308_v45 = vpop.f32.mrf.mxu2 }
 0x2ef   : > { %vm3036_vm10 = vcmp.ge.f32.partialorder %v3000_v47, 0.0  ;;  %v3072_v32 = vmul.f32 0.2, %v3000_v47  ;;  %v2356_v19 = vadd.f32 %v2308_v45, %v1995_v15  ;;  %v1949_v18 = vpop.f32.mrf.mxu1 }
 0x2f0   : > { %v1996_v20 = vadd.f32 %v1949_v18, %v4574_v55 }
 0x2f1   : > { %v3108_v17 = vsel %vm3036_vm10, %v3000_v47, %v3072_v32  ;;  %v2725_v25 = vadd.f32 %v2677_v60, %v2356_v19  ;;  %v2915_v26 = vpop.f32.mrf.mxu0 }
 0x2f2   : > { %v3144_v21 = vmul.f32 1.4142135, %v3108_v17 }
 0x2f3   : > { %v2961_v35 = vadd.f32 %v2913_v16, %v2725_v25  ;;  %v2687_v57 = vpop.f32.mrf.mxu3 }
 0x2f4   : > { %v3180_v9 = vpack.c.bf16 %v3144_v21, %v3144_v21 }
 0x2f5   : > { %v3001_v54 = vadd.f32 %v5035_v42, %v2961_v35 }
 0x2f6   : > { %3217 = vst.msk [vmem:[%s4686_s19 + $0x6c] sm:$0xf] %vm3189_vm9, %v3180_v9  ;;  %v2310_v52 = vpop.f32.mrf.mxu2 }
 0x2f7   : > { %vm3037_vm11 = vcmp.ge.f32.partialorder %v3001_v54, 0.0  ;;  %v3073_v37 = vmul.f32 0.2, %v3001_v54  ;;  %v2357_v36 = vadd.f32 %v2310_v52, %v1996_v20  ;;  %v1952_v62 = vpop.f32.mrf.mxu1  ;;  %v5123_v52 = vld [vmem:[#allocation8_spill] sm:$0xff] }
 0x2f8   : > { %v1997_v27 = vadd.f32 %v1952_v62, %v4583_v3 }
 0x2f9   : > { %v3109_v6 = vsel %vm3037_vm11, %v3001_v54, %v3073_v37  ;;  %v2726_v49 = vadd.f32 %v2679_v22, %v2357_v36  ;;  %v2918_v8 = vpop.f32.mrf.mxu0 }
 0x2fa   : > { %v3145_v41 = vmul.f32 1.4142135, %v3109_v6 }
 0x2fb   : > { %v2962_v12 = vadd.f32 %v2915_v26, %v2726_v49  ;;  %v2689_v15 = vpop.f32.mrf.mxu3 }
 0x2fc   : > { %v3181_v23 = vpack.c.bf16 %v3145_v41, %v3145_v41 }
 0x2fd   : > { %v3002_v4 = vadd.f32 %v5035_v42, %v2962_v12 }
 0x2fe   : > { %3218 = vst.msk [vmem:[%s4686_s19 + $0x70] sm:$0xf] %vm3189_vm9, %v3181_v23  ;;  %v2313_v55 = vpop.f32.mrf.mxu2 }
 0x2ff   : > { %vm3038_vm5 = vcmp.ge.f32.partialorder %v3002_v4, 0.0  ;;  %v3074_v30 = vmul.f32 0.2, %v3002_v4  ;;  %v2358_v46 = vadd.f32 %v2313_v55, %v1997_v27  ;;  %v1954_v33 = vpop.f32.mrf.mxu1  ;;  %v5124_v55 = vld [vmem:[#allocation9_spill] sm:$0xff] }
 0x300   : > { %v1998_v59 = vadd.f32 %v1954_v33, %v4596_v63 }
 0x301   : > { %v3110_v31 = vsel %vm3038_vm5, %v3002_v4, %v3074_v30  ;;  %v2727_v50 = vadd.f32 %v2682_v10, %v2358_v46  ;;  %v2920_v11 = vpop.f32.mrf.mxu0 }
 0x302   : > { %v3146_v24 = vmul.f32 1.4142135, %v3110_v31 }
 0x303   : > { %v2963_v51 = vadd.f32 %v2918_v8, %v2727_v50 }
 0x304   : > { %v3182_v5 = vpack.c.bf16 %v3146_v24, %v3146_v24 }
 0x305   : > { %v3003_v40 = vadd.f32 %v5035_v42, %v2963_v51 }
 0x306   : > { %3219 = vst.msk [vmem:[%s4686_s19 + $0x74] sm:$0xf] %vm3189_vm9, %v3182_v5  ;;  %v2315_v3 = vpop.f32.mrf.mxu2 }
 0x307   : > { %vm3039_vm12 = vcmp.ge.f32.partialorder %v3003_v40, 0.0  ;;  %v3075_v58 = vmul.f32 0.2, %v3003_v40  ;;  %v2359_v44 = vadd.f32 %v2315_v3, %v1998_v59  ;;  %v1957_v56 = vpop.f32.mrf.mxu1 }
 0x308   : > { %v1999_v63 = vadd.f32 %v1957_v56, %v4605_v53 }
 0x309   : > { %v3111_v60 = vsel %vm3039_vm12, %v3003_v40, %v3075_v58  ;;  %v2728_v61 = vadd.f32 %v2684_v0, %v2359_v44  ;;  %v2923_v39 = vpop.f32.mrf.mxu0 }
 0x30a   : > { %v3147_v13 = vmul.f32 1.4142135, %v3111_v60 }
 0x30b   : > { %v2964_v48 = vadd.f32 %v2920_v11, %v2728_v61 }
 0x30c   : > { %v3183_v29 = vpack.c.bf16 %v3147_v13, %v3147_v13 }
 0x30d   : > { %v3004_v34 = vadd.f32 %v5035_v42, %v2964_v48 }
 0x30e   : > { %3220 = vst.msk [vmem:[%s4686_s19 + $0x78] sm:$0xf] %vm3189_vm9, %v3183_v29  ;;  %v2318_v14 = vpop.f32.mrf.mxu2 }
 0x30f   : > { %vm3040_vm13 = vcmp.ge.f32.partialorder %v3004_v34, 0.0  ;;  %v3076_v43 = vmul.f32 0.2, %v3004_v34  ;;  %v2360_v28 = vadd.f32 %v2318_v14, %v1999_v63  ;;  %v1959_v16 = vpop.f32.mrf.mxu1 }
 0x310   : > { %v2000_v32 = vadd.f32 %v1959_v16, %v4618_v1  ;;  %v2692_v1 = vpop.f32.mrf.mxu3 }
 0x311   : > { %v3112_v7 = vsel %vm3040_vm13, %v3004_v34, %v3076_v43  ;;  %v2729_v2 = vadd.f32 %v2687_v57, %v2360_v28  ;;  %v2925_v53 = vpop.f32.mrf.mxu0 }
 0x312   : > { %v3148_v38 = vmul.f32 1.4142135, %v3112_v7 }
 0x313   : > { %v2965_v22 = vadd.f32 %v2923_v39, %v2729_v2 }
 0x314   : > { %v3184_v47 = vpack.c.bf16 %v3148_v38, %v3148_v38 }
 0x315   : > { %v3005_v45 = vadd.f32 %v5035_v42, %v2965_v22 }
 0x316   : > { %3221 = vst.msk [vmem:[%s4686_s19 + $0x7c] sm:$0xf] %vm3189_vm9, %v3184_v47  ;;  %v2320_v19 = vpop.f32.mrf.mxu2 }
 0x317   : > { %vm3041_vm6 = vcmp.ge.f32.partialorder %v3005_v45, 0.0  ;;  %v3077_v18 = vmul.f32 0.2, %v3005_v45  ;;  %v2361_v17 = vadd.f32 %v2320_v19, %v2000_v32  ;;  %v1962_v25 = vpop.f32.mrf.mxu1 }
 0x318   : > { %v2001_v10 = vadd.f32 %v1962_v25, %v5123_v52  ;;  %v2694_v31 = vpop.f32.mrf.mxu3 }
 0x319   : > { %v3113_v26 = vsel %vm3041_vm6, %v3005_v45, %v3077_v18  ;;  %v2730_v21 = vadd.f32 %v2689_v15, %v2361_v17  ;;  %v2928_v6 = vpop.f32.mrf.mxu0 }
 0x31a   : > { %v3149_v35 = vmul.f32 1.4142135, %v3113_v26 }
 0x31b   : > { %v2966_v9 = vadd.f32 %v2925_v53, %v2730_v21 }
 0x31c   : > { %v3185_v54 = vpack.c.bf16 %v3149_v35, %v3149_v35 }
 0x31d   : > { %v3006_v20 = vadd.f32 %v5035_v42, %v2966_v9 }
 0x31e   : > { %3222 = vst.msk [vmem:[%s4686_s19 + $0x80] sm:$0xf] %vm3189_vm9, %v3185_v54  ;;  %v2323_v37 = vpop.f32.mrf.mxu2 }
 0x31f   : > { %vm3042_vm2 = vcmp.ge.f32.partialorder %v3006_v20, 0.0  ;;  %v3078_v36 = vmul.f32 0.2, %v3006_v20  ;;  %v2362_v62 = vadd.f32 %v2323_v37, %v2001_v10  ;;  %v1964_v12 = vpop.f32.mrf.mxu1 }
 0x320   : > { %v2002_v30 = vadd.f32 %v1964_v12, %v5124_v55 }
 0x321   : > { %v3114_v49 = vsel %vm3042_vm2, %v3006_v20, %v3078_v36  ;;  %v2731_v8 = vadd.f32 %v2692_v1, %v2362_v62  ;;  %v2930_v51 = vpop.f32.mrf.mxu0 }
 0x322   : > { %v3150_v41 = vmul.f32 1.4142135, %v3114_v49 }
 0x323   : > { %v2967_v23 = vadd.f32 %v2928_v6, %v2731_v8 }
 0x324   : > { %v3186_v4 = vpack.c.bf16 %v3150_v41, %v3150_v41 }
 0x325   : > { %v3007_v27 = vadd.f32 %v5035_v42, %v2967_v23 }
 0x326   : > { %3223 = vst.msk [vmem:[%s4686_s19 + $0x84] sm:$0xf] %vm3189_vm9, %v3186_v4  ;;  %v2325_v46 = vpop.f32.mrf.mxu2 }
 0x327   : > { %vm3043_vm7 = vcmp.ge.f32.partialorder %v3007_v27, 0.0  ;;  %v3079_v33 = vmul.f32 0.2, %v3007_v27  ;;  %v2363_v0 = vadd.f32 %v2325_v46, %v2002_v30 }
 0x329   : > { %v3115_v50 = vsel %vm3043_vm7, %v3007_v27, %v3079_v33  ;;  %v2732_v24 = vadd.f32 %v2694_v31, %v2363_v0 }
 0x32a   : > { %v3151_v11 = vmul.f32 1.4142135, %v3115_v50 }
 0x32b   : > { %v2968_v5 = vadd.f32 %v2930_v51, %v2732_v24 }
 0x32c   : > { %v3187_v40 = vpack.c.bf16 %v3151_v11, %v3151_v11 }
 0x32d   : > { %v3008_v59 = vadd.f32 %v5035_v42, %v2968_v5 }
 0x32e   : > { %3224 = vst.msk [vmem:[%s4686_s19 + $0x88] sm:$0xf] %vm3189_vm9, %v3187_v40 }
 0x32f   : > { %vm3044_vm14 = vcmp.ge.f32.partialorder %v3008_v59, 0.0  ;;  %v3080_v3 = vmul.f32 0.2, %v3008_v59 }
 0x331   : > { %v3116_v58 = vsel %vm3044_vm14, %v3008_v59, %v3080_v3 }
 0x332   : > { %v3152_v44 = vmul.f32 1.4142135, %v3116_v58 }
 0x334   : > { %v3188_v56 = vpack.c.bf16 %v3152_v44, %v3152_v44 }
 0x336   : > { %3225 = vst.msk [vmem:[%s4686_s19 + $0x8c] sm:$0xf] %vm3189_vm9, %v3188_v56 }
 0x337 PF: > { %s13_s14 = sadd.s32 1, %s3847_s14   ;;  %s5125_s12 = smov %s3843_s13 }
 0x338   : > { %p10_p5 = scmp.ge.s32.totalorder %s13_s14, 4   ;;  %s5126_s13 = smov %s5128_s15 }
 0x33a   :  { %12 = sbr.rel (!%p10_p5) target bundleno = 2 (0x2), region = 76 }

// kernel: resblock_forward.6
= control target key start
LH: loop header
LB: loop body
LE: loop exit
PB: predicated region body
PF: predicated region fallthrough
CT: control target
= control target key end

     0   :  { %s937_s12 = smov 0   ;;  %s939_s13 = smov 0   ;;  %s1068_s0 = inlined_call_operand.vmem [shape: bf16[2,90,16], index: 0, kind: input, shape index: {}]   ;;  %s1069_s1 = inlined_call_operand.vmem [shape: bf16[4,16,8], index: 1, kind: input, shape index: {}]   ;;  %s1070_s2 = inlined_call_operand.vmem [shape: f32[1,8], index: 2, kind: input, shape index: {}]   ;;  %s1071_s3 = inlined_call_operand.vmem [shape: bf16[2,72,8], index: 3, kind: output, shape index: {}]  }
   0x1   :  { %s941_s14 = smov 0  }
   0x2 LB: > { %s25_s15 = sadd.s32 1, %s911_s13  ;;  %p772_p0 = scmp.ge.s32.totalorder %s915_s14, 1  ;;  %s915_s14 = sphi %s941_s14, %s13_s14   ;;  %s911_s13 = sphi %s939_s13, %s1073_s13   ;;  %s907_s12 = sphi %s937_s12, %s1072_s12  }
   0x3   : > { %p27_p1 = scmp.ge.s32.totalorder %s25_s15, 2  ;;  %p168_p2 = scmp.lt.s32.totalorder %s915_s14, 3 }
   0x5   : > { %s1075_s15 = smov (%p27_p1, %s25_s15), 0  ;;  %p169_p3 = pnand %p772_p0, %p168_p2 }
   0x6   : > { %p202_p4 = scmp.lt.s32.totalorder (!%p169_p3), %s907_s12, 1 }
   0x7   : > { %172 = sbr.rel (%p169_p3) target bundleno = 230 (0xe6), region = 32 }
   0xc   : > { %v855_v0 = vld [vmem:[%s1069_s1] sm:$0xff]  ;;  %v862_v1 = vld [vmem:[%s1069_s1 + $0x18] sm:$0xff]  ;;  %v856_v2 = vld [vmem:[%s1069_s1 + $0x8] sm:$0xff]  ;;  %s1077_s12 = smov (!%p202_p4, %s907_s12), 1  ;;  %vm309_vm0 = vcmask 130048   ;;  %vm556_vm1 = vcmask 1046528  }
   0xd   : > { %v861_v3 = vld [vmem:[%s1069_s1 + $0x10] sm:$0xff]  ;;  %383 = vmatpush.bf16.msra.mxu1 %v855_v0  ;;  %594 = vmatpush.bf16.msra.mxu3 %v862_v1  ;;  %s863_s24 = smul.u32 48, %s1077_s12  ;;  %vm263_vm2 = vsmask.f32 7424  ;;  %vm651_vm3 = vcmask 60416  }
   0xe   : > { %332 = vmatpush.bf16.msra.mxu0 %v856_v2  ;;  %514 = vmatpush.bf16.msra.mxu2 %v861_v3  ;;  %s864_s30 = smul.u32 36, %s1077_s12 }
   0xf   : > { %s973_s27 = scalar_lea.vmem %s1068_s0, %s863_s24 }
  0x10   : > { %v851_v4 = vld [vmem:[%s973_s27] sm:$0xff]  ;;  %v890_v6 = vld [vmem:[%s973_s27 + $0x4] sm:$0xf0]  ;;  %v857_v7 = vld [vmem:[%s973_s27 + $0xc] sm:$0xff]  ;;  %s1031_s6 = scalar_lea.vmem %s1071_s3, %s864_s30 }
  0x11   : > { %v410_v5 = vld [vmem:[%s973_s27 + $0x4] sm:$0xff]   ;;  %v267_v10 = vshll.u32 %v851_v4, 16  ;;  %806 = vmatmul.msk.bf16.vlgmr.msra.gmra.mxu1 %vm309_vm0, %v851_v4  ;;  %v265_v11 = vshrl.u32 %v851_v4, 16  ;;  %v455_v13 = vshll.u32 %v857_v7, 16  ;;  %v558_v15 = vrot.slane %v857_v7, 1  ;;  %v853_v27 = vld [vmem:[%s973_s27 + $0x10] sm:$0xff] }
  0x12   : > { %v891_v8 = vld [vmem:[%s973_s27 + $0x4] sm:$0xe]  ;;  %v852_v9 = vld [vmem:[%s973_s27 + $0x8] sm:$0xff]  ;;  %v448_v18 = vshrl.u32 %v410_v5, 16  ;;  %v450_v19 = vshll.u32 %v410_v5, 16  ;;  %v858_v29 = vld [vmem:[%s973_s27 + $0x14] sm:$0xff] }
  0x13   : > { %v272_v12 = vshll.u32 %v852_v9, 16  ;;  %v892_v14 = vor.u32 %v891_v8, %v890_v6  ;;  %v269_v16 = vrot.slane %v267_v10, 1  ;;  %v457_v23 = vrot.slane %v455_v13, 1  ;;  %v854_v42 = vld [vmem:[%s973_s27 + $0x18] sm:$0xff]  ;;  %v231_v51 = vld [vmem:[%s973_s27 + $0x20] sm:$0xf] }
  0x14   : > { %v452_v22 = vrot.slane %v450_v19, 1  ;;  %v276_v30 = vshrl.u32 %v852_v9, 16  ;;  %v280_v31 = vshll.u32 %v853_v27, 16  ;;  %v459_v32 = vshrl.u32 %v857_v7, 16  ;;  %v859_v43 = vld [vmem:[%s973_s27 + $0x1c] sm:$0xff] }
  0x15   : > { %v274_v17 = vrot.slane %v272_v12, 1  ;;  %v557_v20 = vrot.slane %v892_v14, 1  ;;  %v270_v21 = vor.u32 %v269_v16, %v265_v11  ;;  %v463_v33 = vshll.u32 %v858_v29, 16  ;;  %v234_v52 = vld [vmem:[%s973_s27 + $0x24] sm:$0x1] }
  0x16   : > { %v453_v26 = vor.u32 %v452_v22, %v448_v18  ;;  %v560_v34 = vrot.slane %v858_v29, 1  ;;  %v282_v36 = vrot.slane %v280_v31, 1  ;;  %v461_v37 = vor.u32 %v459_v32, %v457_v23  ;;  %v827_v61 = vld [vmem:[%s973_s27 + $0x24] sm:$0xf]  ;;  %v860_v62 = vld [vmem:[%s973_s27 + $0x24] sm:$0x10] }
  0x17   : > { %v559_v24 = vsel %vm556_vm1, %v557_v20, %v558_v15  ;;  %v275_v25 = vsel %vm263_vm2, %v270_v21, %v274_v17  ;;  %v278_v35 = vor.u32 %v276_v30, %v274_v17  ;;  %v465_v38 = vrot.slane %v463_v33, 1 }
  0x18   : > { %844 = vmatmul.msk.bf16.vlgmr.msra.gmra.mxu3 %vm309_vm0, %v559_v24  ;;  %797 = vmatmul.msk.bf16.vlgmr.msra.gmra.mxu0 %vm309_vm0, %v275_v25  ;;  %v458_v28 = vsel %vm263_vm2, %v453_v26, %v457_v23  ;;  %v561_v39 = vsel %vm556_vm1, %v558_v15, %v560_v34  ;;  %v284_v44 = vshrl.u32 %v853_v27, 16  ;;  %v288_v45 = vshll.u32 %v854_v42, 16  ;;  %v1024_v26 = vld [vmem:[%s1070_s2] ss:$0 sm:$0xff] }
  0x19   : > { %833 = vmatmul.msk.bf16.vlgmr.msra.gmra.mxu2 %vm309_vm0, %v458_v28  ;;  %v283_v40 = vsel %vm263_vm2, %v278_v35, %v282_v36  ;;  %v466_v41 = vsel %vm263_vm2, %v461_v37, %v465_v38  ;;  %v467_v46 = vshrl.u32 %v858_v29, 16  ;;  %v471_v47 = vshll.u32 %v859_v43, 16 }
  0x1a   : > { %v562_v48 = vrot.slane %v859_v43, 1  ;;  %v286_v49 = vor.u32 %v284_v44, %v282_v36  ;;  %v290_v50 = vrot.slane %v288_v45, 1  ;;  %v256_v57 = vunpack.c.l.b16 %v231_v51 }
  0x1b   : > { %v469_v53 = vor.u32 %v467_v46, %v465_v38  ;;  %v473_v54 = vrot.slane %v471_v47, 1  ;;  %v257_v58 = vunpack.c.l.b16 %v234_v52  ;;  %v828_v63 = vor.u32 %v860_v62, %v827_v61 }
  0x1c   : > { %v563_v55 = vsel %vm556_vm1, %v560_v34, %v562_v48  ;;  %v291_v56 = vsel %vm263_vm2, %v286_v49, %v290_v50  ;;  %v292_v0 = vshrl.u32 %v854_v42, 16  ;;  %v475_v2 = vshrl.u32 %v859_v43, 16 }
  0x1d   : > { %v474_v59 = vsel %vm263_vm2, %v469_v53, %v473_v54  ;;  %v262_v60 = vpack.c.b16 %v257_v58, %v256_v57  ;;  %v479_v3 = vshll.u32 %v828_v63, 16  ;;  %v564_v4 = vrot.slane %v828_v63, 1 }
  0x1e   : > { %v294_v5 = vor.u32 %v292_v0, %v290_v50  ;;  %v477_v7 = vor.u32 %v475_v2, %v473_v54  ;;  %v358_v12 = vpack.c.b16 %v256_v57, %v256_v57  ;;  %v483_v14 = vshrl.u32 %v828_v63, 16 }
  0x1f   : > { %v296_v1 = vshll.u32 %v262_v60, 16  ;;  %v481_v8 = vrot.slane %v479_v3, 1  ;;  %v300_v13 = vshrl.u32 %v262_v60, 16 }
  0x21   : > { %807 = vmatmul.msk.bf16.gmra.mxu1 %vm309_vm0, %v852_v9  ;;  %v298_v6 = vrot.slane %v296_v1, 1  ;;  %v565_v9 = vsel %vm556_vm1, %v562_v48, %v564_v4  ;;  %v482_v11 = vsel %vm263_vm2, %v477_v7, %v481_v8  ;;  %v485_v16 = vor.u32 %v483_v14, %v481_v8 }
  0x23   : > { %v299_v10 = vsel %vm263_vm2, %v294_v5, %v298_v6  ;;  %v302_v15 = vor.u32 %v300_v13, %v298_v6 }
  0x28   : > { %845 = vmatmul.msk.bf16.gmra.mxu3 %vm309_vm0, %v561_v39  ;;  %798 = vmatmul.msk.bf16.gmra.mxu0 %vm309_vm0, %v283_v40 }
  0x29   : > { %834 = vmatmul.msk.bf16.gmra.mxu2 %vm309_vm0, %v466_v41 }
  0x31   : > { %808 = vmatmul.msk.bf16.gmra.mxu1 %vm309_vm0, %v853_v27 }
  0x38   : > { %846 = vmatmul.msk.bf16.gmra.mxu3 %vm309_vm0, %v563_v55  ;;  %799 = vmatmul.msk.bf16.gmra.mxu0 %vm309_vm0, %v291_v56 }
  0x39   : > { %835 = vmatmul.msk.bf16.gmra.mxu2 %vm309_vm0, %v474_v59 }
  0x41   : > { %809 = vmatmul.msk.bf16.gmra.mxu1 %vm309_vm0, %v854_v42 }
  0x48   : > { %847 = vmatmul.msk.bf16.gmra.mxu3 %vm309_vm0, %v565_v9  ;;  %800 = vmatmul.msk.bf16.gmra.mxu0 %vm309_vm0, %v299_v10 }
  0x49   : > { %836 = vmatmul.msk.bf16.gmra.mxu2 %vm309_vm0, %v482_v11 }
  0x51   : > { %810 = vmatmul.msk.bf16.gmra.mxu1 %vm309_vm0, %v358_v12 }
  0x58   : > { %848 = vmatmul.msk.bf16.gmra.mxu3 %vm309_vm0, %v564_v4  ;;  %801 = vmatmul.msk.bf16.gmra.mxu0 %vm309_vm0, %v302_v15 }
  0x59   : > { %837 = vmatmul.msk.bf16.gmra.mxu2 %vm309_vm0, %v485_v16 }
  0x8e   : > { %v385_v17 = vpop.f32.mrf.mxu1 }
  0x95   : > { %v334_v18 = vpop.f32.mrf.mxu0 }
  0x96   : > { %v387_v19 = vpop.f32.mrf.mxu1  ;;  %v386_v20 = vadd.f32 %v385_v17, %v334_v18 }
  0x9b   : > { %v596_v21 = vpop.f32.mrf.mxu3 }
  0x9c   : > { %v516_v23 = vpop.f32.mrf.mxu2 }
  0x9d   : > { %v336_v22 = vpop.f32.mrf.mxu0  ;;  %v540_v25 = vadd.f32 %v516_v23, %v386_v20 }
  0x9e   : > { %v390_v24 = vpop.f32.mrf.mxu1  ;;  %v388_v30 = vadd.f32 %v387_v19, %v336_v22 }
  0x9f   : > { %v620_v27 = vadd.f32 %v596_v21, %v540_v25 }
  0xa1   : > { %v633_v28 = vadd.f32 %v1024_v26, %v620_v27 }
  0xa3   : > { %v598_v29 = vpop.f32.mrf.mxu3  ;;  %v642_v31 = vpack.c.bf16 %v633_v28, %v633_v28 }
  0xa4   : > { %v518_v33 = vpop.f32.mrf.mxu2 }
  0xa5   : > { %v339_v32 = vpop.f32.mrf.mxu0  ;;  %652 = vst.msk [vmem:[%s1031_s6] sm:$0xf] %vm651_vm3, %v642_v31  ;;  %v541_v35 = vadd.f32 %v518_v33, %v388_v30 }
  0xa6   : > { %v392_v34 = vpop.f32.mrf.mxu1  ;;  %v391_v37 = vadd.f32 %v390_v24, %v339_v32 }
  0xa7   : > { %v621_v36 = vadd.f32 %v598_v29, %v541_v35 }
  0xa9   : > { %v634_v38 = vadd.f32 %v1024_v26, %v621_v36 }
  0xab   : > { %v601_v39 = vpop.f32.mrf.mxu3  ;;  %v643_v40 = vpack.c.bf16 %v634_v38, %v634_v38 }
  0xac   : > { %v521_v42 = vpop.f32.mrf.mxu2 }
  0xad   : > { %v341_v41 = vpop.f32.mrf.mxu0  ;;  %653 = vst.msk [vmem:[%s1031_s6 + $0x4] sm:$0xf] %vm651_vm3, %v643_v40  ;;  %v542_v44 = vadd.f32 %v521_v42, %v391_v37 }
  0xae   : > { %v395_v43 = vpop.f32.mrf.mxu1  ;;  %v393_v48 = vadd.f32 %v392_v34, %v341_v41 }
  0xaf   : > { %v622_v45 = vadd.f32 %v601_v39, %v542_v44 }
  0xb1   : > { %v635_v46 = vadd.f32 %v1024_v26, %v622_v45 }
  0xb3   : > { %v603_v47 = vpop.f32.mrf.mxu3  ;;  %v644_v49 = vpack.c.bf16 %v635_v46, %v635_v46 }
  0xb4   : > { %v523_v51 = vpop.f32.mrf.mxu2 }
  0xb5   : > { %v344_v50 = vpop.f32.mrf.mxu0  ;;  %654 = vst.msk [vmem:[%s1031_s6 + $0x8] sm:$0xf] %vm651_vm3, %v644_v49  ;;  %v543_v53 = vadd.f32 %v523_v51, %v393_v48 }
  0xb6   : > { %v397_v52 = vpop.f32.mrf.mxu1  ;;  %v396_v55 = vadd.f32 %v395_v43, %v344_v50 }
  0xb7   : > { %v623_v54 = vadd.f32 %v603_v47, %v543_v53 }
  0xb9   : > { %v636_v56 = vadd.f32 %v1024_v26, %v623_v54 }
  0xbb   : > { %v606_v57 = vpop.f32.mrf.mxu3  ;;  %v645_v58 = vpack.c.bf16 %v636_v56, %v636_v56 }
  0xbc   : > { %v526_v60 = vpop.f32.mrf.mxu2 }
  0xbd   : > { %v346_v59 = vpop.f32.mrf.mxu0  ;;  %655 = vst.msk [vmem:[%s1031_s6 + $0xc] sm:$0xf] %vm651_vm3, %v645_v58  ;;  %v544_v62 = vadd.f32 %v526_v60, %v396_v55 }
  0xbe   : > { %v400_v61 = vpop.f32.mrf.mxu1  ;;  %v398_v2 = vadd.f32 %v397_v52, %v346_v59 }
  0xbf   : > { %v624_v63 = vadd.f32 %v606_v57, %v544_v62 }
  0xc1   : > { %v637_v0 = vadd.f32 %v1024_v26, %v624_v63 }
  0xc3   : > { %v608_v1 = vpop.f32.mrf.mxu3  ;;  %v646_v3 = vpack.c.bf16 %v637_v0, %v637_v0 }
  0xc4   : > { %v528_v5 = vpop.f32.mrf.mxu2 }
  0xc5   : > { %v349_v4 = vpop.f32.mrf.mxu0  ;;  %656 = vst.msk [vmem:[%s1031_s6 + $0x10] sm:$0xf] %vm651_vm3, %v646_v3  ;;  %v545_v7 = vadd.f32 %v528_v5, %v398_v2 }
  0xc6   : > { %v402_v6 = vpop.f32.mrf.mxu1  ;;  %v401_v9 = vadd.f32 %v400_v61, %v349_v4 }
  0xc7   : > { %v625_v8 = vadd.f32 %v608_v1, %v545_v7 }
  0xc9   : > { %v638_v10 = vadd.f32 %v1024_v26, %v625_v8 }
  0xcb   : > { %v611_v11 = vpop.f32.mrf.mxu3  ;;  %v647_v12 = vpack.c.bf16 %v638_v10, %v638_v10 }
  0xcc   : > { %v531_v14 = vpop.f32.mrf.mxu2 }
  0xcd   : > { %v351_v13 = vpop.f32.mrf.mxu0  ;;  %657 = vst.msk [vmem:[%s1031_s6 + $0x14] sm:$0xf] %vm651_vm3, %v647_v12  ;;  %v546_v16 = vadd.f32 %v531_v14, %v401_v9 }
  0xce   : > { %v405_v15 = vpop.f32.mrf.mxu1  ;;  %v403_v20 = vadd.f32 %v402_v6, %v351_v13 }
  0xcf   : > { %v626_v17 = vadd.f32 %v611_v11, %v546_v16 }
  0xd1   : > { %v639_v18 = vadd.f32 %v1024_v26, %v626_v17 }
  0xd3   : > { %v613_v19 = vpop.f32.mrf.mxu3  ;;  %v648_v21 = vpack.c.bf16 %v639_v18, %v639_v18 }
  0xd4   : > { %v533_v23 = vpop.f32.mrf.mxu2 }
  0xd5   : > { %v354_v22 = vpop.f32.mrf.mxu0  ;;  %658 = vst.msk [vmem:[%s1031_s6 + $0x18] sm:$0xf] %vm651_vm3, %v648_v21  ;;  %v547_v25 = vadd.f32 %v533_v23, %v403_v20 }
  0xd6   : > { %v407_v24 = vpop.f32.mrf.mxu1  ;;  %v406_v28 = vadd.f32 %v405_v15, %v354_v22 }
  0xd7   : > { %v627_v27 = vadd.f32 %v613_v19, %v547_v25 }
  0xd9   : > { %v640_v29 = vadd.f32 %v1024_v26, %v627_v27 }
  0xdb   : > { %v616_v30 = vpop.f32.mrf.mxu3  ;;  %v649_v31 = vpack.c.bf16 %v640_v29, %v640_v29 }
  0xdc   : > { %v536_v33 = vpop.f32.mrf.mxu2 }
  0xdd   : > { %v356_v32 = vpop.f32.mrf.mxu0  ;;  %659 = vst.msk [vmem:[%s1031_s6 + $0x1c] sm:$0xf] %vm651_vm3, %v649_v31  ;;  %v548_v34 = vadd.f32 %v536_v33, %v406_v28 }
  0xdf   : > { %v628_v35 = vadd.f32 %v616_v30, %v548_v34 }
  0xe1   : > { %v641_v36 = vadd.f32 %v1024_v26, %v628_v35 }
  0xe3   : > { %v618_v37 = vpop.f32.mrf.mxu3  ;;  %v650_v38 = vpack.c.bf16 %v641_v36, %v641_v36 }
  0xe4   : > { %v538_v39 = vpop.f32.mrf.mxu2 }
  0xe5   : > { %660 = vst.msk [vmem:[%s1031_s6 + $0x20] sm:$0xf] %vm651_vm3, %v650_v38 }
  0xe6 PF: > { %s13_s14 = sadd.s32 1, %s915_s14   ;;  %s1072_s12 = smov %s911_s13 }
  0xe7   : > { %p10_p5 = scmp.ge.s32.totalorder %s13_s14, 4   ;;  %s1073_s13 = smov %s1075_s15 }
  0xe9   :  { %12 = sbr.rel (!%p10_p5) target bundleno = 2 (0x2), region = 71 }

// kernel: resblock_forward.7
= control target key start
LH: loop header
LB: loop body
LE: loop exit
PB: predicated region body
PF: predicated region fallthrough
CT: control target
= control target key end

     0   :  { %s1102_s15 = smov 0   ;;  %s1104_s16 = smov 0   ;;  %s1244_s0 = inlined_call_operand.vmem [shape: bf16[2,90,16], index: 0, kind: input, shape index: {}]   ;;  %s1245_s1 = inlined_call_operand.vmem [shape: bf16[4,16,8], index: 1, kind: input, shape index: {}]   ;;  %s1246_s2 = inlined_call_operand.vmem [shape: f32[1,8], index: 2, kind: input, shape index: {}]   ;;  %s1247_s3 = inlined_call_operand.vmem [shape: bf16[2,72,8], index: 3, kind: input, shape index: {}]   ;;  %s1248_s4 = inlined_call_operand.vmem [shape: f32[2,72,8], index: 4, kind: output, shape index: {}]  }
   0x1   :  { %s1106_s17 = smov 0  }
   0x2 LB: > { %s26_s18 = sadd.s32 1, %s1071_s16  ;;  %p911_p0 = scmp.ge.s32.totalorder %s1075_s17, 1  ;;  %s1075_s17 = sphi %s1106_s17, %s14_s17   ;;  %s1071_s16 = sphi %s1104_s16, %s1250_s16   ;;  %s1067_s15 = sphi %s1102_s15, %s1249_s15  }
   0x3   : > { %p28_p1 = scmp.ge.s32.totalorder %s26_s18, 2  ;;  %p208_p2 = scmp.lt.s32.totalorder %s1075_s17, 3 }
   0x5   : > { %s1252_s18 = smov (%p28_p1, %s26_s18), 0  ;;  %p209_p3 = pnand %p911_p0, %p208_p2 }
   0x6   : > { %p252_p4 = scmp.lt.s32.totalorder (!%p209_p3), %s1067_s15, 1 }
   0x7   : > { %212 = sbr.rel (%p209_p3) target bundleno = 237 (0xed), region = 36 }
   0xc   : > { %v995_v0 = vld [vmem:[%s1245_s1] sm:$0xff]  ;;  %v1002_v1 = vld [vmem:[%s1245_s1 + $0x18] sm:$0xff]  ;;  %v996_v2 = vld [vmem:[%s1245_s1 + $0x8] sm:$0xff]  ;;  %s1254_s15 = smov (!%p252_p4, %s1067_s15), 1  ;;  %vm367_vm0 = vcmask 130048   ;;  %vm614_vm1 = vcmask 1046528  }
   0xd   : > { %v1001_v3 = vld [vmem:[%s1245_s1 + $0x10] sm:$0xff]  ;;  %441 = vmatpush.bf16.msra.mxu1 %v995_v0  ;;  %652 = vmatpush.bf16.msra.mxu3 %v1002_v1  ;;  %s1022_s27 = smul.u32 48, %s1254_s15  ;;  %vm321_vm2 = vsmask.f32 7424  ;;  %vm772_vm4 = vcmask 64512  }
   0xe   : > { %390 = vmatpush.bf16.msra.mxu0 %v996_v2  ;;  %572 = vmatpush.bf16.msra.mxu2 %v1001_v3  ;;  %s1023_s5 = smul.u32 36, %s1254_s15 }
   0xf   : > { %s1138_s30 = scalar_lea.vmem %s1244_s0, %s1022_s27  ;;  %s1024_s11 = smul.u32 72, %s1254_s15 }
  0x10   : > { %v991_v4 = vld [vmem:[%s1138_s30] sm:$0xff]  ;;  %v1050_v6 = vld [vmem:[%s1138_s30 + $0x4] sm:$0xf0]  ;;  %v997_v7 = vld [vmem:[%s1138_s30 + $0xc] sm:$0xff]  ;;  %s1195_s10 = scalar_lea.vmem %s1247_s3, %s1023_s5 }
  0x11   : > { %v468_v5 = vld [vmem:[%s1138_s30 + $0x4] sm:$0xff]   ;;  %v325_v10 = vshll.u32 %v991_v4, 16  ;;  %946 = vmatmul.msk.bf16.vlgmr.msra.gmra.mxu1 %vm367_vm0, %v991_v4  ;;  %v323_v11 = vshrl.u32 %v991_v4, 16  ;;  %v513_v13 = vshll.u32 %v997_v7, 16  ;;  %v616_v15 = vrot.slane %v997_v7, 1  ;;  %v993_v27 = vld [vmem:[%s1138_s30 + $0x10] sm:$0xff]  ;;  %s1203_s14 = scalar_lea.vmem %s1248_s4, %s1024_s11 }
  0x12   : > { %v1051_v8 = vld [vmem:[%s1138_s30 + $0x4] sm:$0xe]  ;;  %v992_v9 = vld [vmem:[%s1138_s30 + $0x8] sm:$0xff]  ;;  %v506_v18 = vshrl.u32 %v468_v5, 16  ;;  %v508_v19 = vshll.u32 %v468_v5, 16  ;;  %v998_v29 = vld [vmem:[%s1138_s30 + $0x14] sm:$0xff] }
  0x13   : > { %v330_v12 = vshll.u32 %v992_v9, 16  ;;  %v1052_v14 = vor.u32 %v1051_v8, %v1050_v6  ;;  %v327_v16 = vrot.slane %v325_v10, 1  ;;  %v515_v23 = vrot.slane %v513_v13, 1  ;;  %v994_v42 = vld [vmem:[%s1138_s30 + $0x18] sm:$0xff]  ;;  %v289_v51 = vld [vmem:[%s1138_s30 + $0x20] sm:$0xf] }
  0x14   : > { %v510_v22 = vrot.slane %v508_v19, 1  ;;  %v334_v30 = vshrl.u32 %v992_v9, 16  ;;  %v338_v31 = vshll.u32 %v993_v27, 16  ;;  %v517_v32 = vshrl.u32 %v997_v7, 16  ;;  %v999_v43 = vld [vmem:[%s1138_s30 + $0x1c] sm:$0xff] }
  0x15   : > { %v332_v17 = vrot.slane %v330_v12, 1  ;;  %v615_v20 = vrot.slane %v1052_v14, 1  ;;  %v328_v21 = vor.u32 %v327_v16, %v323_v11  ;;  %v521_v33 = vshll.u32 %v998_v29, 16  ;;  %v292_v52 = vld [vmem:[%s1138_s30 + $0x24] sm:$0x1] }
  0x16   : > { %v511_v26 = vor.u32 %v510_v22, %v506_v18  ;;  %v618_v34 = vrot.slane %v998_v29, 1  ;;  %v340_v36 = vrot.slane %v338_v31, 1  ;;  %v519_v37 = vor.u32 %v517_v32, %v515_v23  ;;  %v967_v61 = vld [vmem:[%s1138_s30 + $0x24] sm:$0xf]  ;;  %v1000_v62 = vld [vmem:[%s1138_s30 + $0x24] sm:$0x10] }
  0x17   : > { %v617_v24 = vsel %vm614_vm1, %v615_v20, %v616_v15  ;;  %v333_v25 = vsel %vm321_vm2, %v328_v21, %v332_v17  ;;  %v336_v35 = vor.u32 %v334_v30, %v332_v17  ;;  %v523_v38 = vrot.slane %v521_v33, 1 }
  0x18   : > { %984 = vmatmul.msk.bf16.vlgmr.msra.gmra.mxu3 %vm367_vm0, %v617_v24  ;;  %937 = vmatmul.msk.bf16.vlgmr.msra.gmra.mxu0 %vm367_vm0, %v333_v25  ;;  %v516_v28 = vsel %vm321_vm2, %v511_v26, %v515_v23  ;;  %v619_v39 = vsel %vm614_vm1, %v616_v15, %v618_v34  ;;  %v342_v44 = vshrl.u32 %v993_v27, 16  ;;  %v346_v45 = vshll.u32 %v994_v42, 16  ;;  %v1190_v26 = vld [vmem:[%s1246_s2] ss:$0 sm:$0xff] }
  0x19   : > { %973 = vmatmul.msk.bf16.vlgmr.msra.gmra.mxu2 %vm367_vm0, %v516_v28  ;;  %v341_v40 = vsel %vm321_vm2, %v336_v35, %v340_v36  ;;  %v524_v41 = vsel %vm321_vm2, %v519_v37, %v523_v38  ;;  %v525_v46 = vshrl.u32 %v998_v29, 16  ;;  %v529_v47 = vshll.u32 %v999_v43, 16  ;;  %v1004_v29 = vld [vmem:[%s1195_s10] sm:$0xff]  }
  0x1a   : > { %v620_v48 = vrot.slane %v999_v43, 1  ;;  %v344_v49 = vor.u32 %v342_v44, %v340_v36  ;;  %v348_v50 = vrot.slane %v346_v45, 1  ;;  %v314_v57 = vunpack.c.l.b16 %v289_v51 }
  0x1b   : > { %v527_v53 = vor.u32 %v525_v46, %v523_v38  ;;  %v531_v54 = vrot.slane %v529_v47, 1  ;;  %v315_v58 = vunpack.c.l.b16 %v292_v52  ;;  %v968_v63 = vor.u32 %v1000_v62, %v967_v61 }
  0x1c   : > { %v621_v55 = vsel %vm614_vm1, %v618_v34, %v620_v48  ;;  %v349_v56 = vsel %vm321_vm2, %v344_v49, %v348_v50  ;;  %v350_v0 = vshrl.u32 %v994_v42, 16  ;;  %v533_v2 = vshrl.u32 %v999_v43, 16 }
  0x1d   : > { %v532_v59 = vsel %vm321_vm2, %v527_v53, %v531_v54  ;;  %v320_v60 = vpack.c.b16 %v315_v58, %v314_v57  ;;  %v537_v3 = vshll.u32 %v968_v63, 16  ;;  %v622_v4 = vrot.slane %v968_v63, 1 }
  0x1e   : > { %v352_v5 = vor.u32 %v350_v0, %v348_v50  ;;  %v535_v7 = vor.u32 %v533_v2, %v531_v54  ;;  %v416_v12 = vpack.c.b16 %v314_v57, %v314_v57  ;;  %v541_v14 = vshrl.u32 %v968_v63, 16  ;;  %v1019_v57 = vld [vmem:[%s1195_s10 + $0x8] sm:$0xff]  }
  0x1f   : > { %v354_v1 = vshll.u32 %v320_v60, 16  ;;  %v539_v8 = vrot.slane %v537_v3, 1  ;;  %v358_v13 = vshrl.u32 %v320_v60, 16  ;;  %v1005_v34 = vunpack.c.l.bf16 %v1004_v29 }
  0x20   : > { %v1009_v63 = vunpack.c.l.bf16 %v1019_v57 }
  0x21   : > { %947 = vmatmul.msk.bf16.gmra.mxu1 %vm367_vm0, %v992_v9  ;;  %v356_v6 = vrot.slane %v354_v1, 1  ;;  %v623_v9 = vsel %vm614_vm1, %v620_v48, %v622_v4  ;;  %v540_v11 = vsel %vm321_vm2, %v535_v7, %v539_v8  ;;  %v543_v16 = vor.u32 %v541_v14, %v539_v8 }
  0x22   : > { %v1006_v48 = vunpack.c.h.bf16 %v1004_v29 }
  0x23   : > { %v357_v10 = vsel %vm321_vm2, %v352_v5, %v356_v6  ;;  %v360_v15 = vor.u32 %v358_v13, %v356_v6  ;;  %v1010_v13 = vunpack.c.h.bf16 %v1019_v57 }
  0x28   : > { %985 = vmatmul.msk.bf16.gmra.mxu3 %vm367_vm0, %v619_v39  ;;  %938 = vmatmul.msk.bf16.gmra.mxu0 %vm367_vm0, %v341_v40 }
  0x29   : > { %974 = vmatmul.msk.bf16.gmra.mxu2 %vm367_vm0, %v524_v41 }
  0x31   : > { %948 = vmatmul.msk.bf16.gmra.mxu1 %vm367_vm0, %v993_v27 }
  0x38   : > { %986 = vmatmul.msk.bf16.gmra.mxu3 %vm367_vm0, %v621_v55  ;;  %939 = vmatmul.msk.bf16.gmra.mxu0 %vm367_vm0, %v349_v56 }
  0x39   : > { %975 = vmatmul.msk.bf16.gmra.mxu2 %vm367_vm0, %v532_v59 }
  0x41   : > { %949 = vmatmul.msk.bf16.gmra.mxu1 %vm367_vm0, %v994_v42 }
  0x48   : > { %987 = vmatmul.msk.bf16.gmra.mxu3 %vm367_vm0, %v623_v9  ;;  %940 = vmatmul.msk.bf16.gmra.mxu0 %vm367_vm0, %v357_v10 }
  0x49   : > { %976 = vmatmul.msk.bf16.gmra.mxu2 %vm367_vm0, %v540_v11 }
  0x51   : > { %950 = vmatmul.msk.bf16.gmra.mxu1 %vm367_vm0, %v416_v12 }
  0x58   : > { %988 = vmatmul.msk.bf16.gmra.mxu3 %vm367_vm0, %v622_v4  ;;  %941 = vmatmul.msk.bf16.gmra.mxu0 %vm367_vm0, %v360_v15 }
  0x59   : > { %977 = vmatmul.msk.bf16.gmra.mxu2 %vm367_vm0, %v543_v16 }
  0x8e   : > { %v443_v17 = vpop.f32.mrf.mxu1 }
  0x95   : > { %v392_v18 = vpop.f32.mrf.mxu0 }
  0x96   : > { %v445_v19 = vpop.f32.mrf.mxu1  ;;  %v444_v20 = vadd.f32 %v443_v17, %v392_v18 }
  0x9b   : > { %v654_v21 = vpop.f32.mrf.mxu3 }
  0x9c   : > { %v574_v23 = vpop.f32.mrf.mxu2 }
  0x9d   : > { %v394_v22 = vpop.f32.mrf.mxu0  ;;  %v598_v25 = vadd.f32 %v574_v23, %v444_v20 }
  0x9e   : > { %v448_v24 = vpop.f32.mrf.mxu1  ;;  %v446_v31 = vadd.f32 %v445_v19, %v394_v22  ;;  %v1020_v22 = vld [vmem:[%s1195_s10 + $0x10] sm:$0xff]  }
  0x9f   : > { %v678_v27 = vadd.f32 %v654_v21, %v598_v25  ;;  %v1013_v29 = vunpack.c.l.bf16 %v1020_v22 }
  0xa1   : > { %v691_v28 = vadd.f32 %v1190_v26, %v678_v27 }
  0xa3   : > { %v656_v30 = vpop.f32.mrf.mxu3  ;;  %vm700_vm3 = vcmp.ge.f32.partialorder %v691_v28, 0.0  ;;  %v709_v32 = vmul.f32 0.2, %v691_v28 }
  0xa4   : > { %v576_v35 = vpop.f32.mrf.mxu2 }
  0xa5   : > { %v397_v33 = vpop.f32.mrf.mxu0  ;;  %v718_v37 = vsel %vm700_vm3, %v691_v28, %v709_v32  ;;  %v599_v38 = vadd.f32 %v576_v35, %v446_v31 }
  0xa6   : > { %v450_v36 = vpop.f32.mrf.mxu1  ;;  %v727_v39 = vmul.f32 1.4142135, %v718_v37  ;;  %v449_v42 = vadd.f32 %v448_v24, %v397_v33 }
  0xa7   : > { %v679_v40 = vadd.f32 %v656_v30, %v599_v38 }
  0xa8   : > { %v754_v41 = vadd.f32 %v1005_v34, %v727_v39 }
  0xa9   : > { %v692_v43 = vadd.f32 %v1190_v26, %v679_v40 }
  0xaa   : > { %v763_v45 = vmul.f32 0.70710677, %v754_v41 }
  0xab   : > { %v659_v44 = vpop.f32.mrf.mxu3  ;;  %vm701_vm5 = vcmp.ge.f32.partialorder %v692_v43, 0.0  ;;  %v710_v46 = vmul.f32 0.2, %v692_v43 }
  0xac   : > { %773 = vst.msk [vmem:[%s1203_s14] sm:$0xff] %vm772_vm4, %v763_v45  ;;  %v579_v49 = vpop.f32.mrf.mxu2 }
  0xad   : > { %v399_v47 = vpop.f32.mrf.mxu0  ;;  %v719_v51 = vsel %vm701_vm5, %v692_v43, %v710_v46  ;;  %v600_v52 = vadd.f32 %v579_v49, %v449_v42  ;;  %v1014_v43 = vunpack.c.h.bf16 %v1020_v22 }
  0xae   : > { %v453_v50 = vpop.f32.mrf.mxu1  ;;  %v728_v53 = vmul.f32 1.4142135, %v719_v51  ;;  %v451_v60 = vadd.f32 %v450_v36, %v399_v47 }
  0xaf   : > { %v680_v54 = vadd.f32 %v659_v44, %v600_v52  ;;  %v1021_v52 = vld [vmem:[%s1195_s10 + $0x18] sm:$0xff]  }
  0xb0   : > { %v755_v55 = vadd.f32 %v1006_v48, %v728_v53 }
  0xb1   : > { %v693_v56 = vadd.f32 %v1190_v26, %v680_v54 }
  0xb2   : > { %v764_v59 = vmul.f32 0.70710677, %v755_v55 }
  0xb3   : > { %v661_v58 = vpop.f32.mrf.mxu3  ;;  %vm702_vm6 = vcmp.ge.f32.partialorder %v693_v56, 0.0  ;;  %v711_v61 = vmul.f32 0.2, %v693_v56 }
  0xb4   : > { %774 = vst.msk [vmem:[%s1203_s14 + $0x8] sm:$0xff] %vm772_vm4, %v764_v59  ;;  %v581_v0 = vpop.f32.mrf.mxu2 }
  0xb5   : > { %v402_v62 = vpop.f32.mrf.mxu0  ;;  %v720_v2 = vsel %vm702_vm6, %v693_v56, %v711_v61  ;;  %v601_v3 = vadd.f32 %v581_v0, %v451_v60 }
  0xb6   : > { %v455_v1 = vpop.f32.mrf.mxu1  ;;  %v729_v4 = vmul.f32 1.4142135, %v720_v2  ;;  %v454_v7 = vadd.f32 %v453_v50, %v402_v62 }
  0xb7   : > { %v681_v5 = vadd.f32 %v661_v58, %v601_v3  ;;  %v1017_v58 = vunpack.c.l.bf16 %v1021_v52 }
  0xb8   : > { %v756_v6 = vadd.f32 %v1009_v63, %v729_v4 }
  0xb9   : > { %v694_v8 = vadd.f32 %v1190_v26, %v681_v5 }
  0xba   : > { %v765_v10 = vmul.f32 0.70710677, %v756_v6 }
  0xbb   : > { %v664_v9 = vpop.f32.mrf.mxu3  ;;  %vm703_vm7 = vcmp.ge.f32.partialorder %v694_v8, 0.0  ;;  %v712_v11 = vmul.f32 0.2, %v694_v8 }
  0xbc   : > { %775 = vst.msk [vmem:[%s1203_s14 + $0x10] sm:$0xff] %vm772_vm4, %v765_v10  ;;  %v584_v14 = vpop.f32.mrf.mxu2 }
  0xbd   : > { %v404_v12 = vpop.f32.mrf.mxu0  ;;  %v721_v16 = vsel %vm703_vm7, %v694_v8, %v712_v11  ;;  %v602_v17 = vadd.f32 %v584_v14, %v454_v7  ;;  %v1018_v8 = vunpack.c.h.bf16 %v1021_v52 }
  0xbe   : > { %v458_v15 = vpop.f32.mrf.mxu1  ;;  %v730_v18 = vmul.f32 1.4142135, %v721_v16  ;;  %v456_v25 = vadd.f32 %v455_v1, %v404_v12  ;;  %v744_v16 = vld [vmem:[%s1195_s10 + $0x20] sm:$0xf] }
  0xbf   : > { %v682_v19 = vadd.f32 %v664_v9, %v602_v17 }
  0xc0   : > { %v757_v20 = vadd.f32 %v1010_v13, %v730_v18 }
  0xc1   : > { %v695_v21 = vadd.f32 %v1190_v26, %v682_v19 }
  0xc2   : > { %v766_v24 = vmul.f32 0.70710677, %v757_v20  ;;  %v753_v20 = vunpack.c.l.bf16 %v744_v16 }
  0xc3   : > { %v666_v23 = vpop.f32.mrf.mxu3  ;;  %vm704_vm8 = vcmp.ge.f32.partialorder %v695_v21, 0.0  ;;  %v713_v27 = vmul.f32 0.2, %v695_v21 }
  0xc4   : > { %776 = vst.msk [vmem:[%s1203_s14 + $0x18] sm:$0xff] %vm772_vm4, %v766_v24  ;;  %v586_v30 = vpop.f32.mrf.mxu2 }
  0xc5   : > { %v407_v28 = vpop.f32.mrf.mxu0  ;;  %v722_v32 = vsel %vm704_vm8, %v695_v21, %v713_v27  ;;  %v603_v33 = vadd.f32 %v586_v30, %v456_v25 }
  0xc6   : > { %v460_v31 = vpop.f32.mrf.mxu1  ;;  %v731_v34 = vmul.f32 1.4142135, %v722_v32  ;;  %v459_v37 = vadd.f32 %v458_v15, %v407_v28 }
  0xc7   : > { %v683_v35 = vadd.f32 %v666_v23, %v603_v33 }
  0xc8   : > { %v758_v36 = vadd.f32 %v1013_v29, %v731_v34 }
  0xc9   : > { %v696_v38 = vadd.f32 %v1190_v26, %v683_v35 }
  0xca   : > { %v767_v40 = vmul.f32 0.70710677, %v758_v36 }
  0xcb   : > { %v669_v39 = vpop.f32.mrf.mxu3  ;;  %vm705_vm9 = vcmp.ge.f32.partialorder %v696_v38, 0.0  ;;  %v714_v41 = vmul.f32 0.2, %v696_v38 }
  0xcc   : > { %777 = vst.msk [vmem:[%s1203_s14 + $0x20] sm:$0xff] %vm772_vm4, %v767_v40  ;;  %v589_v44 = vpop.f32.mrf.mxu2 }
  0xcd   : > { %v409_v42 = vpop.f32.mrf.mxu0  ;;  %v723_v46 = vsel %vm705_vm9, %v696_v38, %v714_v41  ;;  %v604_v47 = vadd.f32 %v589_v44, %v459_v37 }
  0xce   : > { %v463_v45 = vpop.f32.mrf.mxu1  ;;  %v732_v48 = vmul.f32 1.4142135, %v723_v46  ;;  %v461_v55 = vadd.f32 %v460_v31, %v409_v42 }
  0xcf   : > { %v684_v49 = vadd.f32 %v669_v39, %v604_v47 }
  0xd0   : > { %v759_v50 = vadd.f32 %v1014_v43, %v732_v48 }
  0xd1   : > { %v697_v51 = vadd.f32 %v1190_v26, %v684_v49 }
  0xd2   : > { %v768_v54 = vmul.f32 0.70710677, %v759_v50 }
  0xd3   : > { %v671_v53 = vpop.f32.mrf.mxu3  ;;  %vm706_vm10 = vcmp.ge.f32.partialorder %v697_v51, 0.0  ;;  %v715_v56 = vmul.f32 0.2, %v697_v51 }
  0xd4   : > { %778 = vst.msk [vmem:[%s1203_s14 + $0x28] sm:$0xff] %vm772_vm4, %v768_v54  ;;  %v591_v59 = vpop.f32.mrf.mxu2 }
  0xd5   : > { %v412_v57 = vpop.f32.mrf.mxu0  ;;  %v724_v61 = vsel %vm706_vm10, %v697_v51, %v715_v56  ;;  %v605_v62 = vadd.f32 %v591_v59, %v461_v55 }
  0xd6   : > { %v465_v60 = vpop.f32.mrf.mxu1  ;;  %v733_v63 = vmul.f32 1.4142135, %v724_v61  ;;  %v464_v2 = vadd.f32 %v463_v45, %v412_v57 }
  0xd7   : > { %v685_v0 = vadd.f32 %v671_v53, %v605_v62 }
  0xd8   : > { %v760_v1 = vadd.f32 %v1017_v58, %v733_v63 }
  0xd9   : > { %v698_v3 = vadd.f32 %v1190_v26, %v685_v0 }
  0xda   : > { %v769_v5 = vmul.f32 0.70710677, %v760_v1 }
  0xdb   : > { %v674_v4 = vpop.f32.mrf.mxu3  ;;  %vm707_vm11 = vcmp.ge.f32.partialorder %v698_v3, 0.0  ;;  %v716_v6 = vmul.f32 0.2, %v698_v3 }
  0xdc   : > { %779 = vst.msk [vmem:[%s1203_s14 + $0x30] sm:$0xff] %vm772_vm4, %v769_v5  ;;  %v594_v9 = vpop.f32.mrf.mxu2 }
  0xdd   : > { %v414_v7 = vpop.f32.mrf.mxu0  ;;  %v725_v10 = vsel %vm707_vm11, %v698_v3, %v716_v6  ;;  %v606_v11 = vadd.f32 %v594_v9, %v464_v2 }
  0xde   : > { %v734_v12 = vmul.f32 1.4142135, %v725_v10 }
  0xdf   : > { %v686_v13 = vadd.f32 %v674_v4, %v606_v11 }
  0xe0   : > { %v761_v14 = vadd.f32 %v1018_v8, %v734_v12 }
  0xe1   : > { %v699_v15 = vadd.f32 %v1190_v26, %v686_v13 }
  0xe2   : > { %v770_v18 = vmul.f32 0.70710677, %v761_v14 }
  0xe3   : > { %v676_v17 = vpop.f32.mrf.mxu3  ;;  %vm708_vm12 = vcmp.ge.f32.partialorder %v699_v15, 0.0  ;;  %v717_v19 = vmul.f32 0.2, %v699_v15 }
  0xe4   : > { %780 = vst.msk [vmem:[%s1203_s14 + $0x38] sm:$0xff] %vm772_vm4, %v770_v18  ;;  %v596_v21 = vpop.f32.mrf.mxu2 }
  0xe5   : > { %v726_v22 = vsel %vm708_vm12, %v699_v15, %v717_v19 }
  0xe6   : > { %v735_v23 = vmul.f32 1.4142135, %v726_v22 }
  0xe8   : > { %v762_v24 = vadd.f32 %v753_v20, %v735_v23 }
  0xea   : > { %v771_v25 = vmul.f32 0.70710677, %v762_v24 }
  0xec   : > { %781 = vst.msk [vmem:[%s1203_s14 + $0x40] sm:$0xff] %vm772_vm4, %v771_v25 }
  0xed PF: > { %s14_s17 = sadd.s32 1, %s1075_s17   ;;  %s1249_s15 = smov %s1071_s16 }
  0xee   : > { %p11_p5 = scmp.ge.s32.totalorder %s14_s17, 4   ;;  %s1250_s16 = smov %s1252_s18 }
  0xf0   :  { %13 = sbr.rel (!%p11_p5) target bundleno = 2 (0x2), region = 78 }

</bundles_post_ra>
